<compile_context>
chip_gen: v6e
topology: v6e:2x2x1
jax: 0.10.0
libtpu: 0.0.40
codegen_flags: <defaults>
</compile_context>

<pallas_src>
import jax
import jax.numpy as jnp
from jax.experimental import pallas as pl
from jax.experimental.pallas import tpu as pltpu

OUT_LANES = 128  # lane-dense combined output width of the fused level kernel


# ---------------------------- helpers ----------------------------

def _round_up(x, m):
    return ((x + m - 1) // m) * m


def _row_tiles(m):
    """2 'parallel' row tiles when the split stays 8-sublane aligned (keeps
    both v7x TensorCores busy); otherwise one full-M tile (v5e/v6e: fewer
    grid steps)."""
    return 2 if (m >= 16 and m % 16 == 0) else 1


def _im2col3x3(x_nhwc, stride=1):
    """'same' 3x3 conv im2col slab, optionally stride-folded: only the kept
    output pixels are materialized.  Pure XLA data movement on tiny tensors
    (pad + strided slices + concat fuse into one gather)."""
    N, H, W, Cin = x_nhwc.shape
    s = stride
    Ho, Wo = H // s, W // s
    xp = jnp.pad(x_nhwc, ((0, 0), (1, 1), (1, 1), (0, 0)))
    taps = [xp[:, dy:dy + (Ho - 1) * s + 1:s, dx:dx + (Wo - 1) * s + 1:s, :]
            for dy in range(3) for dx in range(3)]
    col = jnp.concatenate(taps, axis=-1).reshape(N * Ho * Wo, 9 * Cin)
    return col.astype(jnp.bfloat16), (N, Ho, Wo)


# ---------------------------- Pallas kernels ----------------------------

def _mm_bias_relu_kernel(x_ref, w_ref, b_ref, o_ref):
    """(TM, K) @ (K, Cout) + bias, ReLU.  Stride-folded backbone convs."""
    acc = jnp.dot(x_ref[...], w_ref[...], preferred_element_type=jnp.float32)
    o_ref[...] = jnp.maximum(acc + b_ref[...], 0.0).astype(o_ref.dtype)


def _neck_head_fused_kernel(col_ref, w_ref, scale_ref, shift_ref,
                            wch_ref, bc_ref, bh_ref, o_ref):
    """One pyramid level, fully fused:
        feat = relu( (col @ W_conv) * bn_scale + bn_shift )        # neck conv3x3
        ch   = feat_bf16 @ [Wc | Wh]                               # ONE head dot
        heat = sigmoid(max(ch[:, :2] + bc))                        # HeatmapHead approx
        pred = heat * ch[:, 2:10] + bh                             # == (feat*heat)@Wh + bh
    Output is a single lane-dense (TM, 128) f32 slab:
        lanes [0:cc)     = neck feature (feeds the next pyramid level)
        lanes [cc:cc+8)  = box-head prediction
        lanes [cc+8:128) = zero padding (gives unmasked full-width stores)
    """
    cc = w_ref.shape[1]
    ncls = bc_ref.shape[1]
    co = bh_ref.shape[1]

    # Neck conv as one big-K MXU dot, accumulated in vregs (no VMEM scratch).
    y = jnp.dot(col_ref[...], w_ref[...], preferred_element_type=jnp.float32)
    feat = jnp.maximum(y * scale_ref[...] + shift_ref[...], 0.0)      # (TM, cc) f32

    # Fused contour + box-head matmul (single MXU push, independent of sigmoid).
    ch = jnp.dot(feat.astype(jnp.bfloat16), wch_ref[...],
                 preferred_element_type=jnp.float32)                  # (TM, ncls+co)
    c = ch[:, 0:ncls] + bc_ref[...]                                   # contour logits
    heat = jax.nn.sigmoid(jnp.maximum(c[:, 0:1], c[:, 1:2]))          # (TM, 1), VPU/EUP
    pred = heat * ch[:, ncls:ncls + co] + bh_ref[...]                 # (TM, co)

    pad_w = o_ref.shape[1] - cc - co
    parts = [feat, pred]
    if pad_w:
        parts.append(jnp.zeros((feat.shape[0], pad_w), jnp.float32))
    o_ref[...] = jnp.concatenate(parts, axis=-1)


# ---------------------------- wrappers ----------------------------

def conv3x3_bias_relu_strided(x_nhwc, w_hwio, b, stride):
    """3x3 'same' conv + ReLU followed by ::stride subsampling, computed as a
    strided conv: one (M, 9*Cin) @ (9*Cin, Cout) matmul over the kept pixels."""
    Cin = x_nhwc.shape[-1]
    Cout = w_hwio.shape[-1]
    col, (N, Ho, Wo) = _im2col3x3(x_nhwc, stride)
    wk = w_hwio.reshape(9 * Cin, Cout).astype(jnp.bfloat16)
    K = 9 * Cin
    Kp = _round_up(K, 16)                       # e.g. stem K = 27 -> 32
    if Kp != K:
        col = jnp.pad(col, ((0, 0), (0, Kp - K)))
        wk = jnp.pad(wk, ((0, Kp - K), (0, 0)))
    M = col.shape[0]
    nt = _row_tiles(M)
    tm = M // nt
    out = pl.pallas_call(
        _mm_bias_relu_kernel,
        grid=(nt,),
        out_shape=jax.ShapeDtypeStruct((M, Cout), jnp.bfloat16),
        in_specs=[
            pl.BlockSpec((tm, Kp), lambda i: (i, 0)),
            pl.BlockSpec((Kp, Cout), lambda i: (0, 0)),
            pl.BlockSpec((1, Cout), lambda i: (0, 0)),
        ],
        out_specs=pl.BlockSpec((tm, Cout), lambda i: (i, 0)),
        compiler_params=pltpu.CompilerParams(dimension_semantics=("parallel",)),
    )(col, wk, b.reshape(1, Cout).astype(jnp.float32))
    return out.reshape(N, Ho, Wo, Cout)


def neck_head_level(coarse_up, fine, w_hwio, scale, shift, wc, bc, wh, bh):
    """One pyramid level: neck conv3x3 (+ folded BN + ReLU) fused with the
    contour 1x1, sigmoid heat, gating and the box-head 1x1 in ONE pallas_call.

    coarse_up: upsampled coarser neck feature or None (topmost level).
    Returns (neck_feature (N,H,W,cc) bf16, boxes (N, H*W, 8) f32).
    """
    xin = fine if coarse_up is None else jnp.concatenate([coarse_up, fine], axis=-1)
    Cin = xin.shape[-1]
    cc = w_hwio.shape[-1]
    ncls = wc.shape[-1]
    co = wh.shape[-1]
    assert ncls == 2, "kernel assumes cls_num == 2 (as in the module)"

    col, (N, H, W) = _im2col3x3(xin, 1)
    wk = w_hwio.reshape(9 * Cin, cc).astype(jnp.bfloat16)
    K = 9 * Cin                                  # multiple of 16 for all levels
    M = N * H * W
    nt = _row_tiles(M)
    tm = M // nt
    wch = jnp.concatenate([wc, wh], axis=-1).astype(jnp.bfloat16)     # (cc, 10)

    out = pl.pallas_call(
        _neck_head_fused_kernel,
        grid=(nt,),
        out_shape=jax.ShapeDtypeStruct((M, OUT_LANES), jnp.float32),
        in_specs=[
            pl.BlockSpec((tm, K), lambda i: (i, 0)),
            pl.BlockSpec((K, cc), lambda i: (0, 0)),
            pl.BlockSpec((1, cc), lambda i: (0, 0)),
            pl.BlockSpec((1, cc), lambda i: (0, 0)),
            pl.BlockSpec((cc, ncls + co), lambda i: (0, 0)),
            pl.BlockSpec((1, ncls), lambda i: (0, 0)),
            pl.BlockSpec((1, co), lambda i: (0, 0)),
        ],
        out_specs=pl.BlockSpec((tm, OUT_LANES), lambda i: (i, 0)),
        compiler_params=pltpu.CompilerParams(dimension_semantics=("parallel",)),
    )(col, wk, scale.reshape(1, cc).astype(jnp.float32),
      shift.reshape(1, cc).astype(jnp.float32), wch,
      bc.reshape(1, ncls).astype(jnp.float32),
      bh.reshape(1, co).astype(jnp.float32))

    feat = out[:, :cc].astype(jnp.bfloat16).reshape(N, H, W, cc)
    pred = out[:, cc:cc + co].reshape(N, H * W, co)
    return feat, pred


# ---------------------------- parameters ----------------------------

def init_params(key):
    ks = iter(jax.random.split(key, 32))

    def conv_w(k, kh, kw, cin, cout):
        return (jax.random.normal(k, (kh, kw, cin, cout), jnp.float32)
                * (1.0 / jnp.sqrt(float(kh * kw * cin))))

    p = {}
    # synthetic backbone stand-in (see TODO in forward)
    p['l1_w'] = conv_w(next(ks), 3, 3, 3, 16);    p['l1_b'] = jnp.zeros((16,), jnp.float32)
    p['l2_w'] = conv_w(next(ks), 3, 3, 16, 32);   p['l2_b'] = jnp.zeros((32,), jnp.float32)
    p['l3_w'] = conv_w(next(ks), 3, 3, 32, 64);   p['l3_b'] = jnp.zeros((64,), jnp.float32)
    p['l4_w'] = conv_w(next(ks), 3, 3, 64, 128);  p['l4_b'] = jnp.zeros((128,), jnp.float32)

    cc = 32  # channel = min(feature_channels)
    for name, cin in (('neck3', 128), ('neck2', cc + 64), ('neck1', cc + 32)):
        p[name + '_w'] = conv_w(next(ks), 3, 3, cin, cc)
        p[name + '_b'] = jnp.zeros((cc,), jnp.float32)
        p[name + '_gamma'] = jnp.ones((cc,), jnp.float32)
        p[name + '_beta'] = jnp.zeros((cc,), jnp.float32)
        p[name + '_mean'] = jnp.zeros((cc,), jnp.float32)
        p[name + '_var'] = jnp.ones((cc,), jnp.float32)

    cls_num = 2
    for lvl in (2, 3, 4):
        p[f'contour{lvl}_w'] = conv_w(next(ks), 1, 1, cc, cls_num)[0, 0]     # (cc, 2)
        p[f'contour{lvl}_b'] = jnp.zeros((cls_num,), jnp.float32)
        p[f'head{lvl}_w'] = conv_w(next(ks), 1, 1, cc, 6 + cls_num)[0, 0]    # (cc, 8)
        p[f'head{lvl}_b'] = jnp.zeros((6 + cls_num,), jnp.float32)
    return p


# ---------------------------- forward ----------------------------

def one_stage_forward(params, x_nchw):
    """Eval-mode OneStage.forward(x, targets=None) -> (loss, boxes)."""
    p = params
    # NCHW -> NHWC, bf16 activations (f32 accumulation in every kernel).
    x = jnp.transpose(x_nchw, (0, 2, 3, 1)).astype(jnp.bfloat16)

    # --- backbone ---
    # TODO(synk): the real OneStage uses a pretrained torchvision resnet18;
    # replaced here by deterministic strided 3x3 conv+ReLU stages with the
    # same stride-8/16/32 feature pyramid structure.  The stride is folded
    # into the conv (numerically identical to conv-then-::s slicing).
    h  = conv3x3_bias_relu_strided(x,  p['l1_w'], p['l1_b'], 4)   # (N,16,16, 16)
    f2 = conv3x3_bias_relu_strided(h,  p['l2_w'], p['l2_b'], 2)   # (N, 8, 8, 32)
    f3 = conv3x3_bias_relu_strided(f2, p['l3_w'], p['l3_b'], 2)   # (N, 4, 4, 64)
    f4 = conv3x3_bias_relu_strided(f3, p['l4_w'], p['l4_b'], 2)   # (N, 2, 2,128)

    # --- FPN neck (Conv3x3 + BatchNorm(eval) + ReLU, BN folded) fused with
    #     contour/heat/gating/box-head per level: 3 pallas_calls total ---
    def bn_fold(name):
        eps = 1e-5
        scale = p[name + '_gamma'] / jnp.sqrt(p[name + '_var'] + eps)
        shift = p[name + '_beta'] + scale * (p[name + '_b'] - p[name + '_mean'])
        return scale, shift

    def up2(t):  # nearest-neighbour 2x; tiny tensors, kept in XLA.
        return jnp.repeat(jnp.repeat(t, 2, axis=1), 2, axis=2)

    s3, b3 = bn_fold('neck3')
    s2, b2 = bn_fold('neck2')
    s1, b1 = bn_fold('neck1')

    # Head/contour pairing is intentionally "crossed" to match the reference:
    # head2 consumes heat4-gated f4 (coarsest), head4 consumes heat2-gated f2.
    # TODO(synk): HeatmapHead is not defined in the source; its inference-time
    # heatmap is approximated as max-over-class sigmoid of the contour logits.
    # TODO(synk): DetectHeadWithWeight decode/loss is not defined in the source;
    # with targets=None the loss contribution is 0 and boxes are the raw
    # per-pixel 8-channel predictions flattened over the spatial grid.
    f4n, box2 = neck_head_level(None, f4, p['neck3_w'], s3, b3,
                                p['contour4_w'], p['contour4_b'],
                                p['head2_w'], p['head2_b'])        # (N,2,2,32), (N,4,8)
    f3n, box3 = neck_head_level(up2(f4n), f3, p['neck2_w'], s2, b2,
                                p['contour3_w'], p['contour3_b'],
                                p['head3_w'], p['head3_b'])        # (N,4,4,32), (N,16,8)
    _,   box4 = neck_head_level(up2(f3n), f2, p['neck1_w'], s1, b1,
                                p['contour2_w'], p['contour2_b'],
                                p['head4_w'], p['head4_b'])        # (N,8,8,32), (N,64,8)

    loss = jnp.zeros((), jnp.float32)  # all losses vanish with targets=None
    boxes = jnp.concatenate([box2, box3, box4], axis=1)    # (N, sum(H*W), 8)
    return loss, boxes


# ---------------------------- driver ----------------------------

if __name__ == "__main__":
    key = jax.random.PRNGKey(0)
    pkey, xkey = jax.random.split(key)
    params = init_params(pkey)
    x = jax.random.normal(xkey, (2, 3, 64, 64), jnp.float32)  # NCHW like PyTorch
    loss, boxes = jax.jit(one_stage_forward)(params, x)
    jax.block_until_ready((loss, boxes))
    assert boxes.shape == (2, 2 * 2 + 4 * 4 + 8 * 8, 8), boxes.shape
    assert loss.shape == ()
    print("KERNEL_OK")
</pallas_src>

<mosaic_0001>
module attributes {stable_mosaic.version = 11 : i64} {
  func.func @_mm_bias_relu_kernel(%arg0: i32, %arg1: memref<256x32xbf16, #tpu.memory_space<vmem>>, %arg2: memref<32x16xbf16, #tpu.memory_space<vmem>>, %arg3: memref<1x16xf32, #tpu.memory_space<vmem>>, %arg4: memref<256x16xbf16, #tpu.memory_space<vmem>>) attributes {dimension_semantics = [#tpu.dimension_semantics<parallel>], iteration_bounds = array<i64: 2>, scalar_prefetch = 0 : i64, scratch_operands = 0 : i64, tpu.core_type = #tpu.core_type<tc>, window_params = [{transform_indices = @transform_0, window_bounds = array<i64: 256, 32>}, {pipeline_mode = #tpu.pipeline_mode<synchronous>, transform_indices = @transform_1, window_bounds = array<i64: 32, 16>}, {pipeline_mode = #tpu.pipeline_mode<synchronous>, transform_indices = @transform_2, window_bounds = array<i64: 1, 16>}, {transform_indices = @transform_3, window_bounds = array<i64: 256, 16>}]} {
    %c0 = arith.constant 0 : index
    %c0_0 = arith.constant 0 : index
    %0 = vector.load %arg1[%c0, %c0_0] : memref<256x32xbf16, #tpu.memory_space<vmem>>, vector<256x32xbf16>
    %c0_1 = arith.constant 0 : index
    %c0_2 = arith.constant 0 : index
    %1 = vector.load %arg2[%c0_1, %c0_2] : memref<32x16xbf16, #tpu.memory_space<vmem>>, vector<32x16xbf16>
    %cst = arith.constant dense<0.000000e+00> : vector<256x16xf32>
    %2 = tpu.matmul %0, %1, %cst {dimension_numbers = #tpu.dot_dimension_numbers<[1], [0], [0], [1], [0, 0, 1, 1], [], []>} : vector<256x32xbf16>, vector<32x16xbf16>, vector<256x16xf32> -> vector<256x16xf32>
    %c0_3 = arith.constant 0 : index
    %c0_4 = arith.constant 0 : index
    %3 = vector.load %arg3[%c0_3, %c0_4] : memref<1x16xf32, #tpu.memory_space<vmem>>, vector<1x16xf32>
    %4 = vector.broadcast %3 : vector<1x16xf32> to vector<256x16xf32>
    %5 = arith.addf %2, %4 : vector<256x16xf32>
    %cst_5 = arith.constant 0.000000e+00 : f32
    %6 = vector.broadcast %cst_5 : f32 to vector<256x16xf32>
    %7 = arith.maximumf %5, %6 : vector<256x16xf32>
    %8 = arith.truncf %7 : vector<256x16xf32> to vector<256x16xbf16>
    %c0_6 = arith.constant 0 : index
    %c0_7 = arith.constant 0 : index
    %9 = vector.load %arg4[%c0_6, %c0_7] : memref<256x16xbf16, #tpu.memory_space<vmem>>, vector<256x16xbf16>
    tpu.vector_store %arg4[%c0_6, %c0_7], %8 {strides = array<i32>} : memref<256x16xbf16, #tpu.memory_space<vmem>>, vector<256x16xbf16>,
    return
  }
  func.func @transform_0(%arg0: i32) -> (i32, i32) {
    %c0_i32 = arith.constant 0 : i32
    %c0_i32_0 = arith.constant 0 : i32
    return %arg0, %c0_i32 : i32, i32
  }
  func.func @transform_1(%arg0: i32) -> (i32, i32) {
    %c0_i32 = arith.constant 0 : i32
    %c0_i32_0 = arith.constant 0 : i32
    %c0_i32_1 = arith.constant 0 : i32
    return %c0_i32, %c0_i32_0 : i32, i32
  }
  func.func @transform_2(%arg0: i32) -> (i32, i32) {
    %c0_i32 = arith.constant 0 : i32
    %c0_i32_0 = arith.constant 0 : i32
    %c0_i32_1 = arith.constant 0 : i32
    return %c0_i32, %c0_i32_0 : i32, i32
  }
  func.func @transform_3(%arg0: i32) -> (i32, i32) {
    %c0_i32 = arith.constant 0 : i32
    %c0_i32_0 = arith.constant 0 : i32
    return %arg0, %c0_i32 : i32, i32
  }
}

module attributes {stable_mosaic.version = 11 : i64} {
  func.func @_mm_bias_relu_kernel(%arg0: i32, %arg1: memref<64x144xbf16, #tpu.memory_space<vmem>>, %arg2: memref<144x32xbf16, #tpu.memory_space<vmem>>, %arg3: memref<1x32xf32, #tpu.memory_space<vmem>>, %arg4: memref<64x32xbf16, #tpu.memory_space<vmem>>) attributes {dimension_semantics = [#tpu.dimension_semantics<parallel>], iteration_bounds = array<i64: 2>, scalar_prefetch = 0 : i64, scratch_operands = 0 : i64, tpu.core_type = #tpu.core_type<tc>, window_params = [{transform_indices = @transform_0, window_bounds = array<i64: 64, 144>}, {pipeline_mode = #tpu.pipeline_mode<synchronous>, transform_indices = @transform_1, window_bounds = array<i64: 144, 32>}, {pipeline_mode = #tpu.pipeline_mode<synchronous>, transform_indices = @transform_2, window_bounds = array<i64: 1, 32>}, {transform_indices = @transform_3, window_bounds = array<i64: 64, 32>}]} {
    %c0 = arith.constant 0 : index
    %c0_0 = arith.constant 0 : index
    %0 = vector.load %arg1[%c0, %c0_0] : memref<64x144xbf16, #tpu.memory_space<vmem>>, vector<64x144xbf16>
    %c0_1 = arith.constant 0 : index
    %c0_2 = arith.constant 0 : index
    %1 = vector.load %arg2[%c0_1, %c0_2] : memref<144x32xbf16, #tpu.memory_space<vmem>>, vector<144x32xbf16>
    %cst = arith.constant dense<0.000000e+00> : vector<64x32xf32>
    %2 = tpu.matmul %0, %1, %cst {dimension_numbers = #tpu.dot_dimension_numbers<[1], [0], [0], [1], [0, 0, 1, 1], [], []>} : vector<64x144xbf16>, vector<144x32xbf16>, vector<64x32xf32> -> vector<64x32xf32>
    %c0_3 = arith.constant 0 : index
    %c0_4 = arith.constant 0 : index
    %3 = vector.load %arg3[%c0_3, %c0_4] : memref<1x32xf32, #tpu.memory_space<vmem>>, vector<1x32xf32>
    %4 = vector.broadcast %3 : vector<1x32xf32> to vector<64x32xf32>
    %5 = arith.addf %2, %4 : vector<64x32xf32>
    %cst_5 = arith.constant 0.000000e+00 : f32
    %6 = vector.broadcast %cst_5 : f32 to vector<64x32xf32>
    %7 = arith.maximumf %5, %6 : vector<64x32xf32>
    %8 = arith.truncf %7 : vector<64x32xf32> to vector<64x32xbf16>
    %c0_6 = arith.constant 0 : index
    %c0_7 = arith.constant 0 : index
    %9 = vector.load %arg4[%c0_6, %c0_7] : memref<64x32xbf16, #tpu.memory_space<vmem>>, vector<64x32xbf16>
    tpu.vector_store %arg4[%c0_6, %c0_7], %8 {strides = array<i32>} : memref<64x32xbf16, #tpu.memory_space<vmem>>, vector<64x32xbf16>,
    return
  }
  func.func @transform_0(%arg0: i32) -> (i32, i32) {
    %c0_i32 = arith.constant 0 : i32
    %c0_i32_0 = arith.constant 0 : i32
    return %arg0, %c0_i32 : i32, i32
  }
  func.func @transform_1(%arg0: i32) -> (i32, i32) {
    %c0_i32 = arith.constant 0 : i32
    %c0_i32_0 = arith.constant 0 : i32
    %c0_i32_1 = arith.constant 0 : i32
    return %c0_i32, %c0_i32_0 : i32, i32
  }
  func.func @transform_2(%arg0: i32) -> (i32, i32) {
    %c0_i32 = arith.constant 0 : i32
    %c0_i32_0 = arith.constant 0 : i32
    %c0_i32_1 = arith.constant 0 : i32
    return %c0_i32, %c0_i32_0 : i32, i32
  }
  func.func @transform_3(%arg0: i32) -> (i32, i32) {
    %c0_i32 = arith.constant 0 : i32
    %c0_i32_0 = arith.constant 0 : i32
    return %arg0, %c0_i32 : i32, i32
  }
}

module attributes {stable_mosaic.version = 11 : i64} {
  func.func @_mm_bias_relu_kernel(%arg0: i32, %arg1: memref<16x288xbf16, #tpu.memory_space<vmem>>, %arg2: memref<288x64xbf16, #tpu.memory_space<vmem>>, %arg3: memref<1x64xf32, #tpu.memory_space<vmem>>, %arg4: memref<16x64xbf16, #tpu.memory_space<vmem>>) attributes {dimension_semantics = [#tpu.dimension_semantics<parallel>], iteration_bounds = array<i64: 2>, scalar_prefetch = 0 : i64, scratch_operands = 0 : i64, tpu.core_type = #tpu.core_type<tc>, window_params = [{transform_indices = @transform_0, window_bounds = array<i64: 16, 288>}, {pipeline_mode = #tpu.pipeline_mode<synchronous>, transform_indices = @transform_1, window_bounds = array<i64: 288, 64>}, {pipeline_mode = #tpu.pipeline_mode<synchronous>, transform_indices = @transform_2, window_bounds = array<i64: 1, 64>}, {transform_indices = @transform_3, window_bounds = array<i64: 16, 64>}]} {
    %c0 = arith.constant 0 : index
    %c0_0 = arith.constant 0 : index
    %0 = vector.load %arg1[%c0, %c0_0] : memref<16x288xbf16, #tpu.memory_space<vmem>>, vector<16x288xbf16>
    %c0_1 = arith.constant 0 : index
    %c0_2 = arith.constant 0 : index
    %1 = vector.load %arg2[%c0_1, %c0_2] : memref<288x64xbf16, #tpu.memory_space<vmem>>, vector<288x64xbf16>
    %cst = arith.constant dense<0.000000e+00> : vector<16x64xf32>
    %2 = tpu.matmul %0, %1, %cst {dimension_numbers = #tpu.dot_dimension_numbers<[1], [0], [0], [1], [0, 0, 1, 1], [], []>} : vector<16x288xbf16>, vector<288x64xbf16>, vector<16x64xf32> -> vector<16x64xf32>
    %c0_3 = arith.constant 0 : index
    %c0_4 = arith.constant 0 : index
    %3 = vector.load %arg3[%c0_3, %c0_4] : memref<1x64xf32, #tpu.memory_space<vmem>>, vector<1x64xf32>
    %4 = vector.broadcast %3 : vector<1x64xf32> to vector<16x64xf32>
    %5 = arith.addf %2, %4 : vector<16x64xf32>
    %cst_5 = arith.constant 0.000000e+00 : f32
    %6 = vector.broadcast %cst_5 : f32 to vector<16x64xf32>
    %7 = arith.maximumf %5, %6 : vector<16x64xf32>
    %8 = arith.truncf %7 : vector<16x64xf32> to vector<16x64xbf16>
    %c0_6 = arith.constant 0 : index
    %c0_7 = arith.constant 0 : index
    %9 = vector.load %arg4[%c0_6, %c0_7] : memref<16x64xbf16, #tpu.memory_space<vmem>>, vector<16x64xbf16>
    tpu.vector_store %arg4[%c0_6, %c0_7], %8 {strides = array<i32>} : memref<16x64xbf16, #tpu.memory_space<vmem>>, vector<16x64xbf16>,
    return
  }
  func.func @transform_0(%arg0: i32) -> (i32, i32) {
    %c0_i32 = arith.constant 0 : i32
    %c0_i32_0 = arith.constant 0 : i32
    return %arg0, %c0_i32 : i32, i32
  }
  func.func @transform_1(%arg0: i32) -> (i32, i32) {
    %c0_i32 = arith.constant 0 : i32
    %c0_i32_0 = arith.constant 0 : i32
    %c0_i32_1 = arith.constant 0 : i32
    return %c0_i32, %c0_i32_0 : i32, i32
  }
  func.func @transform_2(%arg0: i32) -> (i32, i32) {
    %c0_i32 = arith.constant 0 : i32
    %c0_i32_0 = arith.constant 0 : i32
    %c0_i32_1 = arith.constant 0 : i32
    return %c0_i32, %c0_i32_0 : i32, i32
  }
  func.func @transform_3(%arg0: i32) -> (i32, i32) {
    %c0_i32 = arith.constant 0 : i32
    %c0_i32_0 = arith.constant 0 : i32
    return %arg0, %c0_i32 : i32, i32
  }
}

module attributes {stable_mosaic.version = 11 : i64} {
  func.func @_mm_bias_relu_kernel(%arg0: i32, %arg1: memref<8x576xbf16, #tpu.memory_space<vmem>>, %arg2: memref<576x128xbf16, #tpu.memory_space<vmem>>, %arg3: memref<1x128xf32, #tpu.memory_space<vmem>>, %arg4: memref<8x128xbf16, #tpu.memory_space<vmem>>) attributes {dimension_semantics = [#tpu.dimension_semantics<parallel>], iteration_bounds = array<i64: 1>, scalar_prefetch = 0 : i64, scratch_operands = 0 : i64, tpu.core_type = #tpu.core_type<tc>, window_params = [{transform_indices = @transform_0, window_bounds = array<i64: 8, 576>}, {pipeline_mode = #tpu.pipeline_mode<synchronous>, transform_indices = @transform_1, window_bounds = array<i64: 576, 128>}, {pipeline_mode = #tpu.pipeline_mode<synchronous>, transform_indices = @transform_2, window_bounds = array<i64: 1, 128>}, {transform_indices = @transform_3, window_bounds = array<i64: 8, 128>}]} {
    %c0 = arith.constant 0 : index
    %c0_0 = arith.constant 0 : index
    %0 = vector.load %arg1[%c0, %c0_0] : memref<8x576xbf16, #tpu.memory_space<vmem>>, vector<8x576xbf16>
    %c0_1 = arith.constant 0 : index
    %c0_2 = arith.constant 0 : index
    %1 = vector.load %arg2[%c0_1, %c0_2] : memref<576x128xbf16, #tpu.memory_space<vmem>>, vector<576x128xbf16>
    %cst = arith.constant dense<0.000000e+00> : vector<8x128xf32>
    %2 = tpu.matmul %0, %1, %cst {dimension_numbers = #tpu.dot_dimension_numbers<[1], [0], [0], [1], [0, 0, 1, 1], [], []>} : vector<8x576xbf16>, vector<576x128xbf16>, vector<8x128xf32> -> vector<8x128xf32>
    %c0_3 = arith.constant 0 : index
    %c0_4 = arith.constant 0 : index
    %3 = vector.load %arg3[%c0_3, %c0_4] : memref<1x128xf32, #tpu.memory_space<vmem>>, vector<1x128xf32>
    %4 = vector.broadcast %3 : vector<1x128xf32> to vector<8x128xf32>
    %5 = arith.addf %2, %4 : vector<8x128xf32>
    %cst_5 = arith.constant 0.000000e+00 : f32
    %6 = vector.broadcast %cst_5 : f32 to vector<8x128xf32>
    %7 = arith.maximumf %5, %6 : vector<8x128xf32>
    %8 = arith.truncf %7 : vector<8x128xf32> to vector<8x128xbf16>
    %c0_6 = arith.constant 0 : index
    %c0_7 = arith.constant 0 : index
    %9 = vector.load %arg4[%c0_6, %c0_7] : memref<8x128xbf16, #tpu.memory_space<vmem>>, vector<8x128xbf16>
    tpu.vector_store %arg4[%c0_6, %c0_7], %8 {strides = array<i32>} : memref<8x128xbf16, #tpu.memory_space<vmem>>, vector<8x128xbf16>,
    return
  }
  func.func @transform_0(%arg0: i32) -> (i32, i32) {
    %c0_i32 = arith.constant 0 : i32
    %c0_i32_0 = arith.constant 0 : i32
    return %arg0, %c0_i32 : i32, i32
  }
  func.func @transform_1(%arg0: i32) -> (i32, i32) {
    %c0_i32 = arith.constant 0 : i32
    %c0_i32_0 = arith.constant 0 : i32
    %c0_i32_1 = arith.constant 0 : i32
    return %c0_i32, %c0_i32_0 : i32, i32
  }
  func.func @transform_2(%arg0: i32) -> (i32, i32) {
    %c0_i32 = arith.constant 0 : i32
    %c0_i32_0 = arith.constant 0 : i32
    %c0_i32_1 = arith.constant 0 : i32
    return %c0_i32, %c0_i32_0 : i32, i32
  }
  func.func @transform_3(%arg0: i32) -> (i32, i32) {
    %c0_i32 = arith.constant 0 : i32
    %c0_i32_0 = arith.constant 0 : i32
    return %arg0, %c0_i32 : i32, i32
  }
}

module attributes {stable_mosaic.version = 11 : i64} {
  func.func @_neck_head_fused_kernel(%arg0: i32, %arg1: memref<8x1152xbf16, #tpu.memory_space<vmem>>, %arg2: memref<1152x32xbf16, #tpu.memory_space<vmem>>, %arg3: memref<1x32xf32, #tpu.memory_space<vmem>>, %arg4: memref<1x32xf32, #tpu.memory_space<vmem>>, %arg5: memref<32x10xbf16, #tpu.memory_space<vmem>>, %arg6: memref<1x2xf32, #tpu.memory_space<vmem>>, %arg7: memref<1x8xf32, #tpu.memory_space<vmem>>, %arg8: memref<8x128xf32, #tpu.memory_space<vmem>>) attributes {dimension_semantics = [#tpu.dimension_semantics<parallel>], iteration_bounds = array<i64: 1>, scalar_prefetch = 0 : i64, scratch_operands = 0 : i64, tpu.core_type = #tpu.core_type<tc>, window_params = [{transform_indices = @transform_0, window_bounds = array<i64: 8, 1152>}, {pipeline_mode = #tpu.pipeline_mode<synchronous>, transform_indices = @transform_1, window_bounds = array<i64: 1152, 32>}, {pipeline_mode = #tpu.pipeline_mode<synchronous>, transform_indices = @transform_2, window_bounds = array<i64: 1, 32>}, {pipeline_mode = #tpu.pipeline_mode<synchronous>, transform_indices = @transform_3, window_bounds = array<i64: 1, 32>}, {pipeline_mode = #tpu.pipeline_mode<synchronous>, transform_indices = @transform_4, window_bounds = array<i64: 32, 10>}, {pipeline_mode = #tpu.pipeline_mode<synchronous>, transform_indices = @transform_5, window_bounds = array<i64: 1, 2>}, {pipeline_mode = #tpu.pipeline_mode<synchronous>, transform_indices = @transform_6, window_bounds = array<i64: 1, 8>}, {transform_indices = @transform_7, window_bounds = array<i64: 8, 128>}]} {
    %c0 = arith.constant 0 : index
    %c0_0 = arith.constant 0 : index
    %0 = vector.load %arg1[%c0, %c0_0] : memref<8x1152xbf16, #tpu.memory_space<vmem>>, vector<8x1152xbf16>
    %c0_1 = arith.constant 0 : index
    %c0_2 = arith.constant 0 : index
    %1 = vector.load %arg2[%c0_1, %c0_2] : memref<1152x32xbf16, #tpu.memory_space<vmem>>, vector<1152x32xbf16>
    %cst = arith.constant dense<0.000000e+00> : vector<8x32xf32>
    %2 = tpu.matmul %0, %1, %cst {dimension_numbers = #tpu.dot_dimension_numbers<[1], [0], [0], [1], [0, 0, 1, 1], [], []>} : vector<8x1152xbf16>, vector<1152x32xbf16>, vector<8x32xf32> -> vector<8x32xf32>
    %c0_3 = arith.constant 0 : index
    %c0_4 = arith.constant 0 : index
    %3 = vector.load %arg3[%c0_3, %c0_4] : memref<1x32xf32, #tpu.memory_space<vmem>>, vector<1x32xf32>
    %4 = vector.broadcast %3 : vector<1x32xf32> to vector<8x32xf32>
    %5 = arith.mulf %2, %4 : vector<8x32xf32>
    %c0_5 = arith.constant 0 : index
    %c0_6 = arith.constant 0 : index
    %6 = vector.load %arg4[%c0_5, %c0_6] : memref<1x32xf32, #tpu.memory_space<vmem>>, vector<1x32xf32>
    %7 = vector.broadcast %6 : vector<1x32xf32> to vector<8x32xf32>
    %8 = arith.addf %5, %7 : vector<8x32xf32>
    %cst_7 = arith.constant 0.000000e+00 : f32
    %9 = vector.broadcast %cst_7 : f32 to vector<8x32xf32>
    %10 = arith.maximumf %8, %9 : vector<8x32xf32>
    %11 = arith.truncf %10 : vector<8x32xf32> to vector<8x32xbf16>
    %c0_8 = arith.constant 0 : index
    %c0_9 = arith.constant 0 : index
    %12 = vector.load %arg5[%c0_8, %c0_9] : memref<32x10xbf16, #tpu.memory_space<vmem>>, vector<32x10xbf16>
    %cst_10 = arith.constant dense<0.000000e+00> : vector<8x10xf32>
    %13 = tpu.matmul %11, %12, %cst_10 {dimension_numbers = #tpu.dot_dimension_numbers<[1], [0], [0], [1], [0, 0, 1, 1], [], []>} : vector<8x32xbf16>, vector<32x10xbf16>, vector<8x10xf32> -> vector<8x10xf32>
    %14 = vector.extract_strided_slice %13 {offsets = [0, 0], sizes = [8, 2], strides = [1, 1]} : vector<8x10xf32> to vector<8x2xf32>
    %c0_11 = arith.constant 0 : index
    %c0_12 = arith.constant 0 : index
    %15 = vector.load %arg6[%c0_11, %c0_12] : memref<1x2xf32, #tpu.memory_space<vmem>>, vector<1x2xf32>
    %16 = vector.broadcast %15 : vector<1x2xf32> to vector<8x2xf32>
    %17 = arith.addf %14, %16 : vector<8x2xf32>
    %18 = vector.extract_strided_slice %17 {offsets = [0, 0], sizes = [8, 1], strides = [1, 1]} : vector<8x2xf32> to vector<8x1xf32>
    %19 = vector.extract_strided_slice %17 {offsets = [0, 1], sizes = [8, 1], strides = [1, 1]} : vector<8x2xf32> to vector<8x1xf32>
    %20 = arith.maximumf %18, %19 : vector<8x1xf32>
    %21 = arith.negf %20 : vector<8x1xf32>
    %22 = math.exp %21 : vector<8x1xf32>
    %cst_13 = arith.constant 1.000000e+00 : f32
    %23 = vector.broadcast %cst_13 : f32 to vector<8x1xf32>
    %24 = arith.addf %23, %22 : vector<8x1xf32>
    %25 = arith.divf %23, %24 : vector<8x1xf32>
    %26 = vector.extract_strided_slice %13 {offsets = [0, 2], sizes = [8, 8], strides = [1, 1]} : vector<8x10xf32> to vector<8x8xf32>
    %27 = vector.broadcast %25 : vector<8x1xf32> to vector<8x8xf32>
    %28 = arith.mulf %27, %26 : vector<8x8xf32>
    %c0_14 = arith.constant 0 : index
    %c0_15 = arith.constant 0 : index
    %29 = vector.load %arg7[%c0_14, %c0_15] : memref<1x8xf32, #tpu.memory_space<vmem>>, vector<1x8xf32>
    %30 = vector.broadcast %29 : vector<1x8xf32> to vector<8x8xf32>
    %31 = arith.addf %28, %30 : vector<8x8xf32>
    %cst_16 = arith.constant 0.000000e+00 : f32
    %32 = vector.broadcast %cst_16 : f32 to vector<8x88xf32>
    %33 = tpu.concatenate %10, %31, %32 in 1 : vector<8x32xf32>, vector<8x8xf32>, vector<8x88xf32> -> vector<8x128xf32>
    %c0_17 = arith.constant 0 : index
    %c0_18 = arith.constant 0 : index
    %34 = vector.load %arg8[%c0_17, %c0_18] : memref<8x128xf32, #tpu.memory_space<vmem>>, vector<8x128xf32>
    tpu.vector_store %arg8[%c0_17, %c0_18], %33 {strides = array<i32>} : memref<8x128xf32, #tpu.memory_space<vmem>>, vector<8x128xf32>,
    return
  }
  func.func @transform_0(%arg0: i32) -> (i32, i32) {
    %c0_i32 = arith.constant 0 : i32
    %c0_i32_0 = arith.constant 0 : i32
    return %arg0, %c0_i32 : i32, i32
  }
  func.func @transform_1(%arg0: i32) -> (i32, i32) {
    %c0_i32 = arith.constant 0 : i32
    %c0_i32_0 = arith.constant 0 : i32
    %c0_i32_1 = arith.constant 0 : i32
    return %c0_i32, %c0_i32_0 : i32, i32
  }
  func.func @transform_2(%arg0: i32) -> (i32, i32) {
    %c0_i32 = arith.constant 0 : i32
    %c0_i32_0 = arith.constant 0 : i32
    %c0_i32_1 = arith.constant 0 : i32
    return %c0_i32, %c0_i32_0 : i32, i32
  }
  func.func @transform_3(%arg0: i32) -> (i32, i32) {
    %c0_i32 = arith.constant 0 : i32
    %c0_i32_0 = arith.constant 0 : i32
    %c0_i32_1 = arith.constant 0 : i32
    return %c0_i32, %c0_i32_0 : i32, i32
  }
  func.func @transform_4(%arg0: i32) -> (i32, i32) {
    %c0_i32 = arith.constant 0 : i32
    %c0_i32_0 = arith.constant 0 : i32
    %c0_i32_1 = arith.constant 0 : i32
    return %c0_i32, %c0_i32_0 : i32, i32
  }
  func.func @transform_5(%arg0: i32) -> (i32, i32) {
    %c0_i32 = arith.constant 0 : i32
    %c0_i32_0 = arith.constant 0 : i32
    %c0_i32_1 = arith.constant 0 : i32
    return %c0_i32, %c0_i32_0 : i32, i32
  }
  func.func @transform_6(%arg0: i32) -> (i32, i32) {
    %c0_i32 = arith.constant 0 : i32
    %c0_i32_0 = arith.constant 0 : i32
    %c0_i32_1 = arith.constant 0 : i32
    return %c0_i32, %c0_i32_0 : i32, i32
  }
  func.func @transform_7(%arg0: i32) -> (i32, i32) {
    %c0_i32 = arith.constant 0 : i32
    %c0_i32_0 = arith.constant 0 : i32
    return %arg0, %c0_i32 : i32, i32
  }
}

module attributes {stable_mosaic.version = 11 : i64} {
  func.func @_neck_head_fused_kernel(%arg0: i32, %arg1: memref<16x864xbf16, #tpu.memory_space<vmem>>, %arg2: memref<864x32xbf16, #tpu.memory_space<vmem>>, %arg3: memref<1x32xf32, #tpu.memory_space<vmem>>, %arg4: memref<1x32xf32, #tpu.memory_space<vmem>>, %arg5: memref<32x10xbf16, #tpu.memory_space<vmem>>, %arg6: memref<1x2xf32, #tpu.memory_space<vmem>>, %arg7: memref<1x8xf32, #tpu.memory_space<vmem>>, %arg8: memref<16x128xf32, #tpu.memory_space<vmem>>) attributes {dimension_semantics = [#tpu.dimension_semantics<parallel>], iteration_bounds = array<i64: 2>, scalar_prefetch = 0 : i64, scratch_operands = 0 : i64, tpu.core_type = #tpu.core_type<tc>, window_params = [{transform_indices = @transform_0, window_bounds = array<i64: 16, 864>}, {pipeline_mode = #tpu.pipeline_mode<synchronous>, transform_indices = @transform_1, window_bounds = array<i64: 864, 32>}, {pipeline_mode = #tpu.pipeline_mode<synchronous>, transform_indices = @transform_2, window_bounds = array<i64: 1, 32>}, {pipeline_mode = #tpu.pipeline_mode<synchronous>, transform_indices = @transform_3, window_bounds = array<i64: 1, 32>}, {pipeline_mode = #tpu.pipeline_mode<synchronous>, transform_indices = @transform_4, window_bounds = array<i64: 32, 10>}, {pipeline_mode = #tpu.pipeline_mode<synchronous>, transform_indices = @transform_5, window_bounds = array<i64: 1, 2>}, {pipeline_mode = #tpu.pipeline_mode<synchronous>, transform_indices = @transform_6, window_bounds = array<i64: 1, 8>}, {transform_indices = @transform_7, window_bounds = array<i64: 16, 128>}]} {
    %c0 = arith.constant 0 : index
    %c0_0 = arith.constant 0 : index
    %0 = vector.load %arg1[%c0, %c0_0] : memref<16x864xbf16, #tpu.memory_space<vmem>>, vector<16x864xbf16>
    %c0_1 = arith.constant 0 : index
    %c0_2 = arith.constant 0 : index
    %1 = vector.load %arg2[%c0_1, %c0_2] : memref<864x32xbf16, #tpu.memory_space<vmem>>, vector<864x32xbf16>
    %cst = arith.constant dense<0.000000e+00> : vector<16x32xf32>
    %2 = tpu.matmul %0, %1, %cst {dimension_numbers = #tpu.dot_dimension_numbers<[1], [0], [0], [1], [0, 0, 1, 1], [], []>} : vector<16x864xbf16>, vector<864x32xbf16>, vector<16x32xf32> -> vector<16x32xf32>
    %c0_3 = arith.constant 0 : index
    %c0_4 = arith.constant 0 : index
    %3 = vector.load %arg3[%c0_3, %c0_4] : memref<1x32xf32, #tpu.memory_space<vmem>>, vector<1x32xf32>
    %4 = vector.broadcast %3 : vector<1x32xf32> to vector<16x32xf32>
    %5 = arith.mulf %2, %4 : vector<16x32xf32>
    %c0_5 = arith.constant 0 : index
    %c0_6 = arith.constant 0 : index
    %6 = vector.load %arg4[%c0_5, %c0_6] : memref<1x32xf32, #tpu.memory_space<vmem>>, vector<1x32xf32>
    %7 = vector.broadcast %6 : vector<1x32xf32> to vector<16x32xf32>
    %8 = arith.addf %5, %7 : vector<16x32xf32>
    %cst_7 = arith.constant 0.000000e+00 : f32
    %9 = vector.broadcast %cst_7 : f32 to vector<16x32xf32>
    %10 = arith.maximumf %8, %9 : vector<16x32xf32>
    %11 = arith.truncf %10 : vector<16x32xf32> to vector<16x32xbf16>
    %c0_8 = arith.constant 0 : index
    %c0_9 = arith.constant 0 : index
    %12 = vector.load %arg5[%c0_8, %c0_9] : memref<32x10xbf16, #tpu.memory_space<vmem>>, vector<32x10xbf16>
    %cst_10 = arith.constant dense<0.000000e+00> : vector<16x10xf32>
    %13 = tpu.matmul %11, %12, %cst_10 {dimension_numbers = #tpu.dot_dimension_numbers<[1], [0], [0], [1], [0, 0, 1, 1], [], []>} : vector<16x32xbf16>, vector<32x10xbf16>, vector<16x10xf32> -> vector<16x10xf32>
    %14 = vector.extract_strided_slice %13 {offsets = [0, 0], sizes = [16, 2], strides = [1, 1]} : vector<16x10xf32> to vector<16x2xf32>
    %c0_11 = arith.constant 0 : index
    %c0_12 = arith.constant 0 : index
    %15 = vector.load %arg6[%c0_11, %c0_12] : memref<1x2xf32, #tpu.memory_space<vmem>>, vector<1x2xf32>
    %16 = vector.broadcast %15 : vector<1x2xf32> to vector<16x2xf32>
    %17 = arith.addf %14, %16 : vector<16x2xf32>
    %18 = vector.extract_strided_slice %17 {offsets = [0, 0], sizes = [16, 1], strides = [1, 1]} : vector<16x2xf32> to vector<16x1xf32>
    %19 = vector.extract_strided_slice %17 {offsets = [0, 1], sizes = [16, 1], strides = [1, 1]} : vector<16x2xf32> to vector<16x1xf32>
    %20 = arith.maximumf %18, %19 : vector<16x1xf32>
    %21 = arith.negf %20 : vector<16x1xf32>
    %22 = math.exp %21 : vector<16x1xf32>
    %cst_13 = arith.constant 1.000000e+00 : f32
    %23 = vector.broadcast %cst_13 : f32 to vector<16x1xf32>
    %24 = arith.addf %23, %22 : vector<16x1xf32>
    %25 = arith.divf %23, %24 : vector<16x1xf32>
    %26 = vector.extract_strided_slice %13 {offsets = [0, 2], sizes = [16, 8], strides = [1, 1]} : vector<16x10xf32> to vector<16x8xf32>
    %27 = vector.broadcast %25 : vector<16x1xf32> to vector<16x8xf32>
    %28 = arith.mulf %27, %26 : vector<16x8xf32>
    %c0_14 = arith.constant 0 : index
    %c0_15 = arith.constant 0 : index
    %29 = vector.load %arg7[%c0_14, %c0_15] : memref<1x8xf32, #tpu.memory_space<vmem>>, vector<1x8xf32>
    %30 = vector.broadcast %29 : vector<1x8xf32> to vector<16x8xf32>
    %31 = arith.addf %28, %30 : vector<16x8xf32>
    %cst_16 = arith.constant 0.000000e+00 : f32
    %32 = vector.broadcast %cst_16 : f32 to vector<16x88xf32>
    %33 = tpu.concatenate %10, %31, %32 in 1 : vector<16x32xf32>, vector<16x8xf32>, vector<16x88xf32> -> vector<16x128xf32>
    %c0_17 = arith.constant 0 : index
    %c0_18 = arith.constant 0 : index
    %34 = vector.load %arg8[%c0_17, %c0_18] : memref<16x128xf32, #tpu.memory_space<vmem>>, vector<16x128xf32>
    tpu.vector_store %arg8[%c0_17, %c0_18], %33 {strides = array<i32>} : memref<16x128xf32, #tpu.memory_space<vmem>>, vector<16x128xf32>,
    return
  }
  func.func @transform_0(%arg0: i32) -> (i32, i32) {
    %c0_i32 = arith.constant 0 : i32
    %c0_i32_0 = arith.constant 0 : i32
    return %arg0, %c0_i32 : i32, i32
  }
  func.func @transform_1(%arg0: i32) -> (i32, i32) {
    %c0_i32 = arith.constant 0 : i32
    %c0_i32_0 = arith.constant 0 : i32
    %c0_i32_1 = arith.constant 0 : i32
    return %c0_i32, %c0_i32_0 : i32, i32
  }
  func.func @transform_2(%arg0: i32) -> (i32, i32) {
    %c0_i32 = arith.constant 0 : i32
    %c0_i32_0 = arith.constant 0 : i32
    %c0_i32_1 = arith.constant 0 : i32
    return %c0_i32, %c0_i32_0 : i32, i32
  }
  func.func @transform_3(%arg0: i32) -> (i32, i32) {
    %c0_i32 = arith.constant 0 : i32
    %c0_i32_0 = arith.constant 0 : i32
    %c0_i32_1 = arith.constant 0 : i32
    return %c0_i32, %c0_i32_0 : i32, i32
  }
  func.func @transform_4(%arg0: i32) -> (i32, i32) {
    %c0_i32 = arith.constant 0 : i32
    %c0_i32_0 = arith.constant 0 : i32
    %c0_i32_1 = arith.constant 0 : i32
    return %c0_i32, %c0_i32_0 : i32, i32
  }
  func.func @transform_5(%arg0: i32) -> (i32, i32) {
    %c0_i32 = arith.constant 0 : i32
    %c0_i32_0 = arith.constant 0 : i32
    %c0_i32_1 = arith.constant 0 : i32
    return %c0_i32, %c0_i32_0 : i32, i32
  }
  func.func @transform_6(%arg0: i32) -> (i32, i32) {
    %c0_i32 = arith.constant 0 : i32
    %c0_i32_0 = arith.constant 0 : i32
    %c0_i32_1 = arith.constant 0 : i32
    return %c0_i32, %c0_i32_0 : i32, i32
  }
  func.func @transform_7(%arg0: i32) -> (i32, i32) {
    %c0_i32 = arith.constant 0 : i32
    %c0_i32_0 = arith.constant 0 : i32
    return %arg0, %c0_i32 : i32, i32
  }
}

module attributes {stable_mosaic.version = 11 : i64} {
  func.func @_neck_head_fused_kernel(%arg0: i32, %arg1: memref<64x576xbf16, #tpu.memory_space<vmem>>, %arg2: memref<576x32xbf16, #tpu.memory_space<vmem>>, %arg3: memref<1x32xf32, #tpu.memory_space<vmem>>, %arg4: memref<1x32xf32, #tpu.memory_space<vmem>>, %arg5: memref<32x10xbf16, #tpu.memory_space<vmem>>, %arg6: memref<1x2xf32, #tpu.memory_space<vmem>>, %arg7: memref<1x8xf32, #tpu.memory_space<vmem>>, %arg8: memref<64x128xf32, #tpu.memory_space<vmem>>) attributes {dimension_semantics = [#tpu.dimension_semantics<parallel>], iteration_bounds = array<i64: 2>, scalar_prefetch = 0 : i64, scratch_operands = 0 : i64, tpu.core_type = #tpu.core_type<tc>, window_params = [{transform_indices = @transform_0, window_bounds = array<i64: 64, 576>}, {pipeline_mode = #tpu.pipeline_mode<synchronous>, transform_indices = @transform_1, window_bounds = array<i64: 576, 32>}, {pipeline_mode = #tpu.pipeline_mode<synchronous>, transform_indices = @transform_2, window_bounds = array<i64: 1, 32>}, {pipeline_mode = #tpu.pipeline_mode<synchronous>, transform_indices = @transform_3, window_bounds = array<i64: 1, 32>}, {pipeline_mode = #tpu.pipeline_mode<synchronous>, transform_indices = @transform_4, window_bounds = array<i64: 32, 10>}, {pipeline_mode = #tpu.pipeline_mode<synchronous>, transform_indices = @transform_5, window_bounds = array<i64: 1, 2>}, {pipeline_mode = #tpu.pipeline_mode<synchronous>, transform_indices = @transform_6, window_bounds = array<i64: 1, 8>}, {transform_indices = @transform_7, window_bounds = array<i64: 64, 128>}]} {
    %c0 = arith.constant 0 : index
    %c0_0 = arith.constant 0 : index
    %0 = vector.load %arg1[%c0, %c0_0] : memref<64x576xbf16, #tpu.memory_space<vmem>>, vector<64x576xbf16>
    %c0_1 = arith.constant 0 : index
    %c0_2 = arith.constant 0 : index
    %1 = vector.load %arg2[%c0_1, %c0_2] : memref<576x32xbf16, #tpu.memory_space<vmem>>, vector<576x32xbf16>
    %cst = arith.constant dense<0.000000e+00> : vector<64x32xf32>
    %2 = tpu.matmul %0, %1, %cst {dimension_numbers = #tpu.dot_dimension_numbers<[1], [0], [0], [1], [0, 0, 1, 1], [], []>} : vector<64x576xbf16>, vector<576x32xbf16>, vector<64x32xf32> -> vector<64x32xf32>
    %c0_3 = arith.constant 0 : index
    %c0_4 = arith.constant 0 : index
    %3 = vector.load %arg3[%c0_3, %c0_4] : memref<1x32xf32, #tpu.memory_space<vmem>>, vector<1x32xf32>
    %4 = vector.broadcast %3 : vector<1x32xf32> to vector<64x32xf32>
    %5 = arith.mulf %2, %4 : vector<64x32xf32>
    %c0_5 = arith.constant 0 : index
    %c0_6 = arith.constant 0 : index
    %6 = vector.load %arg4[%c0_5, %c0_6] : memref<1x32xf32, #tpu.memory_space<vmem>>, vector<1x32xf32>
    %7 = vector.broadcast %6 : vector<1x32xf32> to vector<64x32xf32>
    %8 = arith.addf %5, %7 : vector<64x32xf32>
    %cst_7 = arith.constant 0.000000e+00 : f32
    %9 = vector.broadcast %cst_7 : f32 to vector<64x32xf32>
    %10 = arith.maximumf %8, %9 : vector<64x32xf32>
    %11 = arith.truncf %10 : vector<64x32xf32> to vector<64x32xbf16>
    %c0_8 = arith.constant 0 : index
    %c0_9 = arith.constant 0 : index
    %12 = vector.load %arg5[%c0_8, %c0_9] : memref<32x10xbf16, #tpu.memory_space<vmem>>, vector<32x10xbf16>
    %cst_10 = arith.constant dense<0.000000e+00> : vector<64x10xf32>
    %13 = tpu.matmul %11, %12, %cst_10 {dimension_numbers = #tpu.dot_dimension_numbers<[1], [0], [0], [1], [0, 0, 1, 1], [], []>} : vector<64x32xbf16>, vector<32x10xbf16>, vector<64x10xf32> -> vector<64x10xf32>
    %14 = vector.extract_strided_slice %13 {offsets = [0, 0], sizes = [64, 2], strides = [1, 1]} : vector<64x10xf32> to vector<64x2xf32>
    %c0_11 = arith.constant 0 : index
    %c0_12 = arith.constant 0 : index
    %15 = vector.load %arg6[%c0_11, %c0_12] : memref<1x2xf32, #tpu.memory_space<vmem>>, vector<1x2xf32>
    %16 = vector.broadcast %15 : vector<1x2xf32> to vector<64x2xf32>
    %17 = arith.addf %14, %16 : vector<64x2xf32>
    %18 = vector.extract_strided_slice %17 {offsets = [0, 0], sizes = [64, 1], strides = [1, 1]} : vector<64x2xf32> to vector<64x1xf32>
    %19 = vector.extract_strided_slice %17 {offsets = [0, 1], sizes = [64, 1], strides = [1, 1]} : vector<64x2xf32> to vector<64x1xf32>
    %20 = arith.maximumf %18, %19 : vector<64x1xf32>
    %21 = arith.negf %20 : vector<64x1xf32>
    %22 = math.exp %21 : vector<64x1xf32>
    %cst_13 = arith.constant 1.000000e+00 : f32
    %23 = vector.broadcast %cst_13 : f32 to vector<64x1xf32>
    %24 = arith.addf %23, %22 : vector<64x1xf32>
    %25 = arith.divf %23, %24 : vector<64x1xf32>
    %26 = vector.extract_strided_slice %13 {offsets = [0, 2], sizes = [64, 8], strides = [1, 1]} : vector<64x10xf32> to vector<64x8xf32>
    %27 = vector.broadcast %25 : vector<64x1xf32> to vector<64x8xf32>
    %28 = arith.mulf %27, %26 : vector<64x8xf32>
    %c0_14 = arith.constant 0 : index
    %c0_15 = arith.constant 0 : index
    %29 = vector.load %arg7[%c0_14, %c0_15] : memref<1x8xf32, #tpu.memory_space<vmem>>, vector<1x8xf32>
    %30 = vector.broadcast %29 : vector<1x8xf32> to vector<64x8xf32>
    %31 = arith.addf %28, %30 : vector<64x8xf32>
    %cst_16 = arith.constant 0.000000e+00 : f32
    %32 = vector.broadcast %cst_16 : f32 to vector<64x88xf32>
    %33 = tpu.concatenate %10, %31, %32 in 1 : vector<64x32xf32>, vector<64x8xf32>, vector<64x88xf32> -> vector<64x128xf32>
    %c0_17 = arith.constant 0 : index
    %c0_18 = arith.constant 0 : index
    %34 = vector.load %arg8[%c0_17, %c0_18] : memref<64x128xf32, #tpu.memory_space<vmem>>, vector<64x128xf32>
    tpu.vector_store %arg8[%c0_17, %c0_18], %33 {strides = array<i32>} : memref<64x128xf32, #tpu.memory_space<vmem>>, vector<64x128xf32>,
    return
  }
  func.func @transform_0(%arg0: i32) -> (i32, i32) {
    %c0_i32 = arith.constant 0 : i32
    %c0_i32_0 = arith.constant 0 : i32
    return %arg0, %c0_i32 : i32, i32
  }
  func.func @transform_1(%arg0: i32) -> (i32, i32) {
    %c0_i32 = arith.constant 0 : i32
    %c0_i32_0 = arith.constant 0 : i32
    %c0_i32_1 = arith.constant 0 : i32
    return %c0_i32, %c0_i32_0 : i32, i32
  }
  func.func @transform_2(%arg0: i32) -> (i32, i32) {
    %c0_i32 = arith.constant 0 : i32
    %c0_i32_0 = arith.constant 0 : i32
    %c0_i32_1 = arith.constant 0 : i32
    return %c0_i32, %c0_i32_0 : i32, i32
  }
  func.func @transform_3(%arg0: i32) -> (i32, i32) {
    %c0_i32 = arith.constant 0 : i32
    %c0_i32_0 = arith.constant 0 : i32
    %c0_i32_1 = arith.constant 0 : i32
    return %c0_i32, %c0_i32_0 : i32, i32
  }
  func.func @transform_4(%arg0: i32) -> (i32, i32) {
    %c0_i32 = arith.constant 0 : i32
    %c0_i32_0 = arith.constant 0 : i32
    %c0_i32_1 = arith.constant 0 : i32
    return %c0_i32, %c0_i32_0 : i32, i32
  }
  func.func @transform_5(%arg0: i32) -> (i32, i32) {
    %c0_i32 = arith.constant 0 : i32
    %c0_i32_0 = arith.constant 0 : i32
    %c0_i32_1 = arith.constant 0 : i32
    return %c0_i32, %c0_i32_0 : i32, i32
  }
  func.func @transform_6(%arg0: i32) -> (i32, i32) {
    %c0_i32 = arith.constant 0 : i32
    %c0_i32_0 = arith.constant 0 : i32
    %c0_i32_1 = arith.constant 0 : i32
    return %c0_i32, %c0_i32_0 : i32, i32
  }
  func.func @transform_7(%arg0: i32) -> (i32, i32) {
    %c0_i32 = arith.constant 0 : i32
    %c0_i32_0 = arith.constant 0 : i32
    return %arg0, %c0_i32 : i32, i32
  }
}

</mosaic_0001>

<bundles_post_ra>
// kernel: one_stage_forward.8
= control target key start
LH: loop header
LB: loop body
LE: loop exit
PB: predicated region body
PF: predicated region fallthrough
CT: control target
= control target key end

     0   :  { %s612_s12 = smov 0   ;;  %s695_s0 = inlined_call_operand.vmem [shape: bf16[128,144], index: 0, kind: input, shape index: {}]   ;;  %s696_s1 = inlined_call_operand.vmem [shape: bf16[144,32], index: 1, kind: input, shape index: {}]   ;;  %s697_s2 = inlined_call_operand.vmem [shape: f32[1,32], index: 2, kind: input, shape index: {}]   ;;  %s698_s3 = inlined_call_operand.vmem [shape: bf16[128,32], index: 3, kind: output, shape index: {}]  }
   0x1 LB: > { %s484_s13 = sadd.s32 4294967295, %s589_s12   ;;  %p488_p0 = scmp.ge.s32.totalorder %s589_s12, 1  ;;  %s589_s12 = sphi %s612_s12, %s13_s12  }
   0x2   : > { %p139_p1 = scmp.lt.s32.totalorder %s589_s12, 3 }
   0x4   : > { %p140_p2 = pnand %p488_p0, %p139_p1 }
   0x5   : > { %s489_s16 = sshll.u32 (!%p140_p2), %s484_s13, 3 }
   0x6   : > { %143 = sbr.rel (%p140_p2) target bundleno = 260 (0x104), region = 32  ;;  %p165_p3 = scmp.lt.s32.totalorder (!%p140_p2), %s489_s16, 15 }
   0xb   : > { %v562_v0 = vld [vmem:[%s696_s1 + $0x38] sm:$0xff]   ;;  %v591_v1 = vmov 0   ;;  %v563_v2 = vld [vmem:[%s696_s1 + $0x30] sm:$0xff]   ;;  %s700_s16 = smov (!%p165_p3, %s489_s16), 15  ;;  %v564_v3 = vld [vmem:[%s696_s1 + $0x28] sm:$0xff]   ;;  %vm301_vm0 = vcmask 130048  }
   0xc   : > { %314 = vmatprep.subr.bf16.mxu0 %v591_v1  ;;  %535 = vmatprep.subr.bf16.mxu1 %v591_v1  ;;  %s526_s21 = sshll.u32 %s700_s16, 3  ;;  %v565_v4 = vld [vmem:[%s696_s1 + $0x20] sm:$0xff]   ;;  %v566_v7 = vld [vmem:[%s696_s1 + $0x18] sm:$0xff]   ;;  %v567_v8 = vld [vmem:[%s696_s1 + $0x10] sm:$0xff]   ;;  %s493_s13 = sshll.u32 %s700_s16, 2  ;;  %vm419_vm1 = vcmask 257024  }
   0xd   : > { %315 = vmatpush1.bf16.msra.mxu0 %v562_v0  ;;  %544 = vmatpush1.bf16.msra.mxu1 %v562_v0  ;;  %s635_s24 = scalar_lea.vmem %s695_s0, %s526_s21  ;;  %v568_v9 = vld [vmem:[%s696_s1 + $0x8] sm:$0xff]   ;;  %v569_v10 = vld [vmem:[%s696_s1] sm:$0xff]   ;;  %s674_s17 = scalar_lea.vmem %s698_s3, %s493_s13 }
   0xe   : > { %316 = vmatprep.subr.bf16.mxu0 %v591_v1  ;;  %536 = vmatprep.subr.bf16.mxu1 %v591_v1  ;;  %v573_v5 = vld [vmem:[%s635_s24 + $0x4] ss:$8 sps:$4 sm:$0xff]   ;;  %v571_v12 = vld [vmem:[%s635_s24] ss:$8 sps:$4 sm:$0xff]   ;;  %v577_v14 = vld [vmem:[%s635_s24 + $0x14] ss:$8 sps:$4 sm:$0xff]  }
   0xf   : > { %v576_v6 = vld [vmem:[%s635_s24 + $0x24] ss:$8 sps:$4 sm:$0xff]   ;;  %512 = vmatprep.mubr.msk.bf16.mxu0 %vm301_vm0, %v573_v5  ;;  %v574_v13 = vld [vmem:[%s635_s24 + $0x20] ss:$8 sps:$4 sm:$0xff]   ;;  %v579_v15 = vld [vmem:[%s635_s24 + $0x34] ss:$8 sps:$4 sm:$0xff]  }
  0x10   : > { %514 = vmatprep.mubr.msk.bf16.mxu1 %vm301_vm0, %v576_v6  ;;  %v570_v11 = vld [vmem:[%s696_s1 + $0x40] sm:$0xff]   ;;  %v581_v16 = vld [vmem:[%s635_s24 + $0x10] ss:$8 sps:$4 sm:$0xff]  }
  0x11   : > { %317 = vmatpush1.bf16.msra.mxu0 %v563_v2  ;;  %545 = vmatpush1.bf16.msra.mxu1 %v563_v2  ;;  %v582_v17 = vld [vmem:[%s635_s24 + $0x30] ss:$8 sps:$4 sm:$0xff]   ;;  %v494_v18 = vld [vmem:[%s697_s2] ss:$0 sm:$0xff] }
  0x12   : > { %318 = vmatprep.subr.bf16.mxu0 %v591_v1  ;;  %537 = vmatprep.subr.bf16.mxu1 %v591_v1 }
  0x15   : > { %319 = vmatpush1.bf16.msra.mxu0 %v564_v3  ;;  %546 = vmatpush1.bf16.msra.mxu1 %v564_v3 }
  0x16   : > { %320 = vmatprep.subr.bf16.mxu0 %v591_v1  ;;  %538 = vmatprep.subr.bf16.mxu1 %v591_v1 }
  0x19   : > { %321 = vmatpush1.bf16.msra.mxu0 %v565_v4  ;;  %547 = vmatpush1.bf16.msra.mxu1 %v565_v4 }
  0x1a   : > { %322 = vmatprep.subr.bf16.mxu0 %v591_v1  ;;  %539 = vmatprep.subr.bf16.mxu1 %v591_v1 }
  0x1d   : > { %323 = vmatpush1.bf16.msra.mxu0 %v566_v7  ;;  %548 = vmatpush1.bf16.msra.mxu1 %v566_v7 }
  0x1e   : > { %324 = vmatprep.subr.bf16.mxu0 %v591_v1  ;;  %540 = vmatprep.subr.bf16.mxu1 %v591_v1 }
  0x21   : > { %325 = vmatpush1.bf16.msra.mxu0 %v567_v8  ;;  %549 = vmatpush1.bf16.msra.mxu1 %v567_v8 }
  0x22   : > { %326 = vmatprep.subr.bf16.mxu0 %v591_v1  ;;  %541 = vmatprep.subr.bf16.mxu1 %v591_v1 }
  0x25   : > { %327 = vmatpush1.bf16.msra.mxu0 %v568_v9  ;;  %550 = vmatpush1.bf16.msra.mxu1 %v568_v9 }
  0x26   : > { %328 = vmatprep.subr.bf16.mxu0 %v591_v1  ;;  %542 = vmatprep.subr.bf16.mxu1 %v591_v1 }
  0x29   : > { %329 = vmatpush1.bf16.msra.mxu0 %v569_v10  ;;  %551 = vmatpush1.bf16.msra.mxu1 %v569_v10 }
  0x2a   : > { %344 = vmatprep.subr.bf16.mxu0 %v591_v1  ;;  %543 = vmatprep.subr.bf16.mxu1 %v591_v1 }
  0x2d   : > { %345 = vmatpush2.bf16.msra.mxu0 %v570_v11  ;;  %552 = vmatpush2.bf16.msra.mxu1 %v570_v11 }
  0x30   : > { %347 = vmatmul.mubr.bf16.vlgmr.msra.gmra.mxu0 %v571_v12  ;;  %363 = vmatmul.mubr.bf16.vlgmr.msra.gmra.mxu1 %v574_v13 }
  0x31   : > { %513 = vmatprep.mubr.msk.bf16.mxu0 %vm301_vm0, %v577_v14  ;;  %515 = vmatprep.mubr.msk.bf16.mxu1 %vm301_vm0, %v579_v15 }
  0x38   : > { %355 = vmatmul.mubr.bf16.gmra.mxu0 %v581_v16  ;;  %371 = vmatmul.mubr.bf16.gmra.mxu1 %v582_v17 }
  0xf0   : > { %v348_v19 = vpop.f32.mrf.mxu0  ;;  %v364_v20 = vpop.f32.mrf.mxu1 }
  0xf1   : > { %v349_v21 = vadd.f32 %v494_v18, %v348_v19  ;;  %v365_v22 = vadd.f32 %v494_v18, %v364_v20 }
  0xf2   : > { %v350_v23 = vpop.f32.mrf.mxu0  ;;  %v366_v24 = vpop.f32.mrf.mxu1 }
  0xf3   : > { %v379_v25 = vmax.f32 %v349_v21, 0.0  ;;  %v383_v26 = vmax.f32 %v365_v22, 0.0 }
  0xf4   : > { %v351_v27 = vpop.f32.mrf.mxu0  ;;  %v367_v28 = vpop.f32.mrf.mxu1 }
  0xf5   : > { %v527_v29 = vpack.c.bf16 %v379_v25, %v379_v25  ;;  %v531_v30 = vpack.c.bf16 %v383_v26, %v383_v26  ;;  %v352_v31 = vadd.f32 %v494_v18, %v351_v27  ;;  %v368_v32 = vadd.f32 %v494_v18, %v367_v28 }
  0xf6   : > { %v353_v33 = vpop.f32.mrf.mxu0  ;;  %v369_v34 = vpop.f32.mrf.mxu1 }
  0xf7   : > { %420 = vst.msk [vmem:[%s674_s17] sm:$0xf] %vm419_vm1, %v527_v29  ;;  %424 = vst.msk [vmem:[%s674_s17 + $0x10] sm:$0xf] %vm419_vm1, %v531_v30  ;;  %v380_v35 = vmax.f32 %v352_v31, 0.0  ;;  %v384_v36 = vmax.f32 %v368_v32, 0.0 }
  0xf8   : > { %v356_v37 = vpop.f32.mrf.mxu0  ;;  %v372_v38 = vpop.f32.mrf.mxu1 }
  0xf9   : > { %v528_v39 = vpack.c.bf16 %v380_v35, %v380_v35  ;;  %v532_v40 = vpack.c.bf16 %v384_v36, %v384_v36  ;;  %v357_v41 = vadd.f32 %v494_v18, %v356_v37  ;;  %v373_v42 = vadd.f32 %v494_v18, %v372_v38 }
  0xfa   : > { %v358_v43 = vpop.f32.mrf.mxu0  ;;  %v374_v44 = vpop.f32.mrf.mxu1 }
  0xfb   : > { %421 = vst.msk [vmem:[%s674_s17 + $0x4] sm:$0xf] %vm419_vm1, %v528_v39  ;;  %425 = vst.msk [vmem:[%s674_s17 + $0x14] sm:$0xf] %vm419_vm1, %v532_v40  ;;  %v381_v45 = vmax.f32 %v357_v41, 0.0  ;;  %v385_v46 = vmax.f32 %v373_v42, 0.0 }
  0xfc   : > { %v359_v47 = vpop.f32.mrf.mxu0  ;;  %v375_v48 = vpop.f32.mrf.mxu1 }
  0xfd   : > { %v529_v49 = vpack.c.bf16 %v381_v45, %v381_v45  ;;  %v533_v50 = vpack.c.bf16 %v385_v46, %v385_v46  ;;  %v360_v51 = vadd.f32 %v494_v18, %v359_v47  ;;  %v376_v52 = vadd.f32 %v494_v18, %v375_v48 }
  0xfe   : > { %v361_v53 = vpop.f32.mrf.mxu0  ;;  %v377_v54 = vpop.f32.mrf.mxu1 }
  0xff   : > { %422 = vst.msk [vmem:[%s674_s17 + $0x8] sm:$0xf] %vm419_vm1, %v529_v49  ;;  %426 = vst.msk [vmem:[%s674_s17 + $0x18] sm:$0xf] %vm419_vm1, %v533_v50  ;;  %v382_v55 = vmax.f32 %v360_v51, 0.0  ;;  %v386_v56 = vmax.f32 %v376_v52, 0.0 }
 0x101   : > { %v530_v57 = vpack.c.bf16 %v382_v55, %v382_v55  ;;  %v534_v58 = vpack.c.bf16 %v386_v56, %v386_v56 }
 0x103   : > { %423 = vst.msk [vmem:[%s674_s17 + $0xc] sm:$0xf] %vm419_vm1, %v530_v57  ;;  %427 = vst.msk [vmem:[%s674_s17 + $0x1c] sm:$0xf] %vm419_vm1, %v534_v58 }
 0x104 PF: > { %s13_s12 = sadd.s32 1, %s589_s12  }
 0x105   : > { %p10_p4 = scmp.ge.s32.totalorder %s13_s12, 4  }
 0x107   :  { %12 = sbr.rel (!%p10_p4) target bundleno = 1 (0x1), region = 62 }

// kernel: one_stage_forward.7
= control target key start
LH: loop header
LB: loop body
LE: loop exit
PB: predicated region body
PF: predicated region fallthrough
CT: control target
= control target key end

     0   :  { %s991_s12 = smov 0   ;;  %s1158_s0 = inlined_call_operand.vmem [shape: bf16[512,32], index: 0, kind: input, shape index: {}]   ;;  %s1159_s1 = inlined_call_operand.vmem [shape: bf16[32,16], index: 1, kind: input, shape index: {}]   ;;  %s1160_s2 = inlined_call_operand.vmem [shape: f32[1,16], index: 2, kind: input, shape index: {}]   ;;  %s1161_s3 = inlined_call_operand.vmem [shape: bf16[512,16], index: 3, kind: output, shape index: {}]  }
   0x1 LB: > { %s769_s13 = sadd.s32 4294967295, %s969_s12   ;;  %p773_p0 = scmp.ge.s32.totalorder %s969_s12, 1  ;;  %s969_s12 = sphi %s991_s12, %s13_s12  }
   0x2   : > { %p138_p1 = scmp.lt.s32.totalorder %s969_s12, 3 }
   0x4   : > { %p139_p2 = pnand %p773_p0, %p138_p1 }
   0x5   : > { %s774_s16 = sshll.u32 (!%p139_p2), %s769_s13, 5 }
   0x6   : > { %142 = sbr.rel (%p139_p2) target bundleno = 250 (0xfa), region = 32  ;;  %p163_p3 = scmp.lt.s32.totalorder (!%p139_p2), %s774_s16, 63 }
   0xb   : > { %v945_v0 = vld [vmem:[%s1159_s1 + $0x8] sm:$0xff]   ;;  %v946_v1 = vld [vmem:[%s1159_s1] sm:$0xff]   ;;  %s1163_s16 = smov (!%p163_p3, %s774_s16), 63  ;;  %vm310_vm0 = vcmask 261120   ;;  %vm680_vm1 = vcmask 125952  }
   0xc   : > { %897 = vmatprep.subr.bf16.mxu0 %v945_v0  ;;  %933 = vmatprep.subr.bf16.mxu1 %v945_v0  ;;  %s775_s19 = sshll.u32 %s1163_s16, 2  ;;  %v1050_v18 = vld [vmem:[%s1160_s2] ss:$0 sm:$0xff] }
   0xd   : > { %898 = vmatpush3.bf16.msra.mxu0 %v945_v0  ;;  %935 = vmatpush3.bf16.msra.mxu1 %v945_v0  ;;  %s1013_s22 = scalar_lea.vmem %s1158_s0, %s775_s19  ;;  %s1060_s27 = scalar_lea.vmem %s1161_s3, %s775_s19 }
   0xe   : > { %899 = vmatprep.subr.bf16.mxu0 %v946_v1  ;;  %934 = vmatprep.subr.bf16.mxu1 %v946_v1  ;;  %v947_v2 = vld [vmem:[%s1013_s22] sm:$0xff]   ;;  %v949_v4 = vld [vmem:[%s1013_s22 + $0x8] sm:$0xff]   ;;  %v951_v6 = vld [vmem:[%s1013_s22 + $0x10] sm:$0xff]  }
   0xf   : > { %v948_v3 = vld [vmem:[%s1013_s22 + $0x40] sm:$0xff]   ;;  %901 = vmatprep.mubr.msk.bf16.mxu0 %vm310_vm0, %v947_v2  ;;  %v950_v5 = vld [vmem:[%s1013_s22 + $0x48] sm:$0xff]   ;;  %v952_v7 = vld [vmem:[%s1013_s22 + $0x50] sm:$0xff]  }
  0x10   : > { %917 = vmatprep.mubr.msk.bf16.mxu1 %vm310_vm0, %v948_v3  ;;  %v953_v8 = vld [vmem:[%s1013_s22 + $0x18] sm:$0xff]   ;;  %v955_v10 = vld [vmem:[%s1013_s22 + $0x20] sm:$0xff]   ;;  %v957_v12 = vld [vmem:[%s1013_s22 + $0x28] sm:$0xff]  }
  0x11   : > { %900 = vmatpush3.bf16.msra.mxu0 %v946_v1  ;;  %936 = vmatpush3.bf16.msra.mxu1 %v946_v1  ;;  %v954_v9 = vld [vmem:[%s1013_s22 + $0x58] sm:$0xff]   ;;  %v956_v11 = vld [vmem:[%s1013_s22 + $0x60] sm:$0xff]   ;;  %v958_v13 = vld [vmem:[%s1013_s22 + $0x68] sm:$0xff]  }
  0x12   : > { %v959_v14 = vld [vmem:[%s1013_s22 + $0x30] sm:$0xff]   ;;  %v961_v16 = vld [vmem:[%s1013_s22 + $0x38] sm:$0xff]  }
  0x13   : > { %v960_v15 = vld [vmem:[%s1013_s22 + $0x70] sm:$0xff]   ;;  %v962_v17 = vld [vmem:[%s1013_s22 + $0x78] sm:$0xff]  }
  0x14   : > { %902 = vmatmul.mubr.msk.bf16.vlgmr.msra.gmra.mxu0 %vm310_vm0, %v949_v4  ;;  %918 = vmatmul.mubr.msk.bf16.vlgmr.msra.gmra.mxu1 %vm310_vm0, %v950_v5 }
  0x15   : > { %905 = vmatprep.mubr.msk.bf16.mxu0 %vm310_vm0, %v951_v6  ;;  %921 = vmatprep.mubr.msk.bf16.mxu1 %vm310_vm0, %v952_v7 }
  0x1c   : > { %906 = vmatmul.mubr.msk.bf16.gmra.mxu0 %vm310_vm0, %v953_v8  ;;  %922 = vmatmul.mubr.msk.bf16.gmra.mxu1 %vm310_vm0, %v954_v9 }
  0x1d   : > { %909 = vmatprep.mubr.msk.bf16.mxu0 %vm310_vm0, %v955_v10  ;;  %925 = vmatprep.mubr.msk.bf16.mxu1 %vm310_vm0, %v956_v11 }
  0x24   : > { %910 = vmatmul.mubr.msk.bf16.gmra.mxu0 %vm310_vm0, %v957_v12  ;;  %926 = vmatmul.mubr.msk.bf16.gmra.mxu1 %vm310_vm0, %v958_v13 }
  0x25   : > { %913 = vmatprep.mubr.msk.bf16.mxu0 %vm310_vm0, %v959_v14  ;;  %929 = vmatprep.mubr.msk.bf16.mxu1 %vm310_vm0, %v960_v15 }
  0x2c   : > { %914 = vmatmul.mubr.msk.bf16.gmra.mxu0 %vm310_vm0, %v961_v16  ;;  %930 = vmatmul.mubr.msk.bf16.gmra.mxu1 %vm310_vm0, %v962_v17 }
  0xd4   : > { %v903_v19 = vpop.f32.mrf.mxu0  ;;  %v919_v21 = vpop.f32.mrf.mxu1 }
  0xd5   : > { %v402_v20 = vadd.f32 %v903_v19, %v1050_v18  ;;  %v466_v22 = vadd.f32 %v919_v21, %v1050_v18 }
  0xd6   : > { %v393_v23 = vpop.f32.mrf.mxu0  ;;  %v457_v26 = vpop.f32.mrf.mxu1 }
  0xd7   : > { %v522_v24 = vmax.f32 %v402_v20, 0.0  ;;  %v394_v25 = vadd.f32 %v1050_v18, %v393_v23  ;;  %v538_v27 = vmax.f32 %v466_v22, 0.0  ;;  %v458_v28 = vadd.f32 %v1050_v18, %v457_v26 }
  0xd8   : > { %v904_v29 = vpop.f32.mrf.mxu0  ;;  %v920_v33 = vpop.f32.mrf.mxu1 }
  0xd9   : > { %v849_v30 = vpack.c.bf16 %v522_v24, %v522_v24  ;;  %v520_v31 = vmax.f32 %v394_v25, 0.0  ;;  %v405_v32 = vadd.f32 %v904_v29, %v1050_v18  ;;  %v865_v34 = vpack.c.bf16 %v538_v27, %v538_v27 }
  0xda   : > { %v536_v35 = vmax.f32 %v458_v28, 0.0  ;;  %v469_v36 = vadd.f32 %v920_v33, %v1050_v18  ;;  %v396_v37 = vpop.f32.mrf.mxu0  ;;  %v460_v41 = vpop.f32.mrf.mxu1 }
  0xdb   : > { %683 = vst.msk [vmem:[%s1060_s27 + $0x8] sm:$0xf] %vm680_vm1, %v849_v30  ;;  %v847_v38 = vpack.c.bf16 %v520_v31, %v520_v31  ;;  %v523_v39 = vmax.f32 %v405_v32, 0.0  ;;  %v397_v40 = vadd.f32 %v1050_v18, %v396_v37  ;;  %699 = vst.msk [vmem:[%s1060_s27 + $0x48] sm:$0xf] %vm680_vm1, %v865_v34  ;;  %v461_v44 = vadd.f32 %v1050_v18, %v460_v41 }
  0xdc   : > { %v863_v42 = vpack.c.bf16 %v536_v35, %v536_v35  ;;  %v539_v43 = vmax.f32 %v469_v36, 0.0  ;;  %v907_v45 = vpop.f32.mrf.mxu0  ;;  %v923_v49 = vpop.f32.mrf.mxu1 }
  0xdd   : > { %681 = vst.msk [vmem:[%s1060_s27] sm:$0xf] %vm680_vm1, %v847_v38  ;;  %v850_v46 = vpack.c.bf16 %v523_v39, %v523_v39  ;;  %v521_v47 = vmax.f32 %v397_v40, 0.0  ;;  %v418_v48 = vadd.f32 %v907_v45, %v1050_v18  ;;  %v537_v51 = vmax.f32 %v461_v44, 0.0 }
  0xde   : > { %697 = vst.msk [vmem:[%s1060_s27 + $0x40] sm:$0xf] %vm680_vm1, %v863_v42  ;;  %v866_v50 = vpack.c.bf16 %v539_v43, %v539_v43  ;;  %v482_v52 = vadd.f32 %v923_v49, %v1050_v18  ;;  %v409_v53 = vpop.f32.mrf.mxu0  ;;  %v473_v57 = vpop.f32.mrf.mxu1 }
  0xdf   : > { %684 = vst.msk [vmem:[%s1060_s27 + $0xc] sm:$0xf] %vm680_vm1, %v850_v46  ;;  %v848_v54 = vpack.c.bf16 %v521_v47, %v521_v47  ;;  %v526_v55 = vmax.f32 %v418_v48, 0.0  ;;  %v410_v56 = vadd.f32 %v1050_v18, %v409_v53  ;;  %v864_v58 = vpack.c.bf16 %v537_v51, %v537_v51 }
  0xe0   : > { %700 = vst.msk [vmem:[%s1060_s27 + $0x4c] sm:$0xf] %vm680_vm1, %v866_v50  ;;  %v542_v59 = vmax.f32 %v482_v52, 0.0  ;;  %v474_v60 = vadd.f32 %v1050_v18, %v473_v57  ;;  %v908_v61 = vpop.f32.mrf.mxu0  ;;  %v924_v1 = vpop.f32.mrf.mxu1 }
  0xe1   : > { %682 = vst.msk [vmem:[%s1060_s27 + $0x4] sm:$0xf] %vm680_vm1, %v848_v54  ;;  %v853_v62 = vpack.c.bf16 %v526_v55, %v526_v55  ;;  %v524_v63 = vmax.f32 %v410_v56, 0.0  ;;  %v421_v0 = vadd.f32 %v908_v61, %v1050_v18  ;;  %698 = vst.msk [vmem:[%s1060_s27 + $0x44] sm:$0xf] %vm680_vm1, %v864_v58  ;;  %v485_v4 = vadd.f32 %v924_v1, %v1050_v18 }
  0xe2   : > { %v869_v2 = vpack.c.bf16 %v542_v59, %v542_v59  ;;  %v540_v3 = vmax.f32 %v474_v60, 0.0  ;;  %v412_v5 = vpop.f32.mrf.mxu0  ;;  %v476_v9 = vpop.f32.mrf.mxu1 }
  0xe3   : > { %687 = vst.msk [vmem:[%s1060_s27 + $0x18] sm:$0xf] %vm680_vm1, %v853_v62  ;;  %v851_v6 = vpack.c.bf16 %v524_v63, %v524_v63  ;;  %v527_v7 = vmax.f32 %v421_v0, 0.0  ;;  %v413_v8 = vadd.f32 %v1050_v18, %v412_v5  ;;  %v543_v11 = vmax.f32 %v485_v4, 0.0 }
  0xe4   : > { %703 = vst.msk [vmem:[%s1060_s27 + $0x58] sm:$0xf] %vm680_vm1, %v869_v2  ;;  %v867_v10 = vpack.c.bf16 %v540_v3, %v540_v3  ;;  %v477_v12 = vadd.f32 %v1050_v18, %v476_v9  ;;  %v911_v13 = vpop.f32.mrf.mxu0  ;;  %v927_v17 = vpop.f32.mrf.mxu1 }
  0xe5   : > { %685 = vst.msk [vmem:[%s1060_s27 + $0x10] sm:$0xf] %vm680_vm1, %v851_v6  ;;  %v854_v14 = vpack.c.bf16 %v527_v7, %v527_v7  ;;  %v525_v15 = vmax.f32 %v413_v8, 0.0  ;;  %v434_v16 = vadd.f32 %v911_v13, %v1050_v18  ;;  %v870_v19 = vpack.c.bf16 %v543_v11, %v543_v11 }
  0xe6   : > { %701 = vst.msk [vmem:[%s1060_s27 + $0x50] sm:$0xf] %vm680_vm1, %v867_v10  ;;  %v541_v20 = vmax.f32 %v477_v12, 0.0  ;;  %v498_v21 = vadd.f32 %v927_v17, %v1050_v18  ;;  %v425_v22 = vpop.f32.mrf.mxu0  ;;  %v489_v26 = vpop.f32.mrf.mxu1 }
  0xe7   : > { %688 = vst.msk [vmem:[%s1060_s27 + $0x1c] sm:$0xf] %vm680_vm1, %v854_v14  ;;  %v852_v23 = vpack.c.bf16 %v525_v15, %v525_v15  ;;  %v530_v24 = vmax.f32 %v434_v16, 0.0  ;;  %v426_v25 = vadd.f32 %v1050_v18, %v425_v22  ;;  %704 = vst.msk [vmem:[%s1060_s27 + $0x5c] sm:$0xf] %vm680_vm1, %v870_v19  ;;  %v490_v29 = vadd.f32 %v1050_v18, %v489_v26 }
  0xe8   : > { %v868_v27 = vpack.c.bf16 %v541_v20, %v541_v20  ;;  %v546_v28 = vmax.f32 %v498_v21, 0.0  ;;  %v912_v30 = vpop.f32.mrf.mxu0  ;;  %v928_v34 = vpop.f32.mrf.mxu1 }
  0xe9   : > { %686 = vst.msk [vmem:[%s1060_s27 + $0x14] sm:$0xf] %vm680_vm1, %v852_v23  ;;  %v857_v31 = vpack.c.bf16 %v530_v24, %v530_v24  ;;  %v528_v32 = vmax.f32 %v426_v25, 0.0  ;;  %v437_v33 = vadd.f32 %v912_v30, %v1050_v18  ;;  %v544_v36 = vmax.f32 %v490_v29, 0.0 }
  0xea   : > { %702 = vst.msk [vmem:[%s1060_s27 + $0x54] sm:$0xf] %vm680_vm1, %v868_v27  ;;  %v873_v35 = vpack.c.bf16 %v546_v28, %v546_v28  ;;  %v501_v37 = vadd.f32 %v928_v34, %v1050_v18  ;;  %v428_v38 = vpop.f32.mrf.mxu0  ;;  %v492_v42 = vpop.f32.mrf.mxu1 }
  0xeb   : > { %691 = vst.msk [vmem:[%s1060_s27 + $0x28] sm:$0xf] %vm680_vm1, %v857_v31  ;;  %v855_v39 = vpack.c.bf16 %v528_v32, %v528_v32  ;;  %v531_v40 = vmax.f32 %v437_v33, 0.0  ;;  %v429_v41 = vadd.f32 %v1050_v18, %v428_v38  ;;  %v871_v43 = vpack.c.bf16 %v544_v36, %v544_v36 }
  0xec   : > { %707 = vst.msk [vmem:[%s1060_s27 + $0x68] sm:$0xf] %vm680_vm1, %v873_v35  ;;  %v547_v44 = vmax.f32 %v501_v37, 0.0  ;;  %v493_v45 = vadd.f32 %v1050_v18, %v492_v42  ;;  %v915_v46 = vpop.f32.mrf.mxu0  ;;  %v931_v50 = vpop.f32.mrf.mxu1 }
  0xed   : > { %689 = vst.msk [vmem:[%s1060_s27 + $0x20] sm:$0xf] %vm680_vm1, %v855_v39  ;;  %v858_v47 = vpack.c.bf16 %v531_v40, %v531_v40  ;;  %v529_v48 = vmax.f32 %v429_v41, 0.0  ;;  %v450_v49 = vadd.f32 %v915_v46, %v1050_v18  ;;  %705 = vst.msk [vmem:[%s1060_s27 + $0x60] sm:$0xf] %vm680_vm1, %v871_v43  ;;  %v514_v53 = vadd.f32 %v931_v50, %v1050_v18 }
  0xee   : > { %v874_v51 = vpack.c.bf16 %v547_v44, %v547_v44  ;;  %v545_v52 = vmax.f32 %v493_v45, 0.0  ;;  %v441_v54 = vpop.f32.mrf.mxu0  ;;  %v505_v58 = vpop.f32.mrf.mxu1 }
  0xef   : > { %692 = vst.msk [vmem:[%s1060_s27 + $0x2c] sm:$0xf] %vm680_vm1, %v858_v47  ;;  %v856_v55 = vpack.c.bf16 %v529_v48, %v529_v48  ;;  %v534_v56 = vmax.f32 %v450_v49, 0.0  ;;  %v442_v57 = vadd.f32 %v1050_v18, %v441_v54  ;;  %v550_v60 = vmax.f32 %v514_v53, 0.0 }
  0xf0   : > { %708 = vst.msk [vmem:[%s1060_s27 + $0x6c] sm:$0xf] %vm680_vm1, %v874_v51  ;;  %v872_v59 = vpack.c.bf16 %v545_v52, %v545_v52  ;;  %v506_v61 = vadd.f32 %v1050_v18, %v505_v58  ;;  %v916_v62 = vpop.f32.mrf.mxu0  ;;  %v932_v2 = vpop.f32.mrf.mxu1 }
  0xf1   : > { %690 = vst.msk [vmem:[%s1060_s27 + $0x24] sm:$0xf] %vm680_vm1, %v856_v55  ;;  %v861_v63 = vpack.c.bf16 %v534_v56, %v534_v56  ;;  %v532_v0 = vmax.f32 %v442_v57, 0.0  ;;  %v453_v1 = vadd.f32 %v916_v62, %v1050_v18  ;;  %v877_v3 = vpack.c.bf16 %v550_v60, %v550_v60 }
  0xf2   : > { %706 = vst.msk [vmem:[%s1060_s27 + $0x64] sm:$0xf] %vm680_vm1, %v872_v59  ;;  %v548_v4 = vmax.f32 %v506_v61, 0.0  ;;  %v517_v5 = vadd.f32 %v932_v2, %v1050_v18  ;;  %v444_v6 = vpop.f32.mrf.mxu0  ;;  %v508_v10 = vpop.f32.mrf.mxu1 }
  0xf3   : > { %695 = vst.msk [vmem:[%s1060_s27 + $0x38] sm:$0xf] %vm680_vm1, %v861_v63  ;;  %v859_v7 = vpack.c.bf16 %v532_v0, %v532_v0  ;;  %v535_v8 = vmax.f32 %v453_v1, 0.0  ;;  %v445_v9 = vadd.f32 %v1050_v18, %v444_v6  ;;  %711 = vst.msk [vmem:[%s1060_s27 + $0x78] sm:$0xf] %vm680_vm1, %v877_v3  ;;  %v509_v13 = vadd.f32 %v1050_v18, %v508_v10 }
  0xf4   : > { %v875_v11 = vpack.c.bf16 %v548_v4, %v548_v4  ;;  %v551_v12 = vmax.f32 %v517_v5, 0.0 }
  0xf5   : > { %693 = vst.msk [vmem:[%s1060_s27 + $0x30] sm:$0xf] %vm680_vm1, %v859_v7  ;;  %v862_v14 = vpack.c.bf16 %v535_v8, %v535_v8  ;;  %v533_v15 = vmax.f32 %v445_v9, 0.0  ;;  %v549_v17 = vmax.f32 %v509_v13, 0.0 }
  0xf6   : > { %709 = vst.msk [vmem:[%s1060_s27 + $0x70] sm:$0xf] %vm680_vm1, %v875_v11  ;;  %v878_v16 = vpack.c.bf16 %v551_v12, %v551_v12 }
  0xf7   : > { %696 = vst.msk [vmem:[%s1060_s27 + $0x3c] sm:$0xf] %vm680_vm1, %v862_v14  ;;  %v860_v19 = vpack.c.bf16 %v533_v15, %v533_v15  ;;  %v876_v20 = vpack.c.bf16 %v549_v17, %v549_v17 }
  0xf8   : > { %712 = vst.msk [vmem:[%s1060_s27 + $0x7c] sm:$0xf] %vm680_vm1, %v878_v16 }
  0xf9   : > { %694 = vst.msk [vmem:[%s1060_s27 + $0x34] sm:$0xf] %vm680_vm1, %v860_v19  ;;  %710 = vst.msk [vmem:[%s1060_s27 + $0x74] sm:$0xf] %vm680_vm1, %v876_v20 }
  0xfa PF: > { %s13_s12 = sadd.s32 1, %s969_s12  }
  0xfb   : > { %p10_p4 = scmp.ge.s32.totalorder %s13_s12, 4  }
  0xfd   :  { %12 = sbr.rel (!%p10_p4) target bundleno = 1 (0x1), region = 62 }

// kernel: one_stage_forward.9
= control target key start
LH: loop header
LB: loop body
LE: loop exit
PB: predicated region body
PF: predicated region fallthrough
CT: control target
= control target key end

     0   :  { %s637_s12 = smov 0   ;;  %s715_s0 = inlined_call_operand.vmem [shape: bf16[32,288], index: 0, kind: input, shape index: {}]   ;;  %s716_s1 = inlined_call_operand.vmem [shape: bf16[288,64], index: 1, kind: input, shape index: {}]   ;;  %s717_s2 = inlined_call_operand.vmem [shape: f32[1,64], index: 2, kind: input, shape index: {}]   ;;  %s718_s3 = inlined_call_operand.vmem [shape: bf16[32,64], index: 3, kind: output, shape index: {}]  }
   0x1 LB: > { %s503_s13 = sadd.s32 4294967295, %s613_s12   ;;  %p507_p0 = scmp.ge.s32.totalorder %s613_s12, 1  ;;  %s613_s12 = sphi %s637_s12, %s13_s12  }
   0x2   : > { %p139_p1 = scmp.lt.s32.totalorder %s613_s12, 3 }
   0x4   : > { %p140_p2 = pnand %p507_p0, %p139_p1 }
   0x5   : > { %s508_s18 = sshll.u32 (!%p140_p2), %s503_s13, 1 }
   0x6   : > { %143 = sbr.rel (%p140_p2) target bundleno = 254 (0xfe), region = 32  ;;  %p165_p3 = scmp.lt.s32.totalorder (!%p140_p2), %s508_s18, 3 }
   0xb   : > { %v585_v0 = vld [vmem:[%s716_s1 + $0x78] sm:$0xff]   ;;  %v615_v2 = vmov 0.0   ;;  %v587_v3 = vld [vmem:[%s716_s1 + $0x70] sm:$0xff]   ;;  %v589_v5 = vld [vmem:[%s716_s1 + $0x68] sm:$0xff]   ;;  %vm616_vm0 = vmmov 0   ;;  %s720_s18 = smov (!%p165_p3, %s508_s18), 3 }
   0xc   : > { %v586_v1 = vld [vmem:[%s716_s1 + $0x38] sm:$0xff]   ;;  %566 = vmatprep.subr.bf16.mxu1 %v615_v2  ;;  %541 = vmatprep.subr.bf16.mxu0 %v585_v0  ;;  %v588_v4 = vld [vmem:[%s716_s1 + $0x30] sm:$0xff]   ;;  %v590_v6 = vld [vmem:[%s716_s1 + $0x28] sm:$0xff]   ;;  %s574_s6 = smul.u32 12, %s720_s18  ;;  %vm348_vm1 = vcmask 261120   ;;  %s511_s5 = sshll.u32 %s720_s18, 2 }
   0xd   : > { %542 = vmatpush3.bf16.msra.mxu0 %v586_v1  ;;  %570 = vmatprep.mubr.msk.bf16.mxu1 %vm616_vm0, %v615_v2  ;;  %v591_v7 = vld [vmem:[%s716_s1 + $0x60] sm:$0xff]   ;;  %v593_v9 = vld [vmem:[%s716_s1 + $0x58] sm:$0xff]   ;;  %v599_v10 = vld [vmem:[%s716_s1 + $0x88] sm:$0xff]   ;;  %s175_s8 = scalar_lea.vmem %s718_s3, %s511_s5  ;;  %vm444_vm2 = vcmask 519168  }
   0xe   : > { %543 = vmatprep.subr.bf16.mxu0 %v587_v3  ;;  %v592_v8 = vld [vmem:[%s716_s1 + $0x20] sm:$0xff]   ;;  %v594_v11 = vld [vmem:[%s716_s1 + $0x18] sm:$0xff]   ;;  %v595_v12 = vld [vmem:[%s716_s1 + $0x50] sm:$0xff]   ;;  %567 = vmatpush3.bf16.msra.mxu1 %v599_v10  ;;  %s169_s16 = scalar_lea.vmem %s715_s0, %s574_s6 }
   0xf   : > { %568 = vmatprep.subr.bf16.mxu1 %v615_v2  ;;  %v602_v13 = vld [vmem:[%s716_s1 + $0x80] sm:$0xff]   ;;  %v596_v14 = vld [vmem:[%s716_s1 + $0x10] sm:$0xff]   ;;  %v597_v16 = vld [vmem:[%s716_s1 + $0x48] sm:$0xff]  }
  0x10   : > { %v605_v15 = vld [vmem:[%s169_s16 + $0x4] ss:$12 sps:$4 sm:$0xff]   ;;  %v606_v17 = vld [vmem:[%s169_s16 + $0x8] ss:$12 sps:$4 sm:$0xff]   ;;  %v603_v21 = vld [vmem:[%s169_s16] ss:$12 sps:$4 sm:$0xff]  }
  0x11   : > { %544 = vmatpush3.bf16.msra.mxu0 %v588_v4  ;;  %384 = vmatprep.mubr.bf16.mxu0 %v605_v15  ;;  %v598_v18 = vld [vmem:[%s716_s1 + $0x8] sm:$0xff]   ;;  %v600_v19 = vld [vmem:[%s716_s1 + $0x40] sm:$0xff]  }
  0x12   : > { %545 = vmatprep.subr.bf16.mxu0 %v589_v5  ;;  %569 = vmatpush3.bf16.msra.mxu1 %v602_v13  ;;  %v601_v20 = vld [vmem:[%s716_s1] sm:$0xff]  }
  0x13   : > { %v512_v27 = vld [vmem:[%s717_s2] ss:$0 sm:$0xff] }
  0x15   : > { %546 = vmatpush3.bf16.msra.mxu0 %v590_v6  ;;  %571 = vmatmul.mubr.msk.bf16.vlgmr.msra.gmra.mxu1 %vm348_vm1, %v606_v17 }
  0x16   : > { %547 = vmatprep.subr.bf16.mxu0 %v591_v7 }
  0x19   : > { %548 = vmatpush3.bf16.msra.mxu0 %v592_v8 }
  0x1a   : > { %549 = vmatprep.subr.bf16.mxu0 %v593_v9 }
  0x1d   : > { %550 = vmatpush3.bf16.msra.mxu0 %v594_v11 }
  0x1e   : > { %551 = vmatprep.subr.bf16.mxu0 %v595_v12 }
  0x21   : > { %552 = vmatpush3.bf16.msra.mxu0 %v596_v14 }
  0x22   : > { %553 = vmatprep.subr.bf16.mxu0 %v597_v16 }
  0x25   : > { %554 = vmatpush3.bf16.msra.mxu0 %v598_v18 }
  0x26   : > { %555 = vmatprep.subr.bf16.mxu0 %v600_v19 }
  0x29   : > { %556 = vmatpush3.bf16.msra.mxu0 %v601_v20 }
  0x2c   : > { %385 = vmatmul.mubr.bf16.vlgmr.msra.gmra.mxu0 %v603_v21 }
  0xd5   : > { %v427_v22 = vpop.f32.mrf.mxu1 }
  0xd7   : > { %v572_v23 = vpop.f32.mrf.mxu1 }
  0xd9   : > { %v430_v24 = vpop.f32.mrf.mxu1 }
  0xdb   : > { %v573_v25 = vpop.f32.mrf.mxu1 }
  0xec   : > { %v557_v26 = vpop.f32.mrf.mxu0 }
  0xee   : > { %v558_v28 = vpop.f32.mrf.mxu0 }
  0xef   : > { %v559_v29 = vadd.f32 %v558_v28, %v557_v26 }
  0xf0   : > { %v560_v30 = vpop.f32.mrf.mxu0 }
  0xf1   : > { %v387_v31 = vadd.f32 %v559_v29, %v512_v27 }
  0xf2   : > { %v561_v32 = vpop.f32.mrf.mxu0 }
  0xf3   : > { %v428_v33 = vadd.f32 %v427_v22, %v387_v31  ;;  %v562_v34 = vadd.f32 %v561_v32, %v560_v30 }
  0xf5   : > { %v434_v35 = vmax.f32 %v428_v33, 0.0  ;;  %v390_v36 = vadd.f32 %v562_v34, %v512_v27 }
  0xf7   : > { %v539_v37 = vpack.c.bf16 %v434_v35, %v434_v35  ;;  %v431_v38 = vadd.f32 %v430_v24, %v390_v36 }
  0xf9   : > { %445 = vst.msk [vmem:[%s175_s8] sm:$0xf] %vm444_vm2, %v539_v37  ;;  %v435_v39 = vmax.f32 %v431_v38, 0.0 }
  0xfb   : > { %v540_v40 = vpack.c.bf16 %v435_v39, %v435_v39 }
  0xfd   : > { %446 = vst.msk [vmem:[%s175_s8 + $0x4] sm:$0xf] %vm444_vm2, %v540_v40 }
  0xfe PF: > { %s13_s12 = sadd.s32 1, %s613_s12  }
  0xff   : > { %p10_p4 = scmp.ge.s32.totalorder %s13_s12, 4  }
 0x101   :  { %12 = sbr.rel (!%p10_p4) target bundleno = 1 (0x1), region = 62 }

// kernel: one_stage_forward.10
= control target key start
LH: loop header
LB: loop body
LE: loop exit
PB: predicated region body
PF: predicated region fallthrough
CT: control target
= control target key end

     0   :  { %v608_v35 = vmov 0.0   ;;  %vm609_vm0 = vmmov 0   ;;  %vm330_vm1 = vcmask 523264   ;;  %s753_s1 = inlined_call_operand.vmem [shape: bf16[576,128], index: 1, kind: input, shape index: {}]   ;;  %s754_s0 = inlined_call_operand.vmem [shape: bf16[8,576], index: 0, kind: input, shape index: {}]   ;;  %s755_s2 = inlined_call_operand.vmem [shape: f32[1,128], index: 2, kind: input, shape index: {}]   ;;  %s756_s3 = inlined_call_operand.vmem [shape: bf16[8,128], index: 3, kind: output, shape index: {}]  }
   0x1   :  { %v567_v0 = vld [vmem:[%s753_s1 + $0x78] sm:$0xff]   ;;  %v571_v4 = vld [vmem:[%s753_s1 + $0x70] sm:$0xff]   ;;  %v575_v8 = vld [vmem:[%s753_s1 + $0x68] sm:$0xff]  }
   0x2   :  { %v568_v1 = vld [vmem:[%s753_s1 + $0x38] sm:$0xff]   ;;  %504 = vmatprep.subr.bf16.mxu0 %v567_v0  ;;  %v572_v5 = vld [vmem:[%s753_s1 + $0x30] sm:$0xff]   ;;  %v576_v9 = vld [vmem:[%s753_s1 + $0x28] sm:$0xff]  }
   0x3   :  { %v569_v2 = vld [vmem:[%s753_s1 + $0xf8] sm:$0xff]   ;;  %505 = vmatpush3.bf16.msra.mxu0 %v568_v1  ;;  %v573_v6 = vld [vmem:[%s753_s1 + $0xf0] sm:$0xff]   ;;  %v577_v10 = vld [vmem:[%s753_s1 + $0xe8] sm:$0xff]  }
   0x4   :  { %v570_v3 = vld [vmem:[%s753_s1 + $0xb8] sm:$0xff]   ;;  %526 = vmatprep.subr.bf16.mxu1 %v569_v2  ;;  %506 = vmatprep.subr.bf16.mxu0 %v571_v4  ;;  %v574_v7 = vld [vmem:[%s753_s1 + $0xb0] sm:$0xff]   ;;  %v578_v11 = vld [vmem:[%s753_s1 + $0xa8] sm:$0xff]  }
   0x5   :  { %527 = vmatpush3.bf16.msra.mxu1 %v570_v3  ;;  %v579_v12 = vld [vmem:[%s753_s1 + $0x60] sm:$0xff]   ;;  %v583_v16 = vld [vmem:[%s753_s1 + $0x58] sm:$0xff]   ;;  %v587_v20 = vld [vmem:[%s753_s1 + $0x50] sm:$0xff]  }
   0x6   :  { %528 = vmatprep.subr.bf16.mxu1 %v573_v6  ;;  %v580_v13 = vld [vmem:[%s753_s1 + $0x20] sm:$0xff]   ;;  %v584_v17 = vld [vmem:[%s753_s1 + $0x18] sm:$0xff]   ;;  %v588_v21 = vld [vmem:[%s753_s1 + $0x10] sm:$0xff]  }
   0x7   :  { %507 = vmatpush3.bf16.msra.mxu0 %v572_v5  ;;  %v581_v14 = vld [vmem:[%s753_s1 + $0xe0] sm:$0xff]   ;;  %v585_v18 = vld [vmem:[%s753_s1 + $0xd8] sm:$0xff]   ;;  %v589_v22 = vld [vmem:[%s753_s1 + $0xd0] sm:$0xff]  }
   0x8   :  { %508 = vmatprep.subr.bf16.mxu0 %v575_v8  ;;  %v582_v15 = vld [vmem:[%s753_s1 + $0xa0] sm:$0xff]   ;;  %v586_v19 = vld [vmem:[%s753_s1 + $0x98] sm:$0xff]   ;;  %v590_v23 = vld [vmem:[%s753_s1 + $0x90] sm:$0xff]  }
   0x9   :  { %529 = vmatpush3.bf16.msra.mxu1 %v574_v7  ;;  %v591_v24 = vld [vmem:[%s753_s1 + $0x48] sm:$0xff]   ;;  %v595_v28 = vld [vmem:[%s753_s1 + $0x40] sm:$0xff]   ;;  %v604_v39 = vld [vmem:[%s753_s1 + $0x118] sm:$0xff]  }
   0xa   :  { %530 = vmatprep.subr.bf16.mxu1 %v577_v10  ;;  %v592_v25 = vld [vmem:[%s753_s1 + $0x8] sm:$0xff]   ;;  %v596_v29 = vld [vmem:[%s753_s1] sm:$0xff]   ;;  %v605_v40 = vld [vmem:[%s753_s1 + $0x110] sm:$0xff]  }
   0xb   :  { %509 = vmatpush3.bf16.msra.mxu0 %v576_v9  ;;  %v593_v26 = vld [vmem:[%s753_s1 + $0xc8] sm:$0xff]   ;;  %v597_v30 = vld [vmem:[%s753_s1 + $0xc0] sm:$0xff]   ;;  %v600_v43 = vld [vmem:[%s754_s0 + $0x10] ss:$0 sps:$4 sm:$0xff]  }
   0xc   :  { %510 = vmatprep.subr.bf16.mxu0 %v579_v12  ;;  %v594_v27 = vld [vmem:[%s753_s1 + $0x88] sm:$0xff]   ;;  %v15_v31 = vld [vmem:[%s754_s0] sm:$0xff] }
   0xd   :  { %531 = vmatpush3.bf16.msra.mxu1 %v578_v11  ;;  %v462_v32 = vcombine.low %v15_v31, %v15_v31  ;;  %v463_v33 = vcombine.high %v15_v31, %v15_v31  ;;  %v601_v34 = vld [vmem:[%s753_s1 + $0x80] sm:$0xff]   ;;  %v16_v36 = vld [vmem:[%s754_s0 + $0x8] sm:$0xff] }
   0xe   :  { %532 = vmatprep.subr.bf16.mxu1 %v581_v14  ;;  %v464_v37 = vcombine.low %v16_v36, %v16_v36  ;;  %v465_v38 = vcombine.high %v16_v36, %v16_v36  ;;  %v606_v41 = vld [vmem:[%s753_s1 + $0x108] sm:$0xff]   ;;  %v607_v42 = vld [vmem:[%s753_s1 + $0x100] sm:$0xff]  }
   0xf   :  { %511 = vmatpush3.bf16.msra.mxu0 %v580_v13  ;;  %366 = vmatprep.mubr.bf16.mxu0 %v463_v33  ;;  %v461_v52 = vld [vmem:[%s755_s2] ss:$0 sm:$0xff] }
  0x10   :  { %512 = vmatprep.subr.bf16.mxu0 %v583_v16  ;;  %406 = vmatprep.mubr.bf16.mxu1 %v465_v38 }
  0x11   :  { %533 = vmatpush3.bf16.msra.mxu1 %v582_v15 }
  0x12   :  { %534 = vmatprep.subr.bf16.mxu1 %v585_v18 }
  0x13   :  { %513 = vmatpush3.bf16.msra.mxu0 %v584_v17 }
  0x14   :  { %514 = vmatprep.subr.bf16.mxu0 %v587_v20 }
  0x15   :  { %535 = vmatpush3.bf16.msra.mxu1 %v586_v19 }
  0x16   :  { %536 = vmatprep.subr.bf16.mxu1 %v589_v22 }
  0x17   :  { %515 = vmatpush3.bf16.msra.mxu0 %v588_v21 }
  0x18   :  { %516 = vmatprep.subr.bf16.mxu0 %v591_v24 }
  0x19   :  { %537 = vmatpush3.bf16.msra.mxu1 %v590_v23 }
  0x1a   :  { %538 = vmatprep.subr.bf16.mxu1 %v593_v26 }
  0x1b   :  { %517 = vmatpush3.bf16.msra.mxu0 %v592_v25 }
  0x1c   :  { %518 = vmatprep.subr.bf16.mxu0 %v595_v28 }
  0x1d   :  { %539 = vmatpush3.bf16.msra.mxu1 %v594_v27 }
  0x1e   :  { %540 = vmatprep.subr.bf16.mxu1 %v597_v30 }
  0x1f   :  { %519 = vmatpush3.bf16.msra.mxu0 %v596_v29 }
  0x20   :  { %553 = vmatprep.subr.bf16.mxu0 %v608_v35 }
  0x21   :  { %541 = vmatpush3.bf16.msra.mxu1 %v601_v34 }
  0x22   :  { %367 = vmatmul.mubr.bf16.vlgmr.msra.gmra.mxu0 %v462_v32 }
  0x23   :  { %554 = vmatpush3.bf16.msra.mxu0 %v604_v39  ;;  %561 = vmatprep.mubr.msk.bf16.mxu0 %vm609_vm0, %v608_v35 }
  0x24   :  { %407 = vmatmul.mubr.bf16.vlgmr.msra.gmra.mxu1 %v464_v37  ;;  %555 = vmatprep.subr.bf16.mxu0 %v608_v35 }
  0x27   :  { %556 = vmatpush3.bf16.msra.mxu0 %v605_v40 }
  0x28   :  { %557 = vmatprep.subr.bf16.mxu0 %v608_v35 }
  0x2b   :  { %558 = vmatpush3.bf16.msra.mxu0 %v606_v41 }
  0x2c   :  { %559 = vmatprep.subr.bf16.mxu0 %v608_v35 }
  0x2f   :  { %560 = vmatpush3.bf16.msra.mxu0 %v607_v42 }
  0x32   :  { %562 = vmatmul.mubr.msk.bf16.vlgmr.msra.gmra.mxu0 %vm330_vm1, %v600_v43 }
  0xe2   :  { %v520_v44 = vpop.f32.mrf.mxu0 }
  0xe4   :  { %v521_v45 = vpop.f32.mrf.mxu0  ;;  %v542_v46 = vpop.f32.mrf.mxu1 }
  0xe5   :  { %v522_v51 = vadd.f32 %v521_v45, %v520_v44 }
  0xe6   :  { %v523_v47 = vpop.f32.mrf.mxu0  ;;  %v543_v48 = vpop.f32.mrf.mxu1 }
  0xe7   :  { %v369_v54 = vadd.f32 %v522_v51, %v461_v52  ;;  %v544_v55 = vadd.f32 %v543_v48, %v542_v46 }
  0xe8   :  { %v524_v49 = vpop.f32.mrf.mxu0  ;;  %v545_v50 = vpop.f32.mrf.mxu1 }
  0xe9   :  { %v409_v56 = vadd.f32 %v544_v55, %v369_v54 }
  0xea   :  { %v546_v53 = vpop.f32.mrf.mxu1 }
  0xf2   :  { %v448_v57 = vpop.f32.mrf.mxu0 }
  0xf3   :  { %v449_v58 = vadd.f32 %v448_v57, %v409_v56 }
  0xf4   :  { %v563_v59 = vpop.f32.mrf.mxu0 }
  0xf5   :  { %v454_v60 = vmax.f32 %v449_v58, 0.0 }
  0xf6   :  { %v451_v61 = vpop.f32.mrf.mxu0 }
  0xf7   :  { %v455_v62 = vpack.c.bf16 %v454_v60, %v454_v60 }
  0xf8   :  { %v564_v63 = vpop.f32.mrf.mxu0 }
  0xf9   :  { %456 = vst [vmem:[%s756_s3] sm:$0xf] %v455_v62 }

// kernel: one_stage_forward.11
= control target key start
LH: loop header
LB: loop body
LE: loop exit
PB: predicated region body
PF: predicated region fallthrough
CT: control target
= control target key end

     0   :  { %vm1277_vm0 = vmmov 0   ;;  %vm874_vm1 = vcmask 261120   ;;  %s1280_s25 = smov 2   ;;  %vm958_vm2 = vcmask 326656   ;;  %s1576_s1 = inlined_call_operand.vmem [shape: bf16[1152,32], index: 1, kind: input, shape index: {}]   ;;  %s1577_s0 = inlined_call_operand.vmem [shape: bf16[8,1152], index: 0, kind: input, shape index: {}]   ;;  %s1578_s4 = inlined_call_operand.vmem [shape: bf16[32,10], index: 4, kind: input, shape index: {}]   ;;  %s1579_s2 = inlined_call_operand.vmem [shape: f32[1,32], index: 2, kind: input, shape index: {}]   ;;  %s1580_s3 = inlined_call_operand.vmem [shape: f32[1,32], index: 3, kind: input, shape index: {}]   ;;  %s1581_s5 = inlined_call_operand.vmem [shape: f32[1,2], index: 5, kind: input, shape index: {}]   ;;  %s1582_s6 = inlined_call_operand.vmem [shape: f32[1,8], index: 6, kind: input, shape index: {}]   ;;  %s1583_s7 = inlined_call_operand.vmem [shape: f32[8,128], index: 7, kind: output, shape index: {}]  }
   0x1   :  { %v1189_v0 = vld [vmem:[%s1576_s1 + $0x78] sm:$0xff]   ;;  %v1193_v4 = vld [vmem:[%s1576_s1 + $0x70] sm:$0xff]   ;;  %v1197_v8 = vld [vmem:[%s1576_s1 + $0x68] sm:$0xff]  }
   0x2   :  { %v1190_v1 = vld [vmem:[%s1576_s1 + $0xf8] sm:$0xff]   ;;  %1054 = vmatprep.subr.bf16.mxu0 %v1189_v0  ;;  %v1194_v5 = vld [vmem:[%s1576_s1 + $0xf0] sm:$0xff]   ;;  %v1198_v9 = vld [vmem:[%s1576_s1 + $0xe8] sm:$0xff]  }
   0x3   :  { %v1191_v2 = vld [vmem:[%s1576_s1 + $0x38] sm:$0xff]   ;;  %1076 = vmatprep.subr.bf16.mxu1 %v1190_v1  ;;  %v1195_v6 = vld [vmem:[%s1576_s1 + $0x30] sm:$0xff]   ;;  %v1199_v10 = vld [vmem:[%s1576_s1 + $0x28] sm:$0xff]  }
   0x4   :  { %v1192_v3 = vld [vmem:[%s1576_s1 + $0xb8] sm:$0xff]   ;;  %1055 = vmatpush3.bf16.msra.mxu0 %v1191_v2  ;;  %v1196_v7 = vld [vmem:[%s1576_s1 + $0xb0] sm:$0xff]   ;;  %v1200_v11 = vld [vmem:[%s1576_s1 + $0xa8] sm:$0xff]  }
   0x5   :  { %1077 = vmatpush3.bf16.msra.mxu1 %v1192_v3  ;;  %1056 = vmatprep.subr.bf16.mxu0 %v1193_v4  ;;  %v1201_v12 = vld [vmem:[%s1576_s1 + $0x60] sm:$0xff]   ;;  %v1205_v16 = vld [vmem:[%s1576_s1 + $0x58] sm:$0xff]   ;;  %v1209_v20 = vld [vmem:[%s1576_s1 + $0x50] sm:$0xff]  }
   0x6   :  { %1078 = vmatprep.subr.bf16.mxu1 %v1194_v5  ;;  %v1202_v13 = vld [vmem:[%s1576_s1 + $0xe0] sm:$0xff]   ;;  %v1206_v17 = vld [vmem:[%s1576_s1 + $0xd8] sm:$0xff]   ;;  %v1210_v21 = vld [vmem:[%s1576_s1 + $0xd0] sm:$0xff]  }
   0x7   :  { %v1203_v14 = vld [vmem:[%s1576_s1 + $0x20] sm:$0xff]   ;;  %v1207_v18 = vld [vmem:[%s1576_s1 + $0x18] sm:$0xff]   ;;  %v1211_v22 = vld [vmem:[%s1576_s1 + $0x10] sm:$0xff]  }
   0x8   :  { %1057 = vmatpush3.bf16.msra.mxu0 %v1195_v6  ;;  %v1204_v15 = vld [vmem:[%s1576_s1 + $0xa0] sm:$0xff]   ;;  %v1208_v19 = vld [vmem:[%s1576_s1 + $0x98] sm:$0xff]   ;;  %v1212_v23 = vld [vmem:[%s1576_s1 + $0x90] sm:$0xff]  }
   0x9   :  { %1079 = vmatpush3.bf16.msra.mxu1 %v1196_v7  ;;  %1058 = vmatprep.subr.bf16.mxu0 %v1197_v8  ;;  %v1213_v24 = vld [vmem:[%s1576_s1 + $0x48] sm:$0xff]   ;;  %v1217_v28 = vld [vmem:[%s1576_s1 + $0x40] sm:$0xff]   ;;  %v1225_v38 = vld [vmem:[%s1576_s1 + $0x178] sm:$0xff]  }
   0xa   :  { %1080 = vmatprep.subr.bf16.mxu1 %v1198_v9  ;;  %v1214_v25 = vld [vmem:[%s1576_s1 + $0xc8] sm:$0xff]   ;;  %v1218_v29 = vld [vmem:[%s1576_s1 + $0xc0] sm:$0xff]   ;;  %v1226_v39 = vld [vmem:[%s1576_s1 + $0x138] sm:$0xff]  }
   0xb   :  { %v1215_v26 = vld [vmem:[%s1576_s1 + $0x8] sm:$0xff]   ;;  %v1219_v30 = vld [vmem:[%s1576_s1] sm:$0xff]   ;;  %v1227_v40 = vld [vmem:[%s1576_s1 + $0x1f8] sm:$0xff]  }
   0xc   :  { %1059 = vmatpush3.bf16.msra.mxu0 %v1199_v10  ;;  %v1216_v27 = vld [vmem:[%s1576_s1 + $0x88] sm:$0xff]   ;;  %v1220_v31 = vld [vmem:[%s1576_s1 + $0x80] sm:$0xff]   ;;  %v1228_v41 = vld [vmem:[%s1576_s1 + $0x1b8] sm:$0xff]  }
   0xd   :  { %1081 = vmatpush3.bf16.msra.mxu1 %v1200_v11  ;;  %1060 = vmatprep.subr.bf16.mxu0 %v1201_v12  ;;  %v27_v32 = vld [vmem:[%s1577_s0] sm:$0xff]  ;;  %v28_v33 = vld [vmem:[%s1577_s0 + $0x8] sm:$0xff]  ;;  %v1229_v42 = vld [vmem:[%s1576_s1 + $0x170] sm:$0xff]  }
   0xe   :  { %1082 = vmatprep.subr.bf16.mxu1 %v1202_v13  ;;  %v965_v34 = vcombine.low %v27_v32, %v27_v32  ;;  %v966_v35 = vcombine.high %v27_v32, %v27_v32  ;;  %v967_v36 = vcombine.low %v28_v33, %v28_v33  ;;  %v968_v37 = vcombine.high %v28_v33, %v28_v33  ;;  %v1230_v43 = vld [vmem:[%s1576_s1 + $0x130] sm:$0xff]   ;;  %v1233_v46 = vld [vmem:[%s1576_s1 + $0x168] sm:$0xff]   ;;  %v1237_v50 = vld [vmem:[%s1576_s1 + $0x160] sm:$0xff]  }
   0xf   :  { %v1231_v44 = vld [vmem:[%s1576_s1 + $0x1f0] sm:$0xff]   ;;  %v1234_v47 = vld [vmem:[%s1576_s1 + $0x128] sm:$0xff]   ;;  %v1238_v51 = vld [vmem:[%s1576_s1 + $0x120] sm:$0xff]   ;;  %v1276_v13 = vmov 0.0  }
  0x10   :  { %1061 = vmatpush3.bf16.msra.mxu0 %v1203_v14  ;;  %672 = vmatprep.mubr.bf16.mxu0 %v966_v35  ;;  %v1232_v45 = vld [vmem:[%s1576_s1 + $0x1b0] sm:$0xff]   ;;  %v1235_v48 = vld [vmem:[%s1576_s1 + $0x1e8] sm:$0xff]   ;;  %v1239_v52 = vld [vmem:[%s1576_s1 + $0x1e0] sm:$0xff]  }
  0x11   :  { %1083 = vmatpush3.bf16.msra.mxu1 %v1204_v15  ;;  %1062 = vmatprep.subr.bf16.mxu0 %v1205_v16  ;;  %v1236_v49 = vld [vmem:[%s1576_s1 + $0x1a8] sm:$0xff]   ;;  %v1240_v53 = vld [vmem:[%s1576_s1 + $0x1a0] sm:$0xff]   ;;  %v1241_v54 = vld [vmem:[%s1576_s1 + $0x158] sm:$0xff]  }
  0x12   :  { %1084 = vmatprep.subr.bf16.mxu1 %v1206_v17  ;;  %712 = vmatprep.mubr.bf16.mxu1 %v968_v37  ;;  %v1242_v55 = vld [vmem:[%s1576_s1 + $0x118] sm:$0xff]   ;;  %v1245_v58 = vld [vmem:[%s1576_s1 + $0x150] sm:$0xff]   ;;  %v1249_v62 = vld [vmem:[%s1576_s1 + $0x148] sm:$0xff]  }
  0x13   :  { %v1243_v56 = vld [vmem:[%s1576_s1 + $0x1d8] sm:$0xff]   ;;  %v1246_v59 = vld [vmem:[%s1576_s1 + $0x110] sm:$0xff]   ;;  %v1250_v63 = vld [vmem:[%s1576_s1 + $0x108] sm:$0xff]  }
  0x14   :  { %1063 = vmatpush3.bf16.msra.mxu0 %v1207_v18  ;;  %v1244_v57 = vld [vmem:[%s1576_s1 + $0x198] sm:$0xff]   ;;  %v1247_v60 = vld [vmem:[%s1576_s1 + $0x1d0] sm:$0xff]   ;;  %v1251_v0 = vld [vmem:[%s1576_s1 + $0x1c8] sm:$0xff]  }
  0x15   :  { %1085 = vmatpush3.bf16.msra.mxu1 %v1208_v19  ;;  %1064 = vmatprep.subr.bf16.mxu0 %v1209_v20  ;;  %v1248_v61 = vld [vmem:[%s1576_s1 + $0x190] sm:$0xff]   ;;  %v1252_v1 = vld [vmem:[%s1576_s1 + $0x188] sm:$0xff]   ;;  %v1253_v2 = vld [vmem:[%s1576_s1 + $0x140] sm:$0xff]  }
  0x16   :  { %1086 = vmatprep.subr.bf16.mxu1 %v1210_v21  ;;  %v1254_v3 = vld [vmem:[%s1576_s1 + $0x100] sm:$0xff]   ;;  %v29_v5 = vld [vmem:[%s1577_s0 + $0x10] sm:$0xff]  ;;  %v30_v9 = vld [vmem:[%s1577_s0 + $0x18] sm:$0xff] }
  0x17   :  { %v1255_v4 = vld [vmem:[%s1576_s1 + $0x1c0] sm:$0xff]   ;;  %v970_v6 = vcombine.high %v29_v5, %v29_v5  ;;  %v969_v8 = vcombine.low %v29_v5, %v29_v5  ;;  %v971_v10 = vcombine.low %v30_v9, %v30_v9  ;;  %v972_v11 = vcombine.high %v30_v9, %v30_v9  ;;  %v1261_v12 = vld [vmem:[%s1576_s1 + $0x238] sm:$0xff]   ;;  %v1262_v14 = vld [vmem:[%s1576_s1 + $0x230] sm:$0xff]  }
  0x18   :  { %1065 = vmatpush3.bf16.msra.mxu0 %v1211_v22  ;;  %v1258_v7 = vld [vmem:[%s1576_s1 + $0x180] sm:$0xff]   ;;  %v1263_v15 = vld [vmem:[%s1576_s1 + $0x228] sm:$0xff]   ;;  %v1265_v17 = vld [vmem:[%s1576_s1 + $0x218] sm:$0xff]  }
  0x19   :  { %1087 = vmatpush3.bf16.msra.mxu1 %v1212_v23  ;;  %1066 = vmatprep.subr.bf16.mxu0 %v1213_v24  ;;  %v1264_v16 = vld [vmem:[%s1576_s1 + $0x220] sm:$0xff]   ;;  %v1266_v18 = vld [vmem:[%s1576_s1 + $0x210] sm:$0xff]   ;;  %v1267_v19 = vld [vmem:[%s1576_s1 + $0x208] sm:$0xff]  }
  0x1a   :  { %1088 = vmatprep.subr.bf16.mxu1 %v1214_v25  ;;  %v1268_v20 = vld [vmem:[%s1576_s1 + $0x200] sm:$0xff]   ;;  %v1270_v22 = vld [vmem:[%s1578_s4 + $0x8] sm:$0xff]  }
  0x1b   :  { %v1269_v21 = vld [vmem:[%s1577_s0 + $0x20] ss:$0 sps:$4 sm:$0xff]  }
  0x1c   :  { %1067 = vmatpush3.bf16.msra.mxu0 %v1215_v26  ;;  %v1271_v23 = vld [vmem:[%s1578_s4] sm:$0xff]  }
  0x1d   :  { %1089 = vmatpush3.bf16.msra.mxu1 %v1216_v27  ;;  %1068 = vmatprep.subr.bf16.mxu0 %v1217_v28 }
  0x1e   :  { %1090 = vmatprep.subr.bf16.mxu1 %v1218_v29 }
  0x20   :  { %1069 = vmatpush3.bf16.msra.mxu0 %v1219_v30 }
  0x21   :  { %1091 = vmatpush3.bf16.msra.mxu1 %v1220_v31  ;;  %1098 = vmatprep.subr.bf16.mxu0 %v1225_v38 }
  0x22   :  { %1120 = vmatprep.subr.bf16.mxu1 %v1227_v40 }
  0x23   :  { %673 = vmatmul.mubr.bf16.vlgmr.msra.gmra.mxu0 %v965_v34 }
  0x24   :  { %713 = vmatmul.mubr.bf16.vlgmr.msra.gmra.mxu1 %v967_v36  ;;  %1099 = vmatpush3.bf16.msra.mxu0 %v1226_v39 }
  0x25   :  { %1121 = vmatpush3.bf16.msra.mxu1 %v1228_v41  ;;  %1100 = vmatprep.subr.bf16.mxu0 %v1229_v42 }
  0x26   :  { %1122 = vmatprep.subr.bf16.mxu1 %v1231_v44  ;;  %752 = vmatprep.mubr.bf16.mxu0 %v970_v6 }
  0x27   :  { %792 = vmatprep.mubr.bf16.mxu1 %v972_v11 }
  0x28   :  { %1101 = vmatpush3.bf16.msra.mxu0 %v1230_v43 }
  0x29   :  { %1123 = vmatpush3.bf16.msra.mxu1 %v1232_v45  ;;  %1102 = vmatprep.subr.bf16.mxu0 %v1233_v46 }
  0x2a   :  { %1124 = vmatprep.subr.bf16.mxu1 %v1235_v48  ;;  %v1046_v48 = vld [vmem:[%s1579_s2] ss:$0 sm:$0xff]  ;;  %s1278_s2 = smov 127  }
  0x2c   :  { %1103 = vmatpush3.bf16.msra.mxu0 %v1234_v47 }
  0x2d   :  { %1125 = vmatpush3.bf16.msra.mxu1 %v1236_v49  ;;  %1104 = vmatprep.subr.bf16.mxu0 %v1237_v50  ;;  %v1047_v50 = vld [vmem:[%s1580_s3] ss:$0 sm:$0xff] }
  0x2e   :  { %1126 = vmatprep.subr.bf16.mxu1 %v1239_v52 }
  0x30   :  { %1105 = vmatpush3.bf16.msra.mxu0 %v1238_v51 }
  0x31   :  { %1127 = vmatpush3.bf16.msra.mxu1 %v1240_v53  ;;  %1106 = vmatprep.subr.bf16.mxu0 %v1241_v54 }
  0x32   :  { %1128 = vmatprep.subr.bf16.mxu1 %v1243_v56 }
  0x34   :  { %1107 = vmatpush3.bf16.msra.mxu0 %v1242_v55 }
  0x35   :  { %1129 = vmatpush3.bf16.msra.mxu1 %v1244_v57  ;;  %1108 = vmatprep.subr.bf16.mxu0 %v1245_v58  ;;  %v1051_v58 = vld [vmem:[%s1581_s5] ss:$0 sm:$0xff]  ;;  %s1281_s5 = smov 30  }
  0x36   :  { %1130 = vmatprep.subr.bf16.mxu1 %v1247_v60 }
  0x38   :  { %1109 = vmatpush3.bf16.msra.mxu0 %v1246_v59 }
  0x39   :  { %1131 = vmatpush3.bf16.msra.mxu1 %v1248_v61  ;;  %1110 = vmatprep.subr.bf16.mxu0 %v1249_v62 }
  0x3a   :  { %1132 = vmatprep.subr.bf16.mxu1 %v1251_v0  ;;  %v1279_v0 = vmov 0  }
  0x3b   :  { %1188 = vset.pattern.permute.xlu0 %v1279_v0 }
  0x3c   :  { %1111 = vmatpush3.bf16.msra.mxu0 %v1250_v63 }
  0x3d   :  { %1133 = vmatpush3.bf16.msra.mxu1 %v1252_v1  ;;  %1112 = vmatprep.subr.bf16.mxu0 %v1253_v2  ;;  %v1053_v1 = vld [vmem:[%s1582_s6] ss:$0 sm:$0xff] }
  0x3e   :  { %1134 = vmatprep.subr.bf16.mxu1 %v1255_v4  ;;  %949 = vrot.lane.b32.xlu1 %v1053_v1, %s1280_s25 }
  0x40   :  { %1113 = vmatpush3.bf16.msra.mxu0 %v1254_v3 }
  0x41   :  { %1135 = vmatpush3.bf16.msra.mxu1 %v1258_v7  ;;  %1154 = vmatprep.subr.bf16.mxu0 %v1276_v13 }
  0x42   :  { %1174 = vmatprep.subr.bf16.mxu1 %v1276_v13 }
  0x43   :  { %753 = vmatmul.mubr.bf16.vlgmr.msra.gmra.mxu0 %v969_v8 }
  0x44   :  { %1155 = vmatpush3.bf16.msra.mxu0 %v1261_v12  ;;  %793 = vmatmul.mubr.bf16.vlgmr.msra.gmra.mxu1 %v971_v10 }
  0x45   :  { %1156 = vmatprep.subr.bf16.mxu0 %v1276_v13  ;;  %1170 = vmatprep.mubr.msk.bf16.mxu0 %vm1277_vm0, %v1276_v13 }
  0x46   :  { %1178 = vmatprep.mubr.msk.bf16.mxu1 %vm1277_vm0, %v1276_v13  ;;  %1175 = vmatpush3.bf16.msra.mxu1 %v1270_v22 }
  0x47   :  { %1176 = vmatprep.subr.bf16.mxu1 %v1276_v13 }
  0x48   :  { %1157 = vmatpush3.bf16.msra.mxu0 %v1262_v14 }
  0x49   :  { %1158 = vmatprep.subr.bf16.mxu0 %v1276_v13 }
  0x4a   :  { %1177 = vmatpush3.bf16.msra.mxu1 %v1271_v23 }
  0x4c   :  { %1159 = vmatpush3.bf16.msra.mxu0 %v1263_v15 }
  0x4d   :  { %1160 = vmatprep.subr.bf16.mxu0 %v1276_v13 }
  0x50   :  { %1161 = vmatpush3.bf16.msra.mxu0 %v1264_v16 }
  0x51   :  { %1162 = vmatprep.subr.bf16.mxu0 %v1276_v13 }
  0x54   :  { %1163 = vmatpush3.bf16.msra.mxu0 %v1265_v17 }
  0x55   :  { %1164 = vmatprep.subr.bf16.mxu0 %v1276_v13 }
  0x58   :  { %1165 = vmatpush3.bf16.msra.mxu0 %v1266_v18 }
  0x59   :  { %1166 = vmatprep.subr.bf16.mxu0 %v1276_v13 }
  0x5c   :  { %1167 = vmatpush3.bf16.msra.mxu0 %v1267_v19 }
  0x5d   :  { %1168 = vmatprep.subr.bf16.mxu0 %v1276_v13 }
  0x60   :  { %1169 = vmatpush3.bf16.msra.mxu0 %v1268_v20 }
  0x63   :  { %1171 = vmatmul.mubr.bf16.vlgmr.msra.gmra.mxu0 %v1269_v21 }
  0xb0   :  { %v950_v9 = vpop.permute.xlu1 %949 }
  0xe3   :  { %v1070_v24 = vpop.f32.mrf.mxu0 }
  0xe4   :  { %v1092_v25 = vpop.f32.mrf.mxu1 }
  0xe5   :  { %v1071_v26 = vpop.f32.mrf.mxu0 }
  0xe6   :  { %v1093_v27 = vpop.f32.mrf.mxu1  ;;  %v1072_v40 = vadd.f32 %v1071_v26, %v1070_v24 }
  0xe7   :  { %v1073_v28 = vpop.f32.mrf.mxu0  ;;  %v1094_v41 = vadd.f32 %v1093_v27, %v1092_v25 }
  0xe8   :  { %v1095_v29 = vpop.f32.mrf.mxu1 }
  0xe9   :  { %v1074_v30 = vpop.f32.mrf.mxu0  ;;  %v715_v43 = vadd.f32 %v1094_v41, %v1072_v40 }
  0xea   :  { %v1096_v31 = vpop.f32.mrf.mxu1 }
 0x103   :  { %v1114_v32 = vpop.f32.mrf.mxu0 }
 0x104   :  { %v1136_v33 = vpop.f32.mrf.mxu1 }
 0x105   :  { %v1115_v34 = vpop.f32.mrf.mxu0 }
 0x106   :  { %v1137_v35 = vpop.f32.mrf.mxu1  ;;  %v1116_v42 = vadd.f32 %v1115_v34, %v1114_v32 }
 0x107   :  { %v1117_v36 = vpop.f32.mrf.mxu0  ;;  %v1138_v45 = vadd.f32 %v1137_v35, %v1136_v33 }
 0x108   :  { %v1139_v37 = vpop.f32.mrf.mxu1  ;;  %v755_v44 = vadd.f32 %v1116_v42, %v715_v43 }
 0x109   :  { %v1118_v38 = vpop.f32.mrf.mxu0 }
 0x10a   :  { %v1140_v39 = vpop.f32.mrf.mxu1  ;;  %v795_v46 = vadd.f32 %v1138_v45, %v755_v44 }
 0x123   :  { %v834_v47 = vpop.f32.mrf.mxu0 }
 0x124   :  { %v835_v49 = vadd.f32 %v834_v47, %v795_v46 }
 0x125   :  { %v1172_v51 = vpop.f32.mrf.mxu0 }
 0x126   :  { %v847_v52 = vmul.f32 %v1046_v48, %v835_v49 }
 0x127   :  { %v837_v53 = vpop.f32.mrf.mxu0 }
 0x128   :  { %v855_v54 = vadd.f32 %v1047_v50, %v847_v52 }
 0x129   :  { %v1173_v55 = vpop.f32.mrf.mxu0 }
 0x12a   :  { %v856_v56 = vmax.f32 %v855_v54, 0.0 }
 0x12c   :  { %v857_v57 = vpack.c.bf16 %v856_v56, %v856_v56 }
 0x12e   :  { %1179 = vmatmul.mubr.msk.bf16.vlgmr.msra.gmra.mxu1 %vm874_vm1, %v857_v57 }
 0x1ee   :  { %v912_v59 = vpop.f32.mrf.mxu1 }
 0x1ef   :  { %v925_v60 = vadd.f32 %v1051_v58, %v912_v59 }
 0x1f0   :  { %v1180_v61 = vpop.f32.mrf.mxu1 }
 0x1f1   :  { %927 = vrot.lane.b32.xlu0 %v925_v60, %s1278_s2 }
 0x1f2   :  { %v915_v62 = vpop.f32.mrf.mxu1 }
 0x1f4   :  { %v1181_v63 = vpop.f32.mrf.mxu1 }
 0x263   :  { %v928_v2 = vpop.permute.xlu0 %927 }
 0x264   :  { %v930_v3 = vmax.f32 %v925_v60, %v928_v2 }
 0x266   :  { %v1052_v4 = vmul.f32 -1.442695, %v930_v3 }
 0x268   :  { %1272 = vpow2.f32 %v1052_v4 }
 0x275   :  { %v1273_v5 = vpop.eup %1272 }
 0x276   :  { %v934_v6 = vadd.f32 1.0, %v1273_v5 }
 0x278   :  { %1274 = vrcp.f32 %v934_v6 }
 0x285   :  { %v1275_v7 = vpop.eup %1274 }
 0x286   :  { %939 = vperm.xlu0 %1188, %v1275_v7  }
 0x301   :  { %v940_v8 = vpop.permute.xlu0 %939 }
 0x302   :  { %v942_v10 = vmul.f32 %v940_v8, %v912_v59 }
 0x304   :  { %v952_v11 = vadd.f32 %v950_v9, %v942_v10 }
 0x306   :  { %954 = vrot.lane.b32.xlu1 %v952_v11, %s1281_s5 }
 0x378   :  { %v955_v12 = vpop.permute.xlu1 %954 }
 0x379   :  { %v957_v13 = vsel %vm874_vm1, %v856_v56, %v955_v12 }
 0x37a   :  { %v959_v14 = vsel %vm958_vm2, %v957_v13, 0.0 }
 0x37b   :  { %960 = vst [vmem:[%s1583_s7] sm:$0xff] %v959_v14 }

// kernel: one_stage_forward.12
= control target key start
LH: loop header
LB: loop body
LE: loop exit
PB: predicated region body
PF: predicated region fallthrough
CT: control target
= control target key end

     0   :  { %s1463_s24 = smov 0   ;;  %s1690_s0 = inlined_call_operand.vmem [shape: bf16[32,864], index: 0, kind: input, shape index: {}]   ;;  %s1691_s1 = inlined_call_operand.vmem [shape: bf16[864,32], index: 1, kind: input, shape index: {}]   ;;  %s1692_s2 = inlined_call_operand.vmem [shape: f32[1,32], index: 2, kind: input, shape index: {}]   ;;  %s1693_s3 = inlined_call_operand.vmem [shape: f32[1,32], index: 3, kind: input, shape index: {}]   ;;  %s1694_s4 = inlined_call_operand.vmem [shape: bf16[32,10], index: 4, kind: input, shape index: {}]   ;;  %s1695_s5 = inlined_call_operand.vmem [shape: f32[1,2], index: 5, kind: input, shape index: {}]   ;;  %s1696_s6 = inlined_call_operand.vmem [shape: f32[1,8], index: 6, kind: input, shape index: {}]   ;;  %s1697_s7 = inlined_call_operand.vmem [shape: f32[32,128], index: 7, kind: output, shape index: {}]  }
   0x1 LB: > { %s1136_s25 = sadd.s32 4294967295, %s1415_s24   ;;  %p1140_p0 = scmp.ge.s32.totalorder %s1415_s24, 1  ;;  %s1415_s24 = sphi %s1463_s24, %s17_s24  }
   0x2   : > { %p239_p1 = scmp.lt.s32.totalorder %s1415_s24, 3 }
   0x4   : > { %p240_p2 = pnand %p1140_p0, %p239_p1 }
   0x5   : > { %s1141_s12 = sshll.u32 (!%p240_p2), %s1136_s25, 1  ;;  %s1419_s21 = smov (!%p240_p2), 127  }
   0x6   : > { %243 = sbr.rel (%p240_p2) target bundleno = 884 (0x374), region = 48  ;;  %p273_p3 = scmp.lt.s32.totalorder (!%p240_p2), %s1141_s12, 3 }
   0x7   : > { %s1421_s27 = smov (!%p240_p2), 2   ;;  %s1422_s28 = smov (!%p240_p2), 30  }
   0xb   : > { %v1335_v0 = vld [vmem:[%s1691_s1 + $0x78] sm:$0xff]   ;;  %v1339_v4 = vld [vmem:[%s1691_s1 + $0x70] sm:$0xff]   ;;  %v1343_v8 = vld [vmem:[%s1691_s1 + $0x68] sm:$0xff]   ;;  %s1699_s12 = smov (!%p273_p3, %s1141_s12), 3  ;;  %v1417_v36 = vmov 0.0   ;;  %vm1418_vm0 = vmmov 0  }
   0xc   : > { %v1336_v1 = vld [vmem:[%s1691_s1 + $0xf8] sm:$0xff]   ;;  %1218 = vmatprep.subr.bf16.mxu0 %v1335_v0  ;;  %v1340_v5 = vld [vmem:[%s1691_s1 + $0xf0] sm:$0xff]   ;;  %v1344_v9 = vld [vmem:[%s1691_s1 + $0xe8] sm:$0xff]   ;;  %s1318_s14 = smul.u32 28, %s1699_s12  ;;  %vm761_vm1 = vcmask 785408   ;;  %vm966_vm2 = vcmask 261120  }
   0xd   : > { %v1337_v2 = vld [vmem:[%s1691_s1 + $0x38] sm:$0xff]   ;;  %1240 = vmatprep.subr.bf16.mxu1 %v1336_v1  ;;  %v1341_v6 = vld [vmem:[%s1691_s1 + $0x30] sm:$0xff]   ;;  %v1345_v10 = vld [vmem:[%s1691_s1 + $0x28] sm:$0xff]   ;;  %s1144_s29 = sshll.u32 %s1699_s12, 3  ;;  %vm1075_vm3 = vcmask 326656  }
   0xe   : > { %v1338_v3 = vld [vmem:[%s1691_s1 + $0xb8] sm:$0xff]   ;;  %1219 = vmatpush3.bf16.msra.mxu0 %v1337_v2  ;;  %v1342_v7 = vld [vmem:[%s1691_s1 + $0xb0] sm:$0xff]   ;;  %v1346_v11 = vld [vmem:[%s1691_s1 + $0xa8] sm:$0xff]   ;;  %s1569_s26 = scalar_lea.vmem %s1690_s0, %s1318_s14  ;;  %s283_s9 = scalar_lea.vmem %s1697_s7, %s1144_s29 }
   0xf   : > { %1241 = vmatpush3.bf16.msra.mxu1 %v1338_v3  ;;  %1220 = vmatprep.subr.bf16.mxu0 %v1339_v4  ;;  %v1347_v12 = vld [vmem:[%s1691_s1 + $0x60] sm:$0xff]   ;;  %v1351_v16 = vld [vmem:[%s1691_s1 + $0x58] sm:$0xff]   ;;  %v1355_v20 = vld [vmem:[%s1691_s1 + $0x50] sm:$0xff]  }
  0x10   : > { %1242 = vmatprep.subr.bf16.mxu1 %v1340_v5  ;;  %v1348_v13 = vld [vmem:[%s1691_s1 + $0xe0] sm:$0xff]   ;;  %v1352_v17 = vld [vmem:[%s1691_s1 + $0xd8] sm:$0xff]   ;;  %v1356_v21 = vld [vmem:[%s1691_s1 + $0xd0] sm:$0xff]  }
  0x11   : > { %v1349_v14 = vld [vmem:[%s1691_s1 + $0x20] sm:$0xff]   ;;  %v1353_v18 = vld [vmem:[%s1691_s1 + $0x18] sm:$0xff]   ;;  %v1357_v22 = vld [vmem:[%s1691_s1 + $0x10] sm:$0xff]  }
  0x12   : > { %1221 = vmatpush3.bf16.msra.mxu0 %v1341_v6  ;;  %v1350_v15 = vld [vmem:[%s1691_s1 + $0xa0] sm:$0xff]   ;;  %v1354_v19 = vld [vmem:[%s1691_s1 + $0x98] sm:$0xff]   ;;  %v1358_v23 = vld [vmem:[%s1691_s1 + $0x90] sm:$0xff]  }
  0x13   : > { %1243 = vmatpush3.bf16.msra.mxu1 %v1342_v7  ;;  %1222 = vmatprep.subr.bf16.mxu0 %v1343_v8  ;;  %v1359_v24 = vld [vmem:[%s1691_s1 + $0x48] sm:$0xff]   ;;  %v1363_v28 = vld [vmem:[%s1691_s1 + $0x40] sm:$0xff]   ;;  %v1373_v37 = vld [vmem:[%s1691_s1 + $0x178] sm:$0xff]  }
  0x14   : > { %1244 = vmatprep.subr.bf16.mxu1 %v1344_v9  ;;  %v1360_v25 = vld [vmem:[%s1691_s1 + $0xc8] sm:$0xff]   ;;  %v1364_v29 = vld [vmem:[%s1691_s1 + $0xc0] sm:$0xff]   ;;  %v1374_v38 = vld [vmem:[%s1691_s1 + $0x138] sm:$0xff]  }
  0x15   : > { %v1361_v26 = vld [vmem:[%s1691_s1 + $0x8] sm:$0xff]   ;;  %v1365_v30 = vld [vmem:[%s1691_s1] sm:$0xff]   ;;  %v1375_v39 = vld [vmem:[%s1691_s1 + $0x170] sm:$0xff]  }
  0x16   : > { %1223 = vmatpush3.bf16.msra.mxu0 %v1345_v10  ;;  %v1362_v27 = vld [vmem:[%s1691_s1 + $0x88] sm:$0xff]   ;;  %v1366_v31 = vld [vmem:[%s1691_s1 + $0x80] sm:$0xff]   ;;  %v1376_v40 = vld [vmem:[%s1691_s1 + $0x130] sm:$0xff]  }
  0x17   : > { %1245 = vmatpush3.bf16.msra.mxu1 %v1346_v11  ;;  %1224 = vmatprep.subr.bf16.mxu0 %v1347_v12  ;;  %v1367_v32 = vld [vmem:[%s1569_s26] ss:$28 sps:$4 sm:$0xff]   ;;  %v1370_v34 = vld [vmem:[%s1569_s26 + $0x8] ss:$28 sps:$4 sm:$0xff]   ;;  %v1386_v50 = vld [vmem:[%s1691_s1 + $0x150] sm:$0xff]  }
  0x18   : > { %1246 = vmatprep.subr.bf16.mxu1 %v1348_v13  ;;  %v1369_v33 = vld [vmem:[%s1569_s26 + $0x4] ss:$28 sps:$4 sm:$0xff]   ;;  %v1372_v35 = vld [vmem:[%s1569_s26 + $0xc] ss:$28 sps:$4 sm:$0xff]   ;;  %v1383_v47 = vld [vmem:[%s1691_s1 + $0x158] sm:$0xff]  }
  0x19   : > { %797 = vmatprep.mubr.bf16.mxu0 %v1369_v33  ;;  %838 = vmatprep.mubr.bf16.mxu1 %v1372_v35  ;;  %v1377_v41 = vld [vmem:[%s1691_s1 + $0x168] sm:$0xff]   ;;  %v1380_v44 = vld [vmem:[%s1691_s1 + $0x160] sm:$0xff]   ;;  %v1385_v48 = vld [vmem:[%s1691_s1 + $0x198] sm:$0xff]  }
  0x1a   : > { %1225 = vmatpush3.bf16.msra.mxu0 %v1349_v14  ;;  %v1379_v42 = vld [vmem:[%s1691_s1 + $0x1a8] sm:$0xff]   ;;  %v1382_v45 = vld [vmem:[%s1691_s1 + $0x1a0] sm:$0xff]   ;;  %v1384_v49 = vld [vmem:[%s1691_s1 + $0x118] sm:$0xff]  }
  0x1b   : > { %1247 = vmatpush3.bf16.msra.mxu1 %v1350_v15  ;;  %1226 = vmatprep.subr.bf16.mxu0 %v1351_v16  ;;  %v1378_v43 = vld [vmem:[%s1691_s1 + $0x128] sm:$0xff]   ;;  %v1381_v46 = vld [vmem:[%s1691_s1 + $0x120] sm:$0xff]   ;;  %v1388_v51 = vld [vmem:[%s1691_s1 + $0x190] sm:$0xff]  }
  0x1c   : > { %1248 = vmatprep.subr.bf16.mxu1 %v1352_v17  ;;  %v1387_v52 = vld [vmem:[%s1691_s1 + $0x110] sm:$0xff]   ;;  %v1389_v53 = vld [vmem:[%s1691_s1 + $0x148] sm:$0xff]   ;;  %v1392_v56 = vld [vmem:[%s1691_s1 + $0x140] sm:$0xff]  }
  0x1d   : > { %v1391_v54 = vld [vmem:[%s1691_s1 + $0x188] sm:$0xff]   ;;  %v1397_v57 = vld [vmem:[%s1569_s26 + $0x14] ss:$28 sps:$4 sm:$0xff]   ;;  %v1394_v58 = vld [vmem:[%s1691_s1 + $0x180] sm:$0xff]  }
  0x1e   : > { %1227 = vmatpush3.bf16.msra.mxu0 %v1353_v18  ;;  %v1390_v55 = vld [vmem:[%s1691_s1 + $0x108] sm:$0xff]   ;;  %v1393_v59 = vld [vmem:[%s1691_s1 + $0x100] sm:$0xff]   ;;  %v1398_v60 = vld [vmem:[%s1569_s26 + $0x18] ss:$28 sps:$4 sm:$0xff]  }
  0x1f   : > { %1249 = vmatpush3.bf16.msra.mxu1 %v1354_v19  ;;  %1228 = vmatprep.subr.bf16.mxu0 %v1355_v20  ;;  %v1395_v61 = vld [vmem:[%s1569_s26 + $0x10] ss:$28 sps:$4 sm:$0xff]   ;;  %v1400_v63 = vld [vmem:[%s1694_s4] sm:$0xff]  }
  0x20   : > { %1250 = vmatprep.subr.bf16.mxu1 %v1356_v21  ;;  %v1399_v62 = vld [vmem:[%s1694_s4 + $0x8] sm:$0xff]  }
  0x22   : > { %1229 = vmatpush3.bf16.msra.mxu0 %v1357_v22  ;;  %v1207_v22 = vld [vmem:[%s1692_s2] ss:$0 sm:$0xff] }
  0x23   : > { %1251 = vmatpush3.bf16.msra.mxu1 %v1358_v23  ;;  %1230 = vmatprep.subr.bf16.mxu0 %v1359_v24 }
  0x24   : > { %1252 = vmatprep.subr.bf16.mxu1 %v1360_v25 }
  0x26   : > { %1231 = vmatpush3.bf16.msra.mxu0 %v1361_v26 }
  0x27   : > { %1253 = vmatpush3.bf16.msra.mxu1 %v1362_v27  ;;  %1232 = vmatprep.subr.bf16.mxu0 %v1363_v28 }
  0x28   : > { %1254 = vmatprep.subr.bf16.mxu1 %v1364_v29  ;;  %v1208_v29 = vld [vmem:[%s1693_s3] ss:$0 sm:$0xff] }
  0x2a   : > { %1233 = vmatpush3.bf16.msra.mxu0 %v1365_v30 }
  0x2b   : > { %1255 = vmatpush3.bf16.msra.mxu1 %v1366_v31  ;;  %1262 = vmatprep.subr.bf16.mxu0 %v1373_v37  ;;  %v1212_v37 = vld [vmem:[%s1695_s5] ss:$0 sm:$0xff] }
  0x2c   : > { %1294 = vmatprep.subr.bf16.mxu1 %v1417_v36 }
  0x2d   : > { %798 = vmatmul.mubr.bf16.vlgmr.msra.gmra.mxu0 %v1367_v32 }
  0x2e   : > { %839 = vmatmul.mubr.bf16.vlgmr.msra.gmra.mxu1 %v1370_v34  ;;  %1263 = vmatpush3.bf16.msra.mxu0 %v1374_v38 }
  0x2f   : > { %1306 = vmatprep.mubr.msk.bf16.mxu1 %vm1418_vm0, %v1417_v36  ;;  %1264 = vmatprep.subr.bf16.mxu0 %v1375_v39 }
  0x30   : > { %1295 = vmatpush3.bf16.msra.mxu1 %v1379_v42  ;;  %879 = vmatprep.mubr.bf16.mxu0 %v1397_v57 }
  0x31   : > { %1296 = vmatprep.subr.bf16.mxu1 %v1417_v36 }
  0x32   : > { %1265 = vmatpush3.bf16.msra.mxu0 %v1376_v40 }
  0x33   : > { %1266 = vmatprep.subr.bf16.mxu0 %v1377_v41 }
  0x34   : > { %1297 = vmatpush3.bf16.msra.mxu1 %v1382_v45  ;;  %v1215_v45 = vld [vmem:[%s1696_s6] ss:$0 sm:$0xff] }
  0x35   : > { %1298 = vmatprep.subr.bf16.mxu1 %v1417_v36 }
  0x36   : > { %1267 = vmatpush3.bf16.msra.mxu0 %v1378_v43 }
  0x37   : > { %1268 = vmatprep.subr.bf16.mxu0 %v1380_v44  ;;  %v1420_v44 = vmov 0  }
  0x38   : > { %1299 = vmatpush3.bf16.msra.mxu1 %v1385_v48  ;;  %1333 = vset.pattern.permute.xlu1 %v1420_v44 }
  0x39   : > { %1300 = vmatprep.subr.bf16.mxu1 %v1417_v36  ;;  %1334 = vset.pattern.permute.xlu0 %v1420_v44 }
  0x3a   : > { %1269 = vmatpush3.bf16.msra.mxu0 %v1381_v46 }
  0x3b   : > { %1270 = vmatprep.subr.bf16.mxu0 %v1383_v47 }
  0x3c   : > { %1301 = vmatpush3.bf16.msra.mxu1 %v1388_v51 }
  0x3d   : > { %1302 = vmatprep.subr.bf16.mxu1 %v1417_v36 }
  0x3e   : > { %1271 = vmatpush3.bf16.msra.mxu0 %v1384_v49 }
  0x3f   : > { %1272 = vmatprep.subr.bf16.mxu0 %v1386_v50 }
  0x40   : > { %1303 = vmatpush3.bf16.msra.mxu1 %v1391_v54 }
  0x41   : > { %1304 = vmatprep.subr.bf16.mxu1 %v1417_v36 }
  0x42   : > { %1273 = vmatpush3.bf16.msra.mxu0 %v1387_v52 }
  0x43   : > { %1274 = vmatprep.subr.bf16.mxu0 %v1389_v53 }
  0x44   : > { %1305 = vmatpush3.bf16.msra.mxu1 %v1394_v58 }
  0x45   : > { %1310 = vmatprep.subr.bf16.mxu1 %v1417_v36 }
  0x46   : > { %1275 = vmatpush3.bf16.msra.mxu0 %v1390_v55 }
  0x47   : > { %1276 = vmatprep.subr.bf16.mxu0 %v1392_v56  ;;  %1307 = vmatmul.mubr.msk.bf16.vlgmr.msra.gmra.mxu1 %vm761_vm1, %v1398_v60 }
  0x48   : > { %1314 = vmatprep.mubr.msk.bf16.mxu1 %vm1418_vm0, %v1417_v36  ;;  %1311 = vmatpush3.bf16.msra.mxu1 %v1399_v62 }
  0x49   : > { %1312 = vmatprep.subr.bf16.mxu1 %v1417_v36 }
  0x4a   : > { %1277 = vmatpush3.bf16.msra.mxu0 %v1393_v59 }
  0x4c   : > { %1313 = vmatpush3.bf16.msra.mxu1 %v1400_v63 }
  0x4d   : > { %880 = vmatmul.mubr.bf16.vlgmr.msra.gmra.mxu0 %v1395_v61 }
  0xed   : > { %v1234_v1 = vpop.f32.mrf.mxu0 }
  0xee   : > { %v1256_v0 = vpop.f32.mrf.mxu1 }
  0xef   : > { %v1235_v3 = vpop.f32.mrf.mxu0 }
  0xf0   : > { %v1257_v2 = vpop.f32.mrf.mxu1  ;;  %v1236_v9 = vadd.f32 %v1235_v3, %v1234_v1 }
  0xf1   : > { %v1237_v5 = vpop.f32.mrf.mxu0  ;;  %v1258_v10 = vadd.f32 %v1257_v2, %v1256_v0 }
  0xf2   : > { %v1259_v4 = vpop.f32.mrf.mxu1 }
  0xf3   : > { %v1238_v8 = vpop.f32.mrf.mxu0  ;;  %v841_v15 = vadd.f32 %v1258_v10, %v1236_v9 }
  0xf4   : > { %v1260_v6 = vpop.f32.mrf.mxu1  ;;  %v1239_v16 = vadd.f32 %v1238_v8, %v1237_v5 }
  0xf5   : > { %v1261_v17 = vadd.f32 %v1260_v6, %v1259_v4 }
  0xf7   : > { %v844_v24 = vadd.f32 %v1261_v17, %v1239_v16 }
 0x107   : > { %v922_v7 = vpop.f32.mrf.mxu1 }
 0x109   : > { %v1308_v11 = vpop.f32.mrf.mxu1 }
 0x10b   : > { %v925_v13 = vpop.f32.mrf.mxu1 }
 0x10d   : > { %v1278_v12 = vpop.f32.mrf.mxu0  ;;  %v1309_v19 = vpop.f32.mrf.mxu1 }
 0x10f   : > { %v1279_v14 = vpop.f32.mrf.mxu0 }
 0x110   : > { %v1280_v18 = vadd.f32 %v1279_v14, %v1278_v12 }
 0x111   : > { %v1281_v20 = vpop.f32.mrf.mxu0 }
 0x112   : > { %v882_v21 = vadd.f32 %v1280_v18, %v841_v15 }
 0x113   : > { %v1282_v23 = vpop.f32.mrf.mxu0 }
 0x114   : > { %v923_v25 = vadd.f32 %v922_v7, %v882_v21  ;;  %v1283_v26 = vadd.f32 %v1282_v23, %v1281_v20 }
 0x116   : > { %v936_v27 = vmul.f32 %v1207_v22, %v923_v25  ;;  %v885_v28 = vadd.f32 %v1283_v26, %v844_v24 }
 0x118   : > { %v926_v30 = vadd.f32 %v925_v13, %v885_v28  ;;  %v945_v31 = vadd.f32 %v1208_v29, %v936_v27 }
 0x11a   : > { %v937_v32 = vmul.f32 %v1207_v22, %v926_v30  ;;  %v947_v34 = vmax.f32 %v945_v31, 0.0 }
 0x11c   : > { %v946_v33 = vadd.f32 %v1208_v29, %v937_v32 }
 0x11e   : > { %v948_v35 = vmax.f32 %v946_v33, 0.0 }
 0x120   : > { %v949_v36 = vpack.c.bf16 %v948_v35, %v947_v34 }
 0x122   : > { %1315 = vmatmul.mubr.msk.bf16.vlgmr.msra.gmra.mxu1 %vm966_vm2, %v949_v36 }
 0x1e2   : > { %v1004_v38 = vpop.f32.mrf.mxu1 }
 0x1e3   : > { %v1018_v39 = vadd.f32 %v1212_v37, %v1004_v38 }
 0x1e4   : > { %v1316_v40 = vpop.f32.mrf.mxu1 }
 0x1e5   : > { %1022 = vrot.lane.b32.xlu0 %v1018_v39, %s1419_s21 }
 0x1e6   : > { %v1007_v41 = vpop.f32.mrf.mxu1 }
 0x1e7   : > { %v1019_v42 = vadd.f32 %v1212_v37, %v1007_v41 }
 0x1e8   : > { %v1317_v43 = vpop.f32.mrf.mxu1 }
 0x1e9   : > { %1024 = vrot.lane.b32.xlu0 %v1019_v42, %s1419_s21 }
 0x1ed   : > { %1060 = vrot.lane.b32.xlu0 %v1215_v45, %s1421_s27 }
 0x257   : > { %v1023_v46 = vpop.permute.xlu0 %1022 }
 0x258   : > { %v1028_v47 = vmax.f32 %v1018_v39, %v1023_v46 }
 0x25a   : > { %v1213_v48 = vmul.f32 -1.442695, %v1028_v47 }
 0x25b   : > { %v1025_v49 = vpop.permute.xlu0 %1024 }
 0x25c   : > { %1401 = vpow2.f32 %v1213_v48  ;;  %v1029_v50 = vmax.f32 %v1019_v42, %v1025_v49 }
 0x25e   : > { %v1214_v51 = vmul.f32 -1.442695, %v1029_v50 }
 0x25f   : > { %v1061_v59 = vpop.permute.xlu0 %1060 }
 0x260   : > { %1403 = vpow2.f32 %v1214_v51 }
 0x269   : > { %v1402_v52 = vpop.eup %1401 }
 0x26a   : > { %v1036_v53 = vadd.f32 1.0, %v1402_v52 }
 0x26c   : > { %1405 = vrcp.f32 %v1036_v53 }
 0x26d   : > { %v1404_v54 = vpop.eup %1403 }
 0x26e   : > { %v1037_v55 = vadd.f32 1.0, %v1404_v54 }
 0x270   : > { %1407 = vrcp.f32 %v1037_v55 }
 0x279   : > { %v1406_v56 = vpop.eup %1405 }
 0x27a   : > { %1044 = vperm.xlu1 %1333, %v1406_v56  }
 0x27d   : > { %v1408_v57 = vpop.eup %1407 }
 0x27e   : > { %1049 = vperm.xlu1 %1333, %v1408_v57  }
 0x2f5   : > { %v1045_v58 = vpop.permute.xlu1 %1044 }
 0x2f6   : > { %v1052_v60 = vmul.f32 %v1045_v58, %v1004_v38 }
 0x2f8   : > { %v1063_v61 = vadd.f32 %v1061_v59, %v1052_v60 }
 0x2f9   : > { %v1050_v62 = vpop.permute.xlu1 %1049 }
 0x2fa   : > { %v1053_v63 = vmul.f32 %v1050_v62, %v1007_v41  ;;  %1067 = vrot.lane.b32.xlu1 %v1063_v61, %s1422_s28 }
 0x2fc   : > { %v1064_v0 = vadd.f32 %v1061_v59, %v1053_v63 }
 0x2fe   : > { %1069 = vrot.lane.b32.xlu0 %v1064_v0, %s1422_s28 }
 0x36c   : > { %v1068_v1 = vpop.permute.xlu1 %1067 }
 0x36d   : > { %v1073_v2 = vsel %vm966_vm2, %v947_v34, %v1068_v1 }
 0x36e   : > { %v1076_v3 = vsel %vm1075_vm3, %v1073_v2, 0.0 }
 0x36f   : > { %1078 = vst [vmem:[%s283_s9] sm:$0xff] %v1076_v3 }
 0x370   : > { %v1070_v4 = vpop.permute.xlu0 %1069 }
 0x371   : > { %v1074_v5 = vsel %vm966_vm2, %v948_v35, %v1070_v4 }
 0x372   : > { %v1077_v6 = vsel %vm1075_vm3, %v1074_v5, 0.0 }
 0x373   : > { %1079 = vst [vmem:[%s283_s9 + $0x8] sm:$0xff] %v1077_v6 }
 0x374 PF: > { %s17_s24 = sadd.s32 1, %s1415_s24  }
 0x375   : > { %p14_p4 = scmp.ge.s32.totalorder %s17_s24, 4  }
 0x377   :  { %16 = sbr.rel (!%p14_p4) target bundleno = 1 (0x1), region = 78 }

// kernel: one_stage_forward.13
= control target key start
LH: loop header
LB: loop body
LE: loop exit
PB: predicated region body
PF: predicated region fallthrough
CT: control target
= control target key end

     0   :  { %s1699_s24 = smov 0   ;;  %s1988_s0 = inlined_call_operand.vmem [shape: bf16[128,576], index: 0, kind: input, shape index: {}]   ;;  %s1989_s1 = inlined_call_operand.vmem [shape: bf16[576,32], index: 1, kind: input, shape index: {}]   ;;  %s1990_s2 = inlined_call_operand.vmem [shape: f32[1,32], index: 2, kind: input, shape index: {}]   ;;  %s1991_s3 = inlined_call_operand.vmem [shape: f32[1,32], index: 3, kind: input, shape index: {}]   ;;  %s1992_s4 = inlined_call_operand.vmem [shape: bf16[32,10], index: 4, kind: input, shape index: {}]   ;;  %s1993_s5 = inlined_call_operand.vmem [shape: f32[1,2], index: 5, kind: input, shape index: {}]   ;;  %s1994_s6 = inlined_call_operand.vmem [shape: f32[1,8], index: 6, kind: input, shape index: {}]   ;;  %s1995_s7 = inlined_call_operand.vmem [shape: f32[128,128], index: 7, kind: output, shape index: {}]  }
   0x1 LB: > { %s1323_s25 = sadd.s32 4294967295, %s1653_s24   ;;  %p1327_p0 = scmp.ge.s32.totalorder %s1653_s24, 1  ;;  %s1653_s24 = sphi %s1699_s24, %s17_s24  }
   0x2   : > { %p239_p1 = scmp.lt.s32.totalorder %s1653_s24, 3 }
   0x4   : > { %p240_p2 = pnand %p1327_p0, %p239_p1 }
   0x5   : > { %s1328_s12 = sshll.u32 (!%p240_p2), %s1323_s25, 3  ;;  %s1655_s28 = smov (!%p240_p2), 127  }
   0x6   : > { %243 = sbr.rel (%p240_p2) target bundleno = 905 (0x389), region = 48  ;;  %p273_p3 = scmp.lt.s32.totalorder (!%p240_p2), %s1328_s12, 15 }
   0x7   : > { %s1657_s8 = smov (!%p240_p2), 2   ;;  %s1658_s9 = smov (!%p240_p2), 30  }
   0xb   : > { %v1549_v0 = vld [vmem:[%s1989_s1 + $0x78] sm:$0xff]   ;;  %v1553_v4 = vld [vmem:[%s1989_s1 + $0x70] sm:$0xff]   ;;  %v1557_v8 = vld [vmem:[%s1989_s1 + $0x68] sm:$0xff]   ;;  %s1997_s12 = smov (!%p273_p3, %s1328_s12), 15  ;;  %vm698_vm0 = vcmask 523264   ;;  %vm964_vm1 = vcmask 261120  }
   0xc   : > { %v1550_v1 = vld [vmem:[%s1989_s1 + $0xf8] sm:$0xff]   ;;  %1412 = vmatprep.subr.bf16.mxu0 %v1549_v0  ;;  %v1554_v5 = vld [vmem:[%s1989_s1 + $0xf0] sm:$0xff]   ;;  %v1558_v9 = vld [vmem:[%s1989_s1 + $0xe8] sm:$0xff]   ;;  %s1534_s14 = smul.u32 20, %s1997_s12  ;;  %s1331_s10 = sshll.u32 %s1997_s12, 3  ;;  %vm1250_vm2 = vcmask 326656  }
   0xd   : > { %v1551_v2 = vld [vmem:[%s1989_s1 + $0x38] sm:$0xff]   ;;  %1452 = vmatprep.subr.bf16.mxu1 %v1550_v1  ;;  %v1555_v6 = vld [vmem:[%s1989_s1 + $0x30] sm:$0xff]   ;;  %v1559_v10 = vld [vmem:[%s1989_s1 + $0x28] sm:$0xff]  }
   0xe   : > { %v1552_v3 = vld [vmem:[%s1989_s1 + $0xb8] sm:$0xff]   ;;  %1413 = vmatpush3.bf16.msra.mxu0 %v1551_v2  ;;  %v1556_v7 = vld [vmem:[%s1989_s1 + $0xb0] sm:$0xff]   ;;  %v1560_v11 = vld [vmem:[%s1989_s1 + $0xa8] sm:$0xff]   ;;  %s1805_s26 = scalar_lea.vmem %s1988_s0, %s1534_s14  ;;  %s1943_s14 = scalar_lea.vmem %s1995_s7, %s1331_s10 }
   0xf   : > { %1453 = vmatpush3.bf16.msra.mxu1 %v1552_v3  ;;  %1414 = vmatprep.subr.bf16.mxu0 %v1553_v4  ;;  %v1561_v12 = vld [vmem:[%s1989_s1 + $0x60] sm:$0xff]   ;;  %v1565_v16 = vld [vmem:[%s1989_s1 + $0x58] sm:$0xff]   ;;  %v1569_v20 = vld [vmem:[%s1989_s1 + $0x50] sm:$0xff]  }
  0x10   : > { %1454 = vmatprep.subr.bf16.mxu1 %v1554_v5  ;;  %v1562_v13 = vld [vmem:[%s1989_s1 + $0xe0] sm:$0xff]   ;;  %v1566_v17 = vld [vmem:[%s1989_s1 + $0xd8] sm:$0xff]   ;;  %v1570_v21 = vld [vmem:[%s1989_s1 + $0xd0] sm:$0xff]  }
  0x11   : > { %v1563_v14 = vld [vmem:[%s1989_s1 + $0x20] sm:$0xff]   ;;  %v1567_v18 = vld [vmem:[%s1989_s1 + $0x18] sm:$0xff]   ;;  %v1571_v22 = vld [vmem:[%s1989_s1 + $0x10] sm:$0xff]  }
  0x12   : > { %1415 = vmatpush3.bf16.msra.mxu0 %v1555_v6  ;;  %v1564_v15 = vld [vmem:[%s1989_s1 + $0xa0] sm:$0xff]   ;;  %v1568_v19 = vld [vmem:[%s1989_s1 + $0x98] sm:$0xff]   ;;  %v1572_v23 = vld [vmem:[%s1989_s1 + $0x90] sm:$0xff]  }
  0x13   : > { %1455 = vmatpush3.bf16.msra.mxu1 %v1556_v7  ;;  %1416 = vmatprep.subr.bf16.mxu0 %v1557_v8  ;;  %v1573_v24 = vld [vmem:[%s1989_s1 + $0x48] sm:$0xff]   ;;  %v1577_v28 = vld [vmem:[%s1989_s1 + $0x40] sm:$0xff]   ;;  %v1587_v36 = vld [vmem:[%s1989_s1 + $0x118] sm:$0xff]  }
  0x14   : > { %1456 = vmatprep.subr.bf16.mxu1 %v1558_v9  ;;  %v1574_v25 = vld [vmem:[%s1989_s1 + $0xc8] sm:$0xff]   ;;  %v1578_v29 = vld [vmem:[%s1989_s1 + $0xc0] sm:$0xff]   ;;  %v1594_v39 = vld [vmem:[%s1989_s1 + $0x110] sm:$0xff]  }
  0x15   : > { %v1575_v26 = vld [vmem:[%s1989_s1 + $0x8] sm:$0xff]   ;;  %v1579_v30 = vld [vmem:[%s1989_s1] sm:$0xff]   ;;  %v1597_v43 = vld [vmem:[%s1805_s26 + $0x5c] ss:$20 sps:$4 sm:$0xff]  }
  0x16   : > { %1417 = vmatpush3.bf16.msra.mxu0 %v1559_v10  ;;  %v1576_v27 = vld [vmem:[%s1989_s1 + $0x88] sm:$0xff]   ;;  %v1580_v31 = vld [vmem:[%s1989_s1 + $0x80] sm:$0xff]   ;;  %v1602_v48 = vld [vmem:[%s1805_s26 + $0x7c] ss:$20 sps:$4 sm:$0xff]  }
  0x17   : > { %1457 = vmatpush3.bf16.msra.mxu1 %v1560_v11  ;;  %1418 = vmatprep.subr.bf16.mxu0 %v1561_v12  ;;  %v1581_v32 = vld [vmem:[%s1805_s26] ss:$20 sps:$4 sm:$0xff]   ;;  %v1583_v33 = vld [vmem:[%s1805_s26 + $0x4] ss:$20 sps:$4 sm:$0xff]   ;;  %v1584_v34 = vld [vmem:[%s1805_s26 + $0x8] ss:$20 sps:$4 sm:$0xff]  }
  0x18   : > { %1458 = vmatprep.subr.bf16.mxu1 %v1562_v13  ;;  %v1586_v35 = vld [vmem:[%s1805_s26 + $0xc] ss:$20 sps:$4 sm:$0xff]   ;;  %743 = vmatprep.mubr.bf16.mxu0 %v1583_v33  ;;  %v1590_v38 = vld [vmem:[%s1805_s26 + $0x34] ss:$20 sps:$4 sm:$0xff]   ;;  %v1593_v41 = vld [vmem:[%s1805_s26 + $0x30] ss:$20 sps:$4 sm:$0xff]  }
  0x19   : > { %808 = vmatprep.mubr.bf16.mxu1 %v1586_v35  ;;  %v1588_v37 = vld [vmem:[%s1805_s26 + $0x2c] ss:$20 sps:$4 sm:$0xff]   ;;  %v1592_v40 = vld [vmem:[%s1805_s26 + $0x28] ss:$20 sps:$4 sm:$0xff]   ;;  %v1599_v46 = vld [vmem:[%s1805_s26 + $0x50] ss:$20 sps:$4 sm:$0xff]  }
  0x1a   : > { %1419 = vmatpush3.bf16.msra.mxu0 %v1563_v14  ;;  %v1595_v42 = vld [vmem:[%s1805_s26 + $0x54] ss:$20 sps:$4 sm:$0xff]   ;;  %v1608_v45 = vld [vmem:[%s1989_s1 + $0x100] sm:$0xff]   ;;  %v1600_v47 = vld [vmem:[%s1805_s26 + $0x58] ss:$20 sps:$4 sm:$0xff]  }
  0x1b   : > { %1459 = vmatpush3.bf16.msra.mxu1 %v1564_v15  ;;  %1420 = vmatprep.subr.bf16.mxu0 %v1565_v16  ;;  %v1601_v44 = vld [vmem:[%s1989_s1 + $0x108] sm:$0xff]   ;;  %v1604_v49 = vld [vmem:[%s1805_s26 + $0x84] ss:$20 sps:$4 sm:$0xff]   ;;  %v1607_v51 = vld [vmem:[%s1805_s26 + $0x80] ss:$20 sps:$4 sm:$0xff]  }
  0x1c   : > { %1460 = vmatprep.subr.bf16.mxu1 %v1566_v17  ;;  %v1606_v50 = vld [vmem:[%s1805_s26 + $0x78] ss:$20 sps:$4 sm:$0xff]   ;;  %v1609_v52 = vld [vmem:[%s1805_s26 + $0x10] ss:$20 sps:$4 sm:$0xff]   ;;  %v1611_v54 = vld [vmem:[%s1805_s26 + $0x60] ss:$20 sps:$4 sm:$0xff]  }
  0x1d   : > { %v1610_v53 = vld [vmem:[%s1805_s26 + $0x38] ss:$20 sps:$4 sm:$0xff]   ;;  %v1612_v55 = vld [vmem:[%s1805_s26 + $0x88] ss:$20 sps:$4 sm:$0xff]   ;;  %v1614_v57 = vld [vmem:[%s1992_s4] sm:$0xff]  }
  0x1e   : > { %1421 = vmatpush3.bf16.msra.mxu0 %v1567_v18  ;;  %v1613_v56 = vld [vmem:[%s1992_s4 + $0x8] sm:$0xff]  }
  0x1f   : > { %1461 = vmatpush3.bf16.msra.mxu1 %v1568_v19  ;;  %1422 = vmatprep.subr.bf16.mxu0 %v1569_v20 }
  0x20   : > { %1462 = vmatprep.subr.bf16.mxu1 %v1570_v21 }
  0x22   : > { %1423 = vmatpush3.bf16.msra.mxu0 %v1571_v22 }
  0x23   : > { %1463 = vmatpush3.bf16.msra.mxu1 %v1572_v23  ;;  %1424 = vmatprep.subr.bf16.mxu0 %v1573_v24 }
  0x24   : > { %1464 = vmatprep.subr.bf16.mxu1 %v1574_v25 }
  0x26   : > { %1425 = vmatpush3.bf16.msra.mxu0 %v1575_v26 }
  0x27   : > { %1465 = vmatpush3.bf16.msra.mxu1 %v1576_v27  ;;  %1426 = vmatprep.subr.bf16.mxu0 %v1577_v28 }
  0x28   : > { %1466 = vmatprep.subr.bf16.mxu1 %v1578_v29 }
  0x2a   : > { %1427 = vmatpush3.bf16.msra.mxu0 %v1579_v30 }
  0x2b   : > { %1467 = vmatpush3.bf16.msra.mxu1 %v1580_v31  ;;  %1506 = vmatprep.subr.bf16.mxu0 %v1587_v36 }
  0x2c   : > { %1522 = vmatprep.subr.bf16.mxu1 %v1613_v56 }
  0x2d   : > { %744 = vmatmul.mubr.bf16.vlgmr.msra.gmra.mxu0 %v1581_v32 }
  0x2e   : > { %809 = vmatmul.mubr.bf16.vlgmr.msra.gmra.mxu1 %v1584_v34  ;;  %1507 = vmatpush3.bf16.msra.mxu0 %v1587_v36 }
  0x2f   : > { %751 = vmatprep.mubr.bf16.mxu0 %v1588_v37  ;;  %816 = vmatprep.mubr.bf16.mxu1 %v1590_v38 }
  0x30   : > { %1508 = vmatprep.subr.bf16.mxu0 %v1594_v39  ;;  %1523 = vmatpush3.bf16.msra.mxu1 %v1613_v56 }
  0x31   : > { %1524 = vmatprep.subr.bf16.mxu1 %v1614_v57 }
  0x32   : > { %1509 = vmatpush3.bf16.msra.mxu0 %v1594_v39 }
  0x33   : > { %1510 = vmatprep.subr.bf16.mxu0 %v1601_v44 }
  0x34   : > { %1525 = vmatpush3.bf16.msra.mxu1 %v1614_v57 }
  0x35   : > { %752 = vmatmul.mubr.bf16.gmra.mxu0 %v1592_v40  ;;  %v1392_v40 = vld [vmem:[%s1990_s2] ss:$0 sm:$0xff] }
  0x36   : > { %817 = vmatmul.mubr.bf16.gmra.mxu1 %v1593_v41  ;;  %759 = vmatprep.mubr.bf16.mxu0 %v1595_v42 }
  0x37   : > { %824 = vmatprep.mubr.bf16.mxu1 %v1597_v43  ;;  %1511 = vmatpush3.bf16.msra.mxu0 %v1601_v44 }
  0x38   : > { %1512 = vmatprep.subr.bf16.mxu0 %v1608_v45 }
  0x3b   : > { %1513 = vmatpush3.bf16.msra.mxu0 %v1608_v45 }
  0x3d   : > { %760 = vmatmul.mubr.bf16.gmra.mxu0 %v1599_v46 }
  0x3e   : > { %825 = vmatmul.mubr.bf16.gmra.mxu1 %v1600_v47  ;;  %767 = vmatprep.mubr.bf16.mxu0 %v1602_v48 }
  0x3f   : > { %832 = vmatprep.mubr.bf16.mxu1 %v1604_v49 }
  0x45   : > { %768 = vmatmul.mubr.bf16.gmra.mxu0 %v1606_v50 }
  0x46   : > { %833 = vmatmul.mubr.bf16.gmra.mxu1 %v1607_v51  ;;  %1514 = vmatprep.mubr.msk.bf16.mxu0 %vm698_vm0, %v1609_v52  ;;  %v1393_v52 = vld [vmem:[%s1991_s3] ss:$0 sm:$0xff] }
  0x4d   : > { %1515 = vmatmul.mubr.msk.bf16.vlgmr.msra.gmra.mxu0 %vm698_vm0, %v1610_v53 }
  0x4e   : > { %1518 = vmatprep.mubr.msk.bf16.mxu0 %vm698_vm0, %v1611_v54 }
  0x55   : > { %1519 = vmatmul.mubr.msk.bf16.gmra.mxu0 %vm698_vm0, %v1612_v55 }
  0xed   : > { %v1428_v58 = vpop.f32.mrf.mxu0 }
  0xee   : > { %v1468_v59 = vpop.f32.mrf.mxu1 }
  0xef   : > { %v1429_v60 = vpop.f32.mrf.mxu0 }
  0xf0   : > { %v1469_v61 = vpop.f32.mrf.mxu1  ;;  %v1430_v24 = vadd.f32 %v1429_v60, %v1428_v58 }
  0xf1   : > { %v1431_v62 = vpop.f32.mrf.mxu0  ;;  %v1470_v25 = vadd.f32 %v1469_v61, %v1468_v59 }
  0xf2   : > { %v1471_v63 = vpop.f32.mrf.mxu1 }
  0xf3   : > { %v1432_v0 = vpop.f32.mrf.mxu0  ;;  %v811_v35 = vadd.f32 %v1470_v25, %v1430_v24 }
  0xf4   : > { %v1472_v1 = vpop.f32.mrf.mxu1  ;;  %v1433_v32 = vadd.f32 %v1432_v0, %v1431_v62 }
  0xf5   : > { %v1434_v2 = vpop.f32.mrf.mxu0  ;;  %v1473_v33 = vadd.f32 %v1472_v1, %v1471_v63 }
  0xf6   : > { %v1474_v3 = vpop.f32.mrf.mxu1 }
  0xf7   : > { %v1435_v4 = vpop.f32.mrf.mxu0  ;;  %v814_v49 = vadd.f32 %v1473_v33, %v1433_v32  ;;  %v1400_v32 = vld [vmem:[%s1993_s5] ss:$0 sm:$0xff] }
  0xf8   : > { %v1475_v5 = vpop.f32.mrf.mxu1  ;;  %v1436_v21 = vadd.f32 %v1435_v4, %v1434_v2 }
  0xf9   : > { %v1437_v6 = vpop.f32.mrf.mxu0  ;;  %v1476_v22 = vadd.f32 %v1475_v5, %v1474_v3 }
  0xfa   : > { %v1477_v7 = vpop.f32.mrf.mxu1 }
  0xfb   : > { %v1438_v8 = vpop.f32.mrf.mxu0  ;;  %v819_v30 = vadd.f32 %v1476_v22, %v1436_v21 }
  0xfc   : > { %v1478_v9 = vpop.f32.mrf.mxu1  ;;  %v1439_v28 = vadd.f32 %v1438_v8, %v1437_v6 }
  0xfd   : > { %v1440_v10 = vpop.f32.mrf.mxu0  ;;  %v1479_v29 = vadd.f32 %v1478_v9, %v1477_v7 }
  0xfe   : > { %v1480_v11 = vpop.f32.mrf.mxu1 }
  0xff   : > { %v1441_v12 = vpop.f32.mrf.mxu0  ;;  %v822_v42 = vadd.f32 %v1479_v29, %v1439_v28 }
 0x100   : > { %v1481_v13 = vpop.f32.mrf.mxu1  ;;  %v1442_v38 = vadd.f32 %v1441_v12, %v1440_v10 }
 0x101   : > { %v1443_v14 = vpop.f32.mrf.mxu0  ;;  %v1482_v39 = vadd.f32 %v1481_v13, %v1480_v11 }
 0x102   : > { %v1483_v15 = vpop.f32.mrf.mxu1 }
 0x103   : > { %v1444_v16 = vpop.f32.mrf.mxu0  ;;  %v827_v55 = vadd.f32 %v1482_v39, %v1442_v38 }
 0x104   : > { %v1484_v17 = vpop.f32.mrf.mxu1  ;;  %v1445_v56 = vadd.f32 %v1444_v16, %v1443_v14 }
 0x105   : > { %v1446_v18 = vpop.f32.mrf.mxu0  ;;  %v1485_v61 = vadd.f32 %v1484_v17, %v1483_v15 }
 0x106   : > { %v1486_v19 = vpop.f32.mrf.mxu1 }
 0x107   : > { %v1447_v20 = vpop.f32.mrf.mxu0  ;;  %v830_v12 = vadd.f32 %v1485_v61, %v1445_v56 }
 0x108   : > { %v1487_v26 = vpop.f32.mrf.mxu1  ;;  %v1448_v43 = vadd.f32 %v1447_v20, %v1446_v18 }
 0x109   : > { %v1449_v23 = vpop.f32.mrf.mxu0  ;;  %v1488_v44 = vadd.f32 %v1487_v26, %v1486_v19 }
 0x10a   : > { %v1489_v34 = vpop.f32.mrf.mxu1 }
 0x10b   : > { %v1450_v27 = vpop.f32.mrf.mxu0  ;;  %v835_v59 = vadd.f32 %v1488_v44, %v1448_v43 }
 0x10c   : > { %v1490_v46 = vpop.f32.mrf.mxu1  ;;  %v1451_v57 = vadd.f32 %v1450_v27, %v1449_v23 }
 0x10d   : > { %v1516_v31 = vpop.f32.mrf.mxu0  ;;  %v1491_v58 = vadd.f32 %v1490_v46, %v1489_v34 }
 0x10e   : > { %v884_v36 = vadd.f32 %v1516_v31, %v819_v30 }
 0x10f   : > { %v875_v37 = vpop.f32.mrf.mxu0  ;;  %v838_v7 = vadd.f32 %v1491_v58, %v1451_v57 }
 0x110   : > { %v876_v41 = vadd.f32 %v875_v37, %v811_v35  ;;  %v915_v50 = vmul.f32 %v1392_v40, %v884_v36 }
 0x111   : > { %v1517_v45 = vpop.f32.mrf.mxu0 }
 0x112   : > { %v913_v47 = vmul.f32 %v1392_v40, %v876_v41  ;;  %v887_v48 = vadd.f32 %v1517_v45, %v822_v42  ;;  %v1861_v1 = vadd.f32 %v1393_v52, %v915_v50 }
 0x113   : > { %v878_v51 = vpop.f32.mrf.mxu0 }
 0x114   : > { %v916_v53 = vmul.f32 %v1392_v40, %v887_v48  ;;  %v879_v54 = vadd.f32 %v878_v51, %v814_v49  ;;  %v1857_v62 = vadd.f32 %v1393_v52, %v913_v47  ;;  %v938_v13 = vmax.f32 %v1861_v1, 0.0 }
 0x115   : > { %v1520_v60 = vpop.f32.mrf.mxu0  ;;  %v1656_v49 = vmov 0  }
 0x116   : > { %v1859_v63 = vadd.f32 %v1393_v52, %v916_v53  ;;  %v914_v0 = vmul.f32 %v1392_v40, %v879_v54  ;;  %v900_v2 = vadd.f32 %v1520_v60, %v835_v59  ;;  %v936_v9 = vmax.f32 %v1857_v62, 0.0  ;;  %1547 = vset.pattern.permute.xlu1 %v1656_v49  ;;  %1548 = vset.pattern.permute.xlu0 %v1656_v49 }
 0x117   : > { %v891_v3 = vpop.f32.mrf.mxu0 }
 0x118   : > { %v1863_v4 = vadd.f32 %v1393_v52, %v914_v0  ;;  %v892_v5 = vadd.f32 %v891_v3, %v827_v55  ;;  %v939_v6 = vmax.f32 %v1859_v63, 0.0  ;;  %v919_v14 = vmul.f32 %v1392_v40, %v900_v2 }
 0x119   : > { %v1521_v8 = vpop.f32.mrf.mxu0 }
 0x11a   : > { %v937_v10 = vmax.f32 %v1863_v4, 0.0  ;;  %v917_v11 = vmul.f32 %v1392_v40, %v892_v5  ;;  %v903_v15 = vadd.f32 %v1521_v8, %v838_v7  ;;  %v945_v19 = vpack.c.bf16 %v939_v6, %v938_v13 }
 0x11b   : > { %v894_v16 = vpop.f32.mrf.mxu0  ;;  %v1880_v23 = vadd.f32 %v1393_v52, %v919_v14 }
 0x11c   : > { %v944_v17 = vpack.c.bf16 %v937_v10, %v936_v9  ;;  %v895_v18 = vadd.f32 %v894_v16, %v830_v12  ;;  %v920_v20 = vmul.f32 %v1392_v40, %v903_v15  ;;  %v1877_v21 = vadd.f32 %v1393_v52, %v917_v11 }
 0x11d   : > { %v942_v29 = vmax.f32 %v1880_v23, 0.0 }
 0x11e   : > { %v918_v22 = vmul.f32 %v1392_v40, %v895_v18  ;;  %1526 = vmatprep.mubr.msk.bf16.mxu1 %vm964_vm1, %v944_v17  ;;  %v1882_v24 = vadd.f32 %v1393_v52, %v920_v20  ;;  %v940_v27 = vmax.f32 %v1877_v21, 0.0 }
 0x11f   : > { %1527 = vmatmul.mubr.msk.bf16.vlgmr.msra.gmra.mxu1 %vm964_vm1, %v945_v19 }
 0x120   : > { %v1885_v25 = vadd.f32 %v1393_v52, %v918_v22  ;;  %v943_v26 = vmax.f32 %v1882_v24, 0.0 }
 0x122   : > { %v941_v28 = vmax.f32 %v1885_v25, 0.0  ;;  %v947_v31 = vpack.c.bf16 %v943_v26, %v942_v29 }
 0x124   : > { %v946_v30 = vpack.c.bf16 %v941_v28, %v940_v27 }
 0x126   : > { %1530 = vmatprep.mubr.msk.bf16.mxu1 %vm964_vm1, %v946_v30 }
 0x127   : > { %1531 = vmatmul.mubr.msk.bf16.gmra.mxu1 %vm964_vm1, %v947_v31 }
 0x1df   : > { %v1904_v33 = vpop.f32.mrf.mxu1 }
 0x1e0   : > { %v1051_v34 = vadd.f32 %v1904_v33, %v1400_v32 }
 0x1e1   : > { %v1907_v35 = vpop.f32.mrf.mxu1 }
 0x1e2   : > { %1069 = vrot.lane.b32.xlu1 %v1051_v34, %s1655_s28  ;;  %v1049_v36 = vadd.f32 %v1400_v32, %v1907_v35 }
 0x1e3   : > { %v1910_v37 = vpop.f32.mrf.mxu1 }
 0x1e4   : > { %v1052_v38 = vadd.f32 %v1910_v37, %v1400_v32  ;;  %1065 = vrot.lane.b32.xlu0 %v1049_v36, %s1655_s28 }
 0x1e5   : > { %v1913_v39 = vpop.f32.mrf.mxu1 }
 0x1e6   : > { %v1050_v40 = vadd.f32 %v1400_v32, %v1913_v39  ;;  %1071 = vrot.lane.b32.xlu1 %v1052_v38, %s1655_s28 }
 0x1e7   : > { %v1916_v41 = vpop.f32.mrf.mxu1 }
 0x1e8   : > { %1067 = vrot.lane.b32.xlu0 %v1050_v40, %s1655_s28  ;;  %v1055_v46 = vadd.f32 %v1916_v41, %v1400_v32 }
 0x1e9   : > { %v1918_v42 = vpop.f32.mrf.mxu1 }
 0x1ea   : > { %v1053_v43 = vadd.f32 %v1400_v32, %v1918_v42 }
 0x1eb   : > { %v1921_v44 = vpop.f32.mrf.mxu1 }
 0x1ec   : > { %1073 = vrot.lane.b32.xlu0 %v1053_v43, %s1655_s28  ;;  %v1056_v48 = vadd.f32 %v1921_v44, %v1400_v32 }
 0x1ed   : > { %v1923_v45 = vpop.f32.mrf.mxu1 }
 0x1ee   : > { %v1054_v47 = vadd.f32 %v1400_v32, %v1923_v45 }
 0x1f0   : > { %1077 = vrot.lane.b32.xlu0 %v1055_v46, %s1655_s28  ;;  %1075 = vrot.lane.b32.xlu1 %v1054_v47, %s1655_s28 }
 0x1f4   : > { %1079 = vrot.lane.b32.xlu1 %v1056_v48, %s1655_s28 }
 0x254   : > { %v1070_v50 = vpop.permute.xlu1 %1069 }
 0x255   : > { %v1091_v51 = vmax.f32 %v1051_v34, %v1070_v50 }
 0x256   : > { %v1066_v52 = vpop.permute.xlu0 %1065 }
 0x257   : > { %v1403_v53 = vmul.f32 -1.442695, %v1091_v51  ;;  %v1089_v54 = vmax.f32 %v1049_v36, %v1066_v52 }
 0x258   : > { %v1072_v55 = vpop.permute.xlu1 %1071 }
 0x259   : > { %1615 = vpow2.f32 %v1403_v53  ;;  %v1401_v56 = vmul.f32 -1.442695, %v1089_v54  ;;  %v1092_v57 = vmax.f32 %v1052_v38, %v1072_v55 }
 0x25a   : > { %v1068_v58 = vpop.permute.xlu0 %1067 }
 0x25b   : > { %1617 = vpow2.f32 %v1401_v56  ;;  %v1404_v59 = vmul.f32 -1.442695, %v1092_v57  ;;  %v1090_v60 = vmax.f32 %v1050_v40, %v1068_v58  ;;  %v1409_v57 = vld [vmem:[%s1994_s6] ss:$0 sm:$0xff] }
 0x25d   : > { %1619 = vpow2.f32 %v1404_v59  ;;  %v1402_v61 = vmul.f32 -1.442695, %v1090_v60 }
 0x25e   : > { %v1074_v0 = vpop.permute.xlu0 %1073 }
 0x25f   : > { %1621 = vpow2.f32 %v1402_v61  ;;  %v1093_v2 = vmax.f32 %v1053_v43, %v1074_v0 }
 0x261   : > { %v1405_v3 = vmul.f32 -1.442695, %v1093_v2 }
 0x262   : > { %v1078_v5 = vpop.permute.xlu0 %1077  ;;  %v1076_v7 = vpop.permute.xlu1 %1075 }
 0x263   : > { %1623 = vpow2.f32 %v1405_v3  ;;  %v1095_v8 = vmax.f32 %v1055_v46, %v1078_v5  ;;  %v1094_v11 = vmax.f32 %v1054_v47, %v1076_v7 }
 0x265   : > { %v1407_v12 = vmul.f32 -1.442695, %v1095_v8  ;;  %v1406_v14 = vmul.f32 -1.442695, %v1094_v11 }
 0x266   : > { %v1616_v15 = vpop.eup %1615  ;;  %v1080_v16 = vpop.permute.xlu1 %1079 }
 0x267   : > { %v1123_v17 = vadd.f32 1.0, %v1616_v15  ;;  %1625 = vpow2.f32 %v1407_v12  ;;  %v1096_v18 = vmax.f32 %v1056_v48, %v1080_v16 }
 0x268   : > { %v1618_v19 = vpop.eup %1617  ;;  %1627 = vpow2.f32 %v1406_v14 }
 0x269   : > { %1629 = vrcp.f32 %v1123_v17  ;;  %v1121_v20 = vadd.f32 1.0, %v1618_v19  ;;  %v1408_v22 = vmul.f32 -1.442695, %v1096_v18 }
 0x26a   : > { %v1620_v30 = vpop.eup %1619 }
 0x26b   : > { %1631 = vrcp.f32 %v1121_v20  ;;  %v1124_v31 = vadd.f32 1.0, %v1620_v30 }
 0x26c   : > { %v1622_v32 = vpop.eup %1621  ;;  %1633 = vpow2.f32 %v1408_v22 }
 0x26d   : > { %v1122_v34 = vadd.f32 1.0, %v1622_v32  ;;  %1635 = vrcp.f32 %v1124_v31 }
 0x26f   : > { %1637 = vrcp.f32 %v1122_v34 }
 0x270   : > { %v1624_v36 = vpop.eup %1623 }
 0x271   : > { %v1125_v38 = vadd.f32 1.0, %v1624_v36 }
 0x273   : > { %1639 = vrcp.f32 %v1125_v38 }
 0x274   : > { %v1626_v40 = vpop.eup %1625 }
 0x275   : > { %v1628_v43 = vpop.eup %1627  ;;  %v1127_v46 = vadd.f32 1.0, %v1626_v40 }
 0x276   : > { %v1630_v47 = vpop.eup %1629  ;;  %v1126_v48 = vadd.f32 1.0, %v1628_v43 }
 0x277   : > { %1641 = vrcp.f32 %v1127_v46  ;;  %1157 = vperm.xlu1 %1547, %v1630_v47  }
 0x278   : > { %v1632_v49 = vpop.eup %1631  ;;  %1643 = vrcp.f32 %v1126_v48 }
 0x279   : > { %v1634_v50 = vpop.eup %1633  ;;  %1147 = vperm.xlu0 %1548, %v1632_v49  }
 0x27a   : > { %v1128_v51 = vadd.f32 1.0, %v1634_v50  ;;  %v1636_v52 = vpop.eup %1635 }
 0x27c   : > { %v1638_v53 = vpop.eup %1637  ;;  %1645 = vrcp.f32 %v1128_v51 }
 0x27d   : > { %1162 = vperm.xlu0 %1548, %v1636_v52   ;;  %1152 = vperm.xlu1 %1547, %v1638_v53  }
 0x280   : > { %v1640_v54 = vpop.eup %1639 }
 0x281   : > { %1167 = vperm.xlu1 %1547, %v1640_v54  }
 0x284   : > { %v1642_v55 = vpop.eup %1641 }
 0x285   : > { %v1644_v56 = vpop.eup %1643  ;;  %1177 = vperm.xlu1 %1547, %v1642_v55  }
 0x286   : > { %1172 = vperm.xlu0 %1548, %v1644_v56  }
 0x289   : > { %v1646_v58 = vpop.eup %1645  ;;  %1199 = vrot.lane.b32.xlu1 %v1409_v57, %s1657_s8 }
 0x28a   : > { %1182 = vperm.xlu0 %1548, %v1646_v58  }
 0x2f2   : > { %v1158_v59 = vpop.permute.xlu1 %1157 }
 0x2f3   : > { %v1187_v5 = vmul.f32 %v1904_v33, %v1158_v59 }
 0x2f4   : > { %v1148_v61 = vpop.permute.xlu0 %1147 }
 0x2f5   : > { %v1185_v15 = vmul.f32 %v1148_v61, %v1907_v35 }
 0x2f8   : > { %v1153_v60 = vpop.permute.xlu1 %1152  ;;  %v1163_v2 = vpop.permute.xlu0 %1162 }
 0x2f9   : > { %v1188_v7 = vmul.f32 %v1910_v37, %v1163_v2  ;;  %v1186_v16 = vmul.f32 %v1153_v60, %v1913_v39 }
 0x2fc   : > { %v1168_v0 = vpop.permute.xlu1 %1167 }
 0x2fd   : > { %v1189_v20 = vmul.f32 %v1168_v0, %v1918_v42 }
 0x300   : > { %v1178_v3 = vpop.permute.xlu1 %1177 }
 0x301   : > { %v1173_v8 = vpop.permute.xlu0 %1172  ;;  %v1191_v35 = vmul.f32 %v1916_v41, %v1178_v3 }
 0x302   : > { %v1190_v33 = vmul.f32 %v1173_v8, %v1923_v45 }
 0x304   : > { %v1200_v11 = vpop.permute.xlu1 %1199 }
 0x305   : > { %v1205_v12 = vadd.f32 %v1200_v11, %v1188_v7  ;;  %v1204_v14 = vadd.f32 %v1200_v11, %v1187_v5  ;;  %v1203_v17 = vadd.f32 %v1200_v11, %v1186_v16  ;;  %v1202_v18 = vadd.f32 %v1200_v11, %v1185_v15  ;;  %v1183_v19 = vpop.permute.xlu0 %1182 }
 0x306   : > { %v1192_v37 = vmul.f32 %v1921_v44, %v1183_v19  ;;  %v1207_v22 = vadd.f32 %v1200_v11, %v1190_v33  ;;  %v1206_v30 = vadd.f32 %v1200_v11, %v1189_v20  ;;  %v1208_v31 = vadd.f32 %v1200_v11, %v1191_v35 }
 0x307   : > { %1224 = vrot.lane.b32.xlu1 %v1205_v12, %s1658_s9  ;;  %1222 = vrot.lane.b32.xlu0 %v1204_v14, %s1658_s9 }
 0x308   : > { %v1209_v39 = vadd.f32 %v1200_v11, %v1192_v37 }
 0x30b   : > { %1220 = vrot.lane.b32.xlu1 %v1203_v17, %s1658_s9  ;;  %1218 = vrot.lane.b32.xlu0 %v1202_v18, %s1658_s9 }
 0x30f   : > { %1228 = vrot.lane.b32.xlu1 %v1207_v22, %s1658_s9  ;;  %1226 = vrot.lane.b32.xlu0 %v1206_v30, %s1658_s9 }
 0x313   : > { %1232 = vrot.lane.b32.xlu1 %v1209_v39, %s1658_s9  ;;  %1230 = vrot.lane.b32.xlu0 %v1208_v31, %s1658_s9 }
 0x379   : > { %v1225_v42 = vpop.permute.xlu1 %1224  ;;  %v1223_v44 = vpop.permute.xlu0 %1222 }
 0x37a   : > { %v1245_v41 = vsel %vm964_vm1, %v939_v6, %v1225_v42  ;;  %v1244_v45 = vsel %vm964_vm1, %v938_v13, %v1223_v44 }
 0x37b   : > { %v1254_v32 = vsel %vm1250_vm2, %v1245_v41, 0.0  ;;  %v1253_v34 = vsel %vm1250_vm2, %v1244_v45, 0.0 }
 0x37c   : > { %1262 = vst [vmem:[%s1943_s14 + $0x18] sm:$0xff] %v1254_v32  ;;  %1261 = vst [vmem:[%s1943_s14 + $0x10] sm:$0xff] %v1253_v34 }
 0x37d   : > { %v1221_v36 = vpop.permute.xlu1 %1220  ;;  %v1219_v38 = vpop.permute.xlu0 %1218 }
 0x37e   : > { %v1243_v63 = vsel %vm964_vm1, %v937_v10, %v1221_v36  ;;  %v1242_v1 = vsel %vm964_vm1, %v936_v9, %v1219_v38 }
 0x37f   : > { %v1252_v6 = vsel %vm1250_vm2, %v1243_v63, 0.0  ;;  %v1251_v13 = vsel %vm1250_vm2, %v1242_v1, 0.0 }
 0x380   : > { %1260 = vst [vmem:[%s1943_s14 + $0x8] sm:$0xff] %v1252_v6  ;;  %1259 = vst [vmem:[%s1943_s14] sm:$0xff] %v1251_v13 }
 0x381   : > { %v1229_v40 = vpop.permute.xlu1 %1228  ;;  %v1227_v43 = vpop.permute.xlu0 %1226 }
 0x382   : > { %v1247_v4 = vsel %vm964_vm1, %v941_v28, %v1229_v40  ;;  %v1246_v62 = vsel %vm964_vm1, %v940_v27, %v1227_v43 }
 0x383   : > { %v1256_v9 = vsel %vm1250_vm2, %v1247_v4, 0.0  ;;  %v1255_v10 = vsel %vm1250_vm2, %v1246_v62, 0.0 }
 0x384   : > { %1264 = vst [vmem:[%s1943_s14 + $0x28] sm:$0xff] %v1256_v9  ;;  %1263 = vst [vmem:[%s1943_s14 + $0x20] sm:$0xff] %v1255_v10 }
 0x385   : > { %v1233_v46 = vpop.permute.xlu1 %1232  ;;  %v1231_v47 = vpop.permute.xlu0 %1230 }
 0x386   : > { %v1249_v48 = vsel %vm964_vm1, %v943_v26, %v1233_v46  ;;  %v1248_v25 = vsel %vm964_vm1, %v942_v29, %v1231_v47 }
 0x387   : > { %v1258_v21 = vsel %vm1250_vm2, %v1249_v48, 0.0  ;;  %v1257_v27 = vsel %vm1250_vm2, %v1248_v25, 0.0 }
 0x388   : > { %1266 = vst [vmem:[%s1943_s14 + $0x38] sm:$0xff] %v1258_v21  ;;  %1265 = vst [vmem:[%s1943_s14 + $0x30] sm:$0xff] %v1257_v27 }
 0x389 PF: > { %s17_s24 = sadd.s32 1, %s1653_s24  }
 0x38a   : > { %p14_p4 = scmp.ge.s32.totalorder %s17_s24, 4  }
 0x38c   :  { %16 = sbr.rel (!%p14_p4) target bundleno = 1 (0x1), region = 78 }

</bundles_post_ra>
